<compile_context>
chip_gen: v5e
topology: v5e:2x2
jax: 0.10.0
libtpu: 0.0.40
codegen_flags: <defaults>
</compile_context>

<pallas_src>
import jax
import jax.numpy as jnp
import numpy as np
from jax.experimental import pallas as pl
from jax.experimental.pallas import tpu as pltpu


LANE = 128
# Explicit scoped-VMEM budget: safe on v5e/v6e (128 MiB) and within v7x's
# 64 MiB physical with headroom; all blocks here are far smaller anyway.
_VMEM_LIMIT = 32 * 1024 * 1024


def _round_up(x, m):
  return ((x + m - 1) // m) * m


def _pad_to(a, axis, size):
  if a.shape[axis] == size:
    return a
  pad = [(0, 0)] * a.ndim
  pad[axis] = (0, size - a.shape[axis])
  return jnp.pad(a, pad)


# ----------------------------------------------------------------------------
# Fused Conv3x3 (pad=1) + bias + per-channel sum / sum-of-squares
# ----------------------------------------------------------------------------
def _make_conv3x3_kernel(n_parts):
  """Kernel factory.

  Per grid step (n, h), the refs are:
    for each part p: 3 refs holding padded-input rows h, h+1, h+2
                     -> block (1, 1, W_out + 2, C_p)
    one weight ref per part          -> block (3, 3, C_p, C_out_p)
    bias ref                         -> block (1, C_out_p)
  Outputs:
    y row                            -> block (1, 1, W_out, C_out_p)
    per-batch channel sum / sumsq    -> block (1, 1, C_out_p), resident over h
  """

  def kernel(*refs):
    row_refs = refs[:3 * n_parts]
    w_refs = refs[3 * n_parts:4 * n_parts]
    b_ref = refs[4 * n_parts]
    y_ref, s_ref, ss_ref = refs[4 * n_parts + 1:4 * n_parts + 4]

    w_out = y_ref.shape[2]
    c_out = y_ref.shape[3]

    acc = jnp.zeros((w_out, c_out), jnp.float32)
    for part in range(n_parts):
      w_ref = w_refs[part]
      for ky in range(3):
        row = row_refs[3 * part + ky][0, 0]            # (w_out + 2, C_p)
        for kx in range(3):
          acc = acc + jnp.dot(row[kx:kx + w_out, :], w_ref[ky, kx],
                              preferred_element_type=jnp.float32)
    y = acc + b_ref[...]                               # (w_out, c_out) f32
    y_ref[0, 0] = y.astype(y_ref.dtype)

    # BatchNorm batch statistics folded into the conv pass (no extra re-read
    # of y just for sum / sumsq).
    @pl.when(pl.program_id(1) == 0)
    def _init():
      s_ref[...] = jnp.zeros_like(s_ref)
      ss_ref[...] = jnp.zeros_like(ss_ref)

    s_ref[0] += jnp.sum(y, axis=0, keepdims=True)
    ss_ref[0] += jnp.sum(y * y, axis=0, keepdims=True)

  return kernel


def conv3x3_bias_stats(xs_padded, ws, bias, cout_p, compute_dtype):
  """Conv2d(k=3, p=1) + bias, with per-channel sum/sumsq side outputs.

  xs_padded: list of spatially padded NHWC inputs (N, Ho+2, Wo+2, C_p); the
             logical conv input is their channel concatenation (fused, never
             materialized).
  ws:        list of matching weights (3, 3, C_p, cout_p).
  Returns (y, ch_sum, ch_sumsq): y is (N, Ho, Wo, cout_p) in compute_dtype.
  """
  n_parts = len(xs_padded)
  n, hp, wp, _ = xs_padded[0].shape
  ho, wo = hp - 2, wp - 2

  args, in_specs = [], []
  for xp in xs_padded:
    c_p = xp.shape[-1]
    for ky in range(3):
      args.append(xp)
      in_specs.append(
          pl.BlockSpec((1, 1, wp, c_p),
                       lambda nn, hh, ky=ky: (nn, hh + ky, 0, 0)))
  for w in ws:
    args.append(w.astype(compute_dtype))
    in_specs.append(pl.BlockSpec(w.shape, lambda nn, hh: (0, 0, 0, 0)))
  args.append(bias.reshape(1, cout_p).astype(jnp.float32))
  in_specs.append(pl.BlockSpec((1, cout_p), lambda nn, hh: (0, 0)))

  out_shape = (
      jax.ShapeDtypeStruct((n, ho, wo, cout_p), compute_dtype),
      jax.ShapeDtypeStruct((n, 1, cout_p), jnp.float32),
      jax.ShapeDtypeStruct((n, 1, cout_p), jnp.float32),
  )
  out_specs = (
      pl.BlockSpec((1, 1, wo, cout_p), lambda nn, hh: (nn, hh, 0, 0)),
      pl.BlockSpec((1, 1, cout_p), lambda nn, hh: (nn, 0, 0)),
      pl.BlockSpec((1, 1, cout_p), lambda nn, hh: (nn, 0, 0)),
  )

  y, s, ss = pl.pallas_call(
      _make_conv3x3_kernel(n_parts),
      out_shape=out_shape,
      grid=(n, ho),
      in_specs=in_specs,
      out_specs=out_specs,
      compiler_params=pltpu.CompilerParams(
          dimension_semantics=("parallel", "arbitrary"),
          vmem_limit_bytes=_VMEM_LIMIT),
  )(*args)
  return y, jnp.sum(s, axis=(0, 1)), jnp.sum(ss, axis=(0, 1))


# ----------------------------------------------------------------------------
# BatchNorm (training-mode batch stats) + ReLU, elementwise Pallas kernel
# ----------------------------------------------------------------------------
def _bn_relu_kernel(x_ref, scale_ref, shift_ref, o_ref):
  o_ref[...] = jnp.maximum(
      x_ref[...].astype(jnp.float32) * scale_ref[...] + shift_ref[...],
      0.0).astype(o_ref.dtype)


def batchnorm_relu(y, ch_sum, ch_sumsq, gamma, beta, eps, compute_dtype):
  n, ho, wo, c = y.shape
  m = n * ho * wo
  mean = ch_sum / m
  # Single-pass (biased) batch variance; clamp guards E[x^2]-E[x]^2
  # cancellation (negligible here, but keeps sqrt well-defined).
  var = jnp.maximum(ch_sumsq / m - mean * mean, 0.0)
  scale = gamma / jnp.sqrt(var + eps)
  shift = beta - mean * scale

  y2 = y.reshape(m, c)
  tm = m if m <= 512 else 512
  out = pl.pallas_call(
      _bn_relu_kernel,
      out_shape=jax.ShapeDtypeStruct((m, c), compute_dtype),
      grid=(pl.cdiv(m, tm),),
      in_specs=[
          pl.BlockSpec((tm, c), lambda i: (i, 0)),
          pl.BlockSpec((1, c), lambda i: (0, 0)),
          pl.BlockSpec((1, c), lambda i: (0, 0)),
      ],
      out_specs=pl.BlockSpec((tm, c), lambda i: (i, 0)),
      compiler_params=pltpu.CompilerParams(
          dimension_semantics=("parallel",),
          vmem_limit_bytes=_VMEM_LIMIT),
  )(y2, scale.reshape(1, c).astype(jnp.float32),
    shift.reshape(1, c).astype(jnp.float32))
  return out.reshape(n, ho, wo, c)


# ----------------------------------------------------------------------------
# ConvTranspose2d(kernel_size=2, stride=2)
# ----------------------------------------------------------------------------
def _upconv2x2_kernel(x_ref, w_ref, b_ref, o_ref):
  x = x_ref[0, 0]                                      # (W, C_in)
  for di in range(2):
    y = jnp.dot(x, w_ref[di], preferred_element_type=jnp.float32) + b_ref[...]
    o_ref[0, 0, di] = y.astype(o_ref.dtype)            # (W, 2*C_out_p) packed


def conv_transpose_2x2_s2(x_nhwc, wt, bt, cout_p, compute_dtype):
  """ConvTranspose2d(k=2, s=2).  Emits a (n, i, di, j, dj*C + c) packed layout
  whose conversion to NHWC is a pure row-major reshape (no transpose pass)."""
  n, h, w, c_in = x_nhwc.shape
  c_out = wt.shape[1]
  # w_k[di][c, dj * cout_p + o] = wt[c, o, di, dj]
  w_k = jnp.transpose(wt, (2, 0, 3, 1))                # (di, c, dj, o)
  w_k = _pad_to(w_k, 3, cout_p).reshape(2, c_in, 2 * cout_p)
  b_pad = _pad_to(bt, 0, cout_p)
  b_k = jnp.concatenate([b_pad, b_pad]).reshape(1, 2 * cout_p)

  up_packed = pl.pallas_call(
      _upconv2x2_kernel,
      out_shape=jax.ShapeDtypeStruct((n, h, 2, w, 2 * cout_p), compute_dtype),
      grid=(n, h),
      in_specs=[
          pl.BlockSpec((1, 1, w, c_in), lambda nn, ii: (nn, ii, 0, 0)),
          pl.BlockSpec((2, c_in, 2 * cout_p), lambda nn, ii: (0, 0, 0)),
          pl.BlockSpec((1, 2 * cout_p), lambda nn, ii: (0, 0)),
      ],
      out_specs=pl.BlockSpec((1, 1, 2, w, 2 * cout_p),
                             lambda nn, ii: (nn, ii, 0, 0, 0)),
      compiler_params=pltpu.CompilerParams(
          dimension_semantics=("parallel", "parallel"),
          vmem_limit_bytes=_VMEM_LIMIT),
  )(x_nhwc.astype(compute_dtype), w_k.astype(compute_dtype),
    b_k.astype(jnp.float32))
  # (n, i, di, j, dj*Cp + c)  ->  (n, 2i+di, 2j+dj, c): pure reshape.
  return up_packed.reshape(n, 2 * h, 2 * w, cout_p)


# ----------------------------------------------------------------------------
# UNetDecoder forward (NCHW in / NCHW out; kernels compute in NHWC)
# ----------------------------------------------------------------------------
def unet_decoder_forward(x_nchw, skip_nchw, params, eps=1e-5,
                         compute_dtype=jnp.bfloat16):
  x = jnp.transpose(x_nchw, (0, 2, 3, 1)).astype(jnp.float32)
  skip = jnp.transpose(skip_nchw, (0, 2, 3, 1)).astype(jnp.float32)
  n, h, w, _ = x.shape
  c_out = params["bt"].shape[0]
  cout_p = _round_up(c_out, LANE)          # lane-dense channel dimension

  # --- ConvTranspose2d(k=2, s=2) -------------------------------------------
  up = conv_transpose_2x2_s2(x, params["wt"], params["bt"], cout_p,
                             compute_dtype)            # (n, 2h, 2w, cout_p)

  # --- F.pad to skip's spatial size (right/bottom) + 1-px conv halo ---------
  hs, ws_ = skip.shape[1], skip.shape[2]
  dh, dw = max(hs - 2 * h, 0), max(ws_ - 2 * w, 0)
  up_p = jnp.pad(up, ((0, 0), (1, 1 + dh), (1, 1 + dw), (0, 0)))
  skip_p = jnp.pad(skip, ((0, 0), (1, 1), (1, 1), (0, 0))).astype(compute_dtype)

  # --- conv1 over concat([up, skip], channel): concat fused into the kernel -
  w1 = jnp.transpose(params["w1"], (2, 3, 1, 0))       # OIHW -> (3,3,cin,cout)
  w1_up = _pad_to(_pad_to(w1[:, :, :c_out, :], 2, cout_p), 3, cout_p)
  w1_skip = _pad_to(w1[:, :, c_out:, :], 3, cout_p)
  y1, s1, ss1 = conv3x3_bias_stats(
      [up_p, skip_p], [w1_up, w1_skip], _pad_to(params["b1"], 0, cout_p),
      cout_p, compute_dtype)
  h1 = batchnorm_relu(y1, s1, ss1, _pad_to(params["g1"], 0, cout_p),
                      _pad_to(params["beta1"], 0, cout_p), eps, compute_dtype)

  # --- conv2 ----------------------------------------------------------------
  w2 = _pad_to(_pad_to(jnp.transpose(params["w2"], (2, 3, 1, 0)), 2, cout_p),
               3, cout_p)
  h1_p = jnp.pad(h1, ((0, 0), (1, 1), (1, 1), (0, 0)))
  y2, s2, ss2 = conv3x3_bias_stats(
      [h1_p], [w2], _pad_to(params["b2"], 0, cout_p), cout_p, compute_dtype)
  h2 = batchnorm_relu(y2, s2, ss2, _pad_to(params["g2"], 0, cout_p),
                      _pad_to(params["beta2"], 0, cout_p), eps, compute_dtype)

  out = h2[..., :c_out].astype(jnp.float32)
  return jnp.transpose(out, (0, 3, 1, 2))


# ----------------------------------------------------------------------------
# Pure-JAX reference (mirrors the PyTorch forward) for validation
# ----------------------------------------------------------------------------
def _ref_forward(x, skip, p, eps=1e-5):
  N, Cin, H, W = x.shape
  Cout = p["bt"].shape[0]
  y = jnp.einsum("nchw,codk->nohdwk", x, p["wt"]).reshape(N, Cout, 2 * H, 2 * W)
  y = y + p["bt"][None, :, None, None]
  dh = skip.shape[2] - y.shape[2]
  dw = skip.shape[3] - y.shape[3]
  if dh > 0 or dw > 0:
    y = jnp.pad(y, ((0, 0), (0, 0), (0, max(dh, 0)), (0, max(dw, 0))))
  y = jnp.concatenate([y, skip], axis=1)

  def conv_bn_relu(z, w, b, g, beta):
    z = jax.lax.conv_general_dilated(
        z, w, window_strides=(1, 1), padding=((1, 1), (1, 1)),
        dimension_numbers=("NCHW", "OIHW", "NCHW"))
    z = z + b[None, :, None, None]
    mu = jnp.mean(z, axis=(0, 2, 3), keepdims=True)
    var = jnp.mean((z - mu) ** 2, axis=(0, 2, 3), keepdims=True)
    z = (z - mu) / jnp.sqrt(var + eps)
    z = z * g[None, :, None, None] + beta[None, :, None, None]
    return jnp.maximum(z, 0.0)

  y = conv_bn_relu(y, p["w1"], p["b1"], p["g1"], p["beta1"])
  y = conv_bn_relu(y, p["w2"], p["b2"], p["g2"], p["beta2"])
  return y


# ----------------------------------------------------------------------------
if __name__ == "__main__":
  in_channels, out_channels = 8, 4
  n, h, w = 2, 8, 8   # decoder input (n, in_ch, h, w); skip is (n, in-out, 2h, 2w)

  key = jax.random.PRNGKey(0)
  ks = jax.random.split(key, 12)
  p = {
      "wt": 0.1 * jax.random.normal(ks[0], (in_channels, out_channels, 2, 2), jnp.float32),
      "bt": 0.1 * jax.random.normal(ks[1], (out_channels,), jnp.float32),
      "w1": 0.1 * jax.random.normal(ks[2], (out_channels, in_channels, 3, 3), jnp.float32),
      "b1": 0.1 * jax.random.normal(ks[3], (out_channels,), jnp.float32),
      "g1": 1.0 + 0.1 * jax.random.normal(ks[4], (out_channels,), jnp.float32),
      "beta1": 0.1 * jax.random.normal(ks[5], (out_channels,), jnp.float32),
      "w2": 0.1 * jax.random.normal(ks[6], (out_channels, out_channels, 3, 3), jnp.float32),
      "b2": 0.1 * jax.random.normal(ks[7], (out_channels,), jnp.float32),
      "g2": 1.0 + 0.1 * jax.random.normal(ks[8], (out_channels,), jnp.float32),
      "beta2": 0.1 * jax.random.normal(ks[9], (out_channels,), jnp.float32),
  }
  x = jax.random.normal(ks[10], (n, in_channels, h, w), jnp.float32)
  skip = jax.random.normal(
      ks[11], (n, in_channels - out_channels, 2 * h, 2 * w), jnp.float32)

  fwd = jax.jit(unet_decoder_forward, static_argnames=("compute_dtype",))
  ref = jax.block_until_ready(_ref_forward(x, skip, p))

  # 1) exact-algorithm check: f32 MXU path vs the f32 reference.
  out_f32 = jax.block_until_ready(fwd(x, skip, p, compute_dtype=jnp.float32))
  assert out_f32.shape == (n, out_channels, 2 * h, 2 * w), out_f32.shape
  np.testing.assert_allclose(np.asarray(out_f32), np.asarray(ref),
                             atol=1e-4, rtol=1e-3)

  # 2) production path: bf16 MXU operands (f32 accumulation / f32 BN math).
  #    Tolerance reflects bf16 input rounding through two BN-normalized convs.
  out_bf16 = jax.block_until_ready(fwd(x, skip, p))
  assert out_bf16.shape == (n, out_channels, 2 * h, 2 * w), out_bf16.shape
  np.testing.assert_allclose(np.asarray(out_bf16), np.asarray(ref),
                             atol=1e-1, rtol=1e-1)

  print("KERNEL_OK")
</pallas_src>

<mosaic_0001>
module attributes {stable_mosaic.version = 11 : i64} {
  func.func @_upconv2x2_kernel(%arg0: i32, %arg1: i32, %arg2: memref<1x1x8x8xf32, #tpu.memory_space<vmem>>, %arg3: memref<2x8x256xf32, #tpu.memory_space<vmem>>, %arg4: memref<1x256xf32, #tpu.memory_space<vmem>>, %arg5: memref<1x1x2x8x256xf32, #tpu.memory_space<vmem>>) attributes {dimension_semantics = [#tpu.dimension_semantics<parallel>, #tpu.dimension_semantics<parallel>], iteration_bounds = array<i64: 2, 8>, scalar_prefetch = 0 : i64, scratch_operands = 0 : i64, tpu.core_type = #tpu.core_type<tc>, window_params = [{transform_indices = @transform_0, window_bounds = array<i64: 1, 1, 8, 8>}, {pipeline_mode = #tpu.pipeline_mode<synchronous>, transform_indices = @transform_1, window_bounds = array<i64: 2, 8, 256>}, {pipeline_mode = #tpu.pipeline_mode<synchronous>, transform_indices = @transform_2, window_bounds = array<i64: 1, 256>}, {transform_indices = @transform_3, window_bounds = array<i64: 1, 1, 2, 8, 256>}]} {
    %c0 = arith.constant 0 : index
    %c0_0 = arith.constant 0 : index
    %c0_1 = arith.constant 0 : index
    %c0_2 = arith.constant 0 : index
    %0 = vector.load %arg2[%c0, %c0_0, %c0_1, %c0_2] : memref<1x1x8x8xf32, #tpu.memory_space<vmem>>, vector<1x1x8x8xf32>
    %1 = vector.shape_cast %0 : vector<1x1x8x8xf32> to vector<8x8xf32>
    %c0_3 = arith.constant 0 : index
    %c0_4 = arith.constant 0 : index
    %c0_5 = arith.constant 0 : index
    %2 = vector.load %arg3[%c0_3, %c0_4, %c0_5] : memref<2x8x256xf32, #tpu.memory_space<vmem>>, vector<1x8x256xf32>
    %3 = vector.shape_cast %2 : vector<1x8x256xf32> to vector<8x256xf32>
    %cst = arith.constant dense<0.000000e+00> : vector<8x256xf32>
    %4 = tpu.matmul %1, %3, %cst {dimension_numbers = #tpu.dot_dimension_numbers<[1], [0], [0], [1], [0, 0, 1, 1], [], []>} : vector<8x8xf32>, vector<8x256xf32>, vector<8x256xf32> -> vector<8x256xf32>
    %c0_6 = arith.constant 0 : index
    %c0_7 = arith.constant 0 : index
    %5 = vector.load %arg4[%c0_6, %c0_7] : memref<1x256xf32, #tpu.memory_space<vmem>>, vector<1x256xf32>
    %6 = vector.broadcast %5 : vector<1x256xf32> to vector<8x256xf32>
    %7 = arith.addf %4, %6 : vector<8x256xf32>
    %c0_8 = arith.constant 0 : index
    %c0_9 = arith.constant 0 : index
    %c0_10 = arith.constant 0 : index
    %c0_11 = arith.constant 0 : index
    %c0_12 = arith.constant 0 : index
    %8 = vector.load %arg5[%c0_8, %c0_9, %c0_10, %c0_11, %c0_12] : memref<1x1x2x8x256xf32, #tpu.memory_space<vmem>>, vector<1x1x1x8x256xf32>
    %9 = vector.shape_cast %8 : vector<1x1x1x8x256xf32> to vector<8x256xf32>
    %10 = vector.shape_cast %7 : vector<8x256xf32> to vector<1x1x1x8x256xf32>
    tpu.vector_store %arg5[%c0_8, %c0_9, %c0_10, %c0_11, %c0_12], %10 {strides = array<i32>} : memref<1x1x2x8x256xf32, #tpu.memory_space<vmem>>, vector<1x1x1x8x256xf32>,
    %c1 = arith.constant 1 : index
    %c0_13 = arith.constant 0 : index
    %c0_14 = arith.constant 0 : index
    %11 = vector.load %arg3[%c1, %c0_13, %c0_14] : memref<2x8x256xf32, #tpu.memory_space<vmem>>, vector<1x8x256xf32>
    %12 = vector.shape_cast %11 : vector<1x8x256xf32> to vector<8x256xf32>
    %cst_15 = arith.constant dense<0.000000e+00> : vector<8x256xf32>
    %13 = tpu.matmul %1, %12, %cst_15 {dimension_numbers = #tpu.dot_dimension_numbers<[1], [0], [0], [1], [0, 0, 1, 1], [], []>} : vector<8x8xf32>, vector<8x256xf32>, vector<8x256xf32> -> vector<8x256xf32>
    %c0_16 = arith.constant 0 : index
    %c0_17 = arith.constant 0 : index
    %14 = vector.load %arg4[%c0_16, %c0_17] : memref<1x256xf32, #tpu.memory_space<vmem>>, vector<1x256xf32>
    %15 = vector.broadcast %14 : vector<1x256xf32> to vector<8x256xf32>
    %16 = arith.addf %13, %15 : vector<8x256xf32>
    %c0_18 = arith.constant 0 : index
    %c0_19 = arith.constant 0 : index
    %c1_20 = arith.constant 1 : index
    %c0_21 = arith.constant 0 : index
    %c0_22 = arith.constant 0 : index
    %17 = vector.load %arg5[%c0_18, %c0_19, %c1_20, %c0_21, %c0_22] : memref<1x1x2x8x256xf32, #tpu.memory_space<vmem>>, vector<1x1x1x8x256xf32>
    %18 = vector.shape_cast %17 : vector<1x1x1x8x256xf32> to vector<8x256xf32>
    %19 = vector.shape_cast %16 : vector<8x256xf32> to vector<1x1x1x8x256xf32>
    tpu.vector_store %arg5[%c0_18, %c0_19, %c1_20, %c0_21, %c0_22], %19 {strides = array<i32>} : memref<1x1x2x8x256xf32, #tpu.memory_space<vmem>>, vector<1x1x1x8x256xf32>,
    return
  }
  func.func @transform_0(%arg0: i32, %arg1: i32) -> (i32, i32, i32, i32) {
    %c0_i32 = arith.constant 0 : i32
    %c0_i32_0 = arith.constant 0 : i32
    %c0_i32_1 = arith.constant 0 : i32
    return %arg0, %arg1, %c0_i32, %c0_i32_0 : i32, i32, i32, i32
  }
  func.func @transform_1(%arg0: i32, %arg1: i32) -> (i32, i32, i32) {
    %c0_i32 = arith.constant 0 : i32
    %c0_i32_0 = arith.constant 0 : i32
    %c0_i32_1 = arith.constant 0 : i32
    %c0_i32_2 = arith.constant 0 : i32
    return %c0_i32, %c0_i32_0, %c0_i32_1 : i32, i32, i32
  }
  func.func @transform_2(%arg0: i32, %arg1: i32) -> (i32, i32) {
    %c0_i32 = arith.constant 0 : i32
    %c0_i32_0 = arith.constant 0 : i32
    %c0_i32_1 = arith.constant 0 : i32
    return %c0_i32, %c0_i32_0 : i32, i32
  }
  func.func @transform_3(%arg0: i32, %arg1: i32) -> (i32, i32, i32, i32, i32) {
    %c0_i32 = arith.constant 0 : i32
    %c0_i32_0 = arith.constant 0 : i32
    %c0_i32_1 = arith.constant 0 : i32
    %c0_i32_2 = arith.constant 0 : i32
    return %arg0, %arg1, %c0_i32, %c0_i32_0, %c0_i32_1 : i32, i32, i32, i32, i32
  }
}

module attributes {stable_mosaic.version = 11 : i64} {
  func.func @kernel(%arg0: i32, %arg1: i32, %arg2: memref<1x1x18x128xf32, #tpu.memory_space<vmem>>, %arg3: memref<1x1x18x128xf32, #tpu.memory_space<vmem>>, %arg4: memref<1x1x18x128xf32, #tpu.memory_space<vmem>>, %arg5: memref<1x1x18x4xf32, #tpu.memory_space<vmem>>, %arg6: memref<1x1x18x4xf32, #tpu.memory_space<vmem>>, %arg7: memref<1x1x18x4xf32, #tpu.memory_space<vmem>>, %arg8: memref<3x3x128x128xf32, #tpu.memory_space<vmem>>, %arg9: memref<3x3x4x128xf32, #tpu.memory_space<vmem>>, %arg10: memref<1x128xf32, #tpu.memory_space<vmem>>, %arg11: memref<1x1x16x128xf32, #tpu.memory_space<vmem>>, %arg12: memref<1x1x128xf32, #tpu.memory_space<vmem>>, %arg13: memref<1x1x128xf32, #tpu.memory_space<vmem>>) attributes {dimension_semantics = [#tpu.dimension_semantics<parallel>, #tpu.dimension_semantics<arbitrary>], iteration_bounds = array<i64: 2, 16>, scalar_prefetch = 0 : i64, scratch_operands = 0 : i64, tpu.core_type = #tpu.core_type<tc>, window_params = [{transform_indices = @transform_0, window_bounds = array<i64: 1, 1, 18, 128>}, {transform_indices = @transform_1, window_bounds = array<i64: 1, 1, 18, 128>}, {transform_indices = @transform_2, window_bounds = array<i64: 1, 1, 18, 128>}, {transform_indices = @transform_3, window_bounds = array<i64: 1, 1, 18, 4>}, {transform_indices = @transform_4, window_bounds = array<i64: 1, 1, 18, 4>}, {transform_indices = @transform_5, window_bounds = array<i64: 1, 1, 18, 4>}, {pipeline_mode = #tpu.pipeline_mode<synchronous>, transform_indices = @transform_6, window_bounds = array<i64: 3, 3, 128, 128>}, {pipeline_mode = #tpu.pipeline_mode<synchronous>, transform_indices = @transform_7, window_bounds = array<i64: 3, 3, 4, 128>}, {pipeline_mode = #tpu.pipeline_mode<synchronous>, transform_indices = @transform_8, window_bounds = array<i64: 1, 128>}, {transform_indices = @transform_9, window_bounds = array<i64: 1, 1, 16, 128>}, {transform_indices = @transform_10, window_bounds = array<i64: 1, 1, 128>}, {transform_indices = @transform_11, window_bounds = array<i64: 1, 1, 128>}]} {
    %cst = arith.constant 0.000000e+00 : f32
    %0 = vector.broadcast %cst : f32 to vector<16x128xf32>
    %c0 = arith.constant 0 : index
    %c0_0 = arith.constant 0 : index
    %c0_1 = arith.constant 0 : index
    %c0_2 = arith.constant 0 : index
    %1 = vector.load %arg2[%c0, %c0_0, %c0_1, %c0_2] : memref<1x1x18x128xf32, #tpu.memory_space<vmem>>, vector<1x1x18x128xf32>
    %2 = vector.shape_cast %1 : vector<1x1x18x128xf32> to vector<18x128xf32>
    %3 = vector.extract_strided_slice %2 {offsets = [0, 0], sizes = [16, 128], strides = [1, 1]} : vector<18x128xf32> to vector<16x128xf32>
    %c0_3 = arith.constant 0 : index
    %c0_4 = arith.constant 0 : index
    %c0_5 = arith.constant 0 : index
    %c0_6 = arith.constant 0 : index
    %4 = vector.load %arg8[%c0_3, %c0_4, %c0_5, %c0_6] : memref<3x3x128x128xf32, #tpu.memory_space<vmem>>, vector<1x1x128x128xf32>
    %5 = vector.shape_cast %4 : vector<1x1x128x128xf32> to vector<128x128xf32>
    %cst_7 = arith.constant dense<0.000000e+00> : vector<16x128xf32>
    %6 = tpu.matmul %3, %5, %cst_7 {dimension_numbers = #tpu.dot_dimension_numbers<[1], [0], [0], [1], [0, 0, 1, 1], [], []>} : vector<16x128xf32>, vector<128x128xf32>, vector<16x128xf32> -> vector<16x128xf32>
    %7 = arith.addf %0, %6 : vector<16x128xf32>
    %8 = vector.extract_strided_slice %2 {offsets = [1, 0], sizes = [16, 128], strides = [1, 1]} : vector<18x128xf32> to vector<16x128xf32>
    %c0_8 = arith.constant 0 : index
    %c1 = arith.constant 1 : index
    %c0_9 = arith.constant 0 : index
    %c0_10 = arith.constant 0 : index
    %9 = vector.load %arg8[%c0_8, %c1, %c0_9, %c0_10] : memref<3x3x128x128xf32, #tpu.memory_space<vmem>>, vector<1x1x128x128xf32>
    %10 = vector.shape_cast %9 : vector<1x1x128x128xf32> to vector<128x128xf32>
    %cst_11 = arith.constant dense<0.000000e+00> : vector<16x128xf32>
    %11 = tpu.matmul %8, %10, %cst_11 {dimension_numbers = #tpu.dot_dimension_numbers<[1], [0], [0], [1], [0, 0, 1, 1], [], []>} : vector<16x128xf32>, vector<128x128xf32>, vector<16x128xf32> -> vector<16x128xf32>
    %12 = arith.addf %7, %11 : vector<16x128xf32>
    %13 = vector.extract_strided_slice %2 {offsets = [2, 0], sizes = [16, 128], strides = [1, 1]} : vector<18x128xf32> to vector<16x128xf32>
    %c0_12 = arith.constant 0 : index
    %c2 = arith.constant 2 : index
    %c0_13 = arith.constant 0 : index
    %c0_14 = arith.constant 0 : index
    %14 = vector.load %arg8[%c0_12, %c2, %c0_13, %c0_14] : memref<3x3x128x128xf32, #tpu.memory_space<vmem>>, vector<1x1x128x128xf32>
    %15 = vector.shape_cast %14 : vector<1x1x128x128xf32> to vector<128x128xf32>
    %cst_15 = arith.constant dense<0.000000e+00> : vector<16x128xf32>
    %16 = tpu.matmul %13, %15, %cst_15 {dimension_numbers = #tpu.dot_dimension_numbers<[1], [0], [0], [1], [0, 0, 1, 1], [], []>} : vector<16x128xf32>, vector<128x128xf32>, vector<16x128xf32> -> vector<16x128xf32>
    %17 = arith.addf %12, %16 : vector<16x128xf32>
    %c0_16 = arith.constant 0 : index
    %c0_17 = arith.constant 0 : index
    %c0_18 = arith.constant 0 : index
    %c0_19 = arith.constant 0 : index
    %18 = vector.load %arg3[%c0_16, %c0_17, %c0_18, %c0_19] : memref<1x1x18x128xf32, #tpu.memory_space<vmem>>, vector<1x1x18x128xf32>
    %19 = vector.shape_cast %18 : vector<1x1x18x128xf32> to vector<18x128xf32>
    %20 = vector.extract_strided_slice %19 {offsets = [0, 0], sizes = [16, 128], strides = [1, 1]} : vector<18x128xf32> to vector<16x128xf32>
    %c1_20 = arith.constant 1 : index
    %c0_21 = arith.constant 0 : index
    %c0_22 = arith.constant 0 : index
    %c0_23 = arith.constant 0 : index
    %21 = vector.load %arg8[%c1_20, %c0_21, %c0_22, %c0_23] : memref<3x3x128x128xf32, #tpu.memory_space<vmem>>, vector<1x1x128x128xf32>
    %22 = vector.shape_cast %21 : vector<1x1x128x128xf32> to vector<128x128xf32>
    %cst_24 = arith.constant dense<0.000000e+00> : vector<16x128xf32>
    %23 = tpu.matmul %20, %22, %cst_24 {dimension_numbers = #tpu.dot_dimension_numbers<[1], [0], [0], [1], [0, 0, 1, 1], [], []>} : vector<16x128xf32>, vector<128x128xf32>, vector<16x128xf32> -> vector<16x128xf32>
    %24 = arith.addf %17, %23 : vector<16x128xf32>
    %25 = vector.extract_strided_slice %19 {offsets = [1, 0], sizes = [16, 128], strides = [1, 1]} : vector<18x128xf32> to vector<16x128xf32>
    %c1_25 = arith.constant 1 : index
    %c1_26 = arith.constant 1 : index
    %c0_27 = arith.constant 0 : index
    %c0_28 = arith.constant 0 : index
    %26 = vector.load %arg8[%c1_25, %c1_26, %c0_27, %c0_28] : memref<3x3x128x128xf32, #tpu.memory_space<vmem>>, vector<1x1x128x128xf32>
    %27 = vector.shape_cast %26 : vector<1x1x128x128xf32> to vector<128x128xf32>
    %cst_29 = arith.constant dense<0.000000e+00> : vector<16x128xf32>
    %28 = tpu.matmul %25, %27, %cst_29 {dimension_numbers = #tpu.dot_dimension_numbers<[1], [0], [0], [1], [0, 0, 1, 1], [], []>} : vector<16x128xf32>, vector<128x128xf32>, vector<16x128xf32> -> vector<16x128xf32>
    %29 = arith.addf %24, %28 : vector<16x128xf32>
    %30 = vector.extract_strided_slice %19 {offsets = [2, 0], sizes = [16, 128], strides = [1, 1]} : vector<18x128xf32> to vector<16x128xf32>
    %c1_30 = arith.constant 1 : index
    %c2_31 = arith.constant 2 : index
    %c0_32 = arith.constant 0 : index
    %c0_33 = arith.constant 0 : index
    %31 = vector.load %arg8[%c1_30, %c2_31, %c0_32, %c0_33] : memref<3x3x128x128xf32, #tpu.memory_space<vmem>>, vector<1x1x128x128xf32>
    %32 = vector.shape_cast %31 : vector<1x1x128x128xf32> to vector<128x128xf32>
    %cst_34 = arith.constant dense<0.000000e+00> : vector<16x128xf32>
    %33 = tpu.matmul %30, %32, %cst_34 {dimension_numbers = #tpu.dot_dimension_numbers<[1], [0], [0], [1], [0, 0, 1, 1], [], []>} : vector<16x128xf32>, vector<128x128xf32>, vector<16x128xf32> -> vector<16x128xf32>
    %34 = arith.addf %29, %33 : vector<16x128xf32>
    %c0_35 = arith.constant 0 : index
    %c0_36 = arith.constant 0 : index
    %c0_37 = arith.constant 0 : index
    %c0_38 = arith.constant 0 : index
    %35 = vector.load %arg4[%c0_35, %c0_36, %c0_37, %c0_38] : memref<1x1x18x128xf32, #tpu.memory_space<vmem>>, vector<1x1x18x128xf32>
    %36 = vector.shape_cast %35 : vector<1x1x18x128xf32> to vector<18x128xf32>
    %37 = vector.extract_strided_slice %36 {offsets = [0, 0], sizes = [16, 128], strides = [1, 1]} : vector<18x128xf32> to vector<16x128xf32>
    %c2_39 = arith.constant 2 : index
    %c0_40 = arith.constant 0 : index
    %c0_41 = arith.constant 0 : index
    %c0_42 = arith.constant 0 : index
    %38 = vector.load %arg8[%c2_39, %c0_40, %c0_41, %c0_42] : memref<3x3x128x128xf32, #tpu.memory_space<vmem>>, vector<1x1x128x128xf32>
    %39 = vector.shape_cast %38 : vector<1x1x128x128xf32> to vector<128x128xf32>
    %cst_43 = arith.constant dense<0.000000e+00> : vector<16x128xf32>
    %40 = tpu.matmul %37, %39, %cst_43 {dimension_numbers = #tpu.dot_dimension_numbers<[1], [0], [0], [1], [0, 0, 1, 1], [], []>} : vector<16x128xf32>, vector<128x128xf32>, vector<16x128xf32> -> vector<16x128xf32>
    %41 = arith.addf %34, %40 : vector<16x128xf32>
    %42 = vector.extract_strided_slice %36 {offsets = [1, 0], sizes = [16, 128], strides = [1, 1]} : vector<18x128xf32> to vector<16x128xf32>
    %c2_44 = arith.constant 2 : index
    %c1_45 = arith.constant 1 : index
    %c0_46 = arith.constant 0 : index
    %c0_47 = arith.constant 0 : index
    %43 = vector.load %arg8[%c2_44, %c1_45, %c0_46, %c0_47] : memref<3x3x128x128xf32, #tpu.memory_space<vmem>>, vector<1x1x128x128xf32>
    %44 = vector.shape_cast %43 : vector<1x1x128x128xf32> to vector<128x128xf32>
    %cst_48 = arith.constant dense<0.000000e+00> : vector<16x128xf32>
    %45 = tpu.matmul %42, %44, %cst_48 {dimension_numbers = #tpu.dot_dimension_numbers<[1], [0], [0], [1], [0, 0, 1, 1], [], []>} : vector<16x128xf32>, vector<128x128xf32>, vector<16x128xf32> -> vector<16x128xf32>
    %46 = arith.addf %41, %45 : vector<16x128xf32>
    %47 = vector.extract_strided_slice %36 {offsets = [2, 0], sizes = [16, 128], strides = [1, 1]} : vector<18x128xf32> to vector<16x128xf32>
    %c2_49 = arith.constant 2 : index
    %c2_50 = arith.constant 2 : index
    %c0_51 = arith.constant 0 : index
    %c0_52 = arith.constant 0 : index
    %48 = vector.load %arg8[%c2_49, %c2_50, %c0_51, %c0_52] : memref<3x3x128x128xf32, #tpu.memory_space<vmem>>, vector<1x1x128x128xf32>
    %49 = vector.shape_cast %48 : vector<1x1x128x128xf32> to vector<128x128xf32>
    %cst_53 = arith.constant dense<0.000000e+00> : vector<16x128xf32>
    %50 = tpu.matmul %47, %49, %cst_53 {dimension_numbers = #tpu.dot_dimension_numbers<[1], [0], [0], [1], [0, 0, 1, 1], [], []>} : vector<16x128xf32>, vector<128x128xf32>, vector<16x128xf32> -> vector<16x128xf32>
    %51 = arith.addf %46, %50 : vector<16x128xf32>
    %c0_54 = arith.constant 0 : index
    %c0_55 = arith.constant 0 : index
    %c0_56 = arith.constant 0 : index
    %c0_57 = arith.constant 0 : index
    %52 = vector.load %arg5[%c0_54, %c0_55, %c0_56, %c0_57] : memref<1x1x18x4xf32, #tpu.memory_space<vmem>>, vector<1x1x18x4xf32>
    %53 = vector.shape_cast %52 : vector<1x1x18x4xf32> to vector<18x4xf32>
    %54 = vector.extract_strided_slice %53 {offsets = [0, 0], sizes = [16, 4], strides = [1, 1]} : vector<18x4xf32> to vector<16x4xf32>
    %c0_58 = arith.constant 0 : index
    %c0_59 = arith.constant 0 : index
    %c0_60 = arith.constant 0 : index
    %c0_61 = arith.constant 0 : index
    %55 = vector.load %arg9[%c0_58, %c0_59, %c0_60, %c0_61] : memref<3x3x4x128xf32, #tpu.memory_space<vmem>>, vector<1x1x4x128xf32>
    %56 = vector.shape_cast %55 : vector<1x1x4x128xf32> to vector<4x128xf32>
    %cst_62 = arith.constant dense<0.000000e+00> : vector<16x128xf32>
    %57 = tpu.matmul %54, %56, %cst_62 {dimension_numbers = #tpu.dot_dimension_numbers<[1], [0], [0], [1], [0, 0, 1, 1], [], []>} : vector<16x4xf32>, vector<4x128xf32>, vector<16x128xf32> -> vector<16x128xf32>
    %58 = arith.addf %51, %57 : vector<16x128xf32>
    %59 = vector.extract_strided_slice %53 {offsets = [1, 0], sizes = [16, 4], strides = [1, 1]} : vector<18x4xf32> to vector<16x4xf32>
    %c0_63 = arith.constant 0 : index
    %c1_64 = arith.constant 1 : index
    %c0_65 = arith.constant 0 : index
    %c0_66 = arith.constant 0 : index
    %60 = vector.load %arg9[%c0_63, %c1_64, %c0_65, %c0_66] : memref<3x3x4x128xf32, #tpu.memory_space<vmem>>, vector<1x1x4x128xf32>
    %61 = vector.shape_cast %60 : vector<1x1x4x128xf32> to vector<4x128xf32>
    %cst_67 = arith.constant dense<0.000000e+00> : vector<16x128xf32>
    %62 = tpu.matmul %59, %61, %cst_67 {dimension_numbers = #tpu.dot_dimension_numbers<[1], [0], [0], [1], [0, 0, 1, 1], [], []>} : vector<16x4xf32>, vector<4x128xf32>, vector<16x128xf32> -> vector<16x128xf32>
    %63 = arith.addf %58, %62 : vector<16x128xf32>
    %64 = vector.extract_strided_slice %53 {offsets = [2, 0], sizes = [16, 4], strides = [1, 1]} : vector<18x4xf32> to vector<16x4xf32>
    %c0_68 = arith.constant 0 : index
    %c2_69 = arith.constant 2 : index
    %c0_70 = arith.constant 0 : index
    %c0_71 = arith.constant 0 : index
    %65 = vector.load %arg9[%c0_68, %c2_69, %c0_70, %c0_71] : memref<3x3x4x128xf32, #tpu.memory_space<vmem>>, vector<1x1x4x128xf32>
    %66 = vector.shape_cast %65 : vector<1x1x4x128xf32> to vector<4x128xf32>
    %cst_72 = arith.constant dense<0.000000e+00> : vector<16x128xf32>
    %67 = tpu.matmul %64, %66, %cst_72 {dimension_numbers = #tpu.dot_dimension_numbers<[1], [0], [0], [1], [0, 0, 1, 1], [], []>} : vector<16x4xf32>, vector<4x128xf32>, vector<16x128xf32> -> vector<16x128xf32>
    %68 = arith.addf %63, %67 : vector<16x128xf32>
    %c0_73 = arith.constant 0 : index
    %c0_74 = arith.constant 0 : index
    %c0_75 = arith.constant 0 : index
    %c0_76 = arith.constant 0 : index
    %69 = vector.load %arg6[%c0_73, %c0_74, %c0_75, %c0_76] : memref<1x1x18x4xf32, #tpu.memory_space<vmem>>, vector<1x1x18x4xf32>
    %70 = vector.shape_cast %69 : vector<1x1x18x4xf32> to vector<18x4xf32>
    %71 = vector.extract_strided_slice %70 {offsets = [0, 0], sizes = [16, 4], strides = [1, 1]} : vector<18x4xf32> to vector<16x4xf32>
    %c1_77 = arith.constant 1 : index
    %c0_78 = arith.constant 0 : index
    %c0_79 = arith.constant 0 : index
    %c0_80 = arith.constant 0 : index
    %72 = vector.load %arg9[%c1_77, %c0_78, %c0_79, %c0_80] : memref<3x3x4x128xf32, #tpu.memory_space<vmem>>, vector<1x1x4x128xf32>
    %73 = vector.shape_cast %72 : vector<1x1x4x128xf32> to vector<4x128xf32>
    %cst_81 = arith.constant dense<0.000000e+00> : vector<16x128xf32>
    %74 = tpu.matmul %71, %73, %cst_81 {dimension_numbers = #tpu.dot_dimension_numbers<[1], [0], [0], [1], [0, 0, 1, 1], [], []>} : vector<16x4xf32>, vector<4x128xf32>, vector<16x128xf32> -> vector<16x128xf32>
    %75 = arith.addf %68, %74 : vector<16x128xf32>
    %76 = vector.extract_strided_slice %70 {offsets = [1, 0], sizes = [16, 4], strides = [1, 1]} : vector<18x4xf32> to vector<16x4xf32>
    %c1_82 = arith.constant 1 : index
    %c1_83 = arith.constant 1 : index
    %c0_84 = arith.constant 0 : index
    %c0_85 = arith.constant 0 : index
    %77 = vector.load %arg9[%c1_82, %c1_83, %c0_84, %c0_85] : memref<3x3x4x128xf32, #tpu.memory_space<vmem>>, vector<1x1x4x128xf32>
    %78 = vector.shape_cast %77 : vector<1x1x4x128xf32> to vector<4x128xf32>
    %cst_86 = arith.constant dense<0.000000e+00> : vector<16x128xf32>
    %79 = tpu.matmul %76, %78, %cst_86 {dimension_numbers = #tpu.dot_dimension_numbers<[1], [0], [0], [1], [0, 0, 1, 1], [], []>} : vector<16x4xf32>, vector<4x128xf32>, vector<16x128xf32> -> vector<16x128xf32>
    %80 = arith.addf %75, %79 : vector<16x128xf32>
    %81 = vector.extract_strided_slice %70 {offsets = [2, 0], sizes = [16, 4], strides = [1, 1]} : vector<18x4xf32> to vector<16x4xf32>
    %c1_87 = arith.constant 1 : index
    %c2_88 = arith.constant 2 : index
    %c0_89 = arith.constant 0 : index
    %c0_90 = arith.constant 0 : index
    %82 = vector.load %arg9[%c1_87, %c2_88, %c0_89, %c0_90] : memref<3x3x4x128xf32, #tpu.memory_space<vmem>>, vector<1x1x4x128xf32>
    %83 = vector.shape_cast %82 : vector<1x1x4x128xf32> to vector<4x128xf32>
    %cst_91 = arith.constant dense<0.000000e+00> : vector<16x128xf32>
    %84 = tpu.matmul %81, %83, %cst_91 {dimension_numbers = #tpu.dot_dimension_numbers<[1], [0], [0], [1], [0, 0, 1, 1], [], []>} : vector<16x4xf32>, vector<4x128xf32>, vector<16x128xf32> -> vector<16x128xf32>
    %85 = arith.addf %80, %84 : vector<16x128xf32>
    %c0_92 = arith.constant 0 : index
    %c0_93 = arith.constant 0 : index
    %c0_94 = arith.constant 0 : index
    %c0_95 = arith.constant 0 : index
    %86 = vector.load %arg7[%c0_92, %c0_93, %c0_94, %c0_95] : memref<1x1x18x4xf32, #tpu.memory_space<vmem>>, vector<1x1x18x4xf32>
    %87 = vector.shape_cast %86 : vector<1x1x18x4xf32> to vector<18x4xf32>
    %88 = vector.extract_strided_slice %87 {offsets = [0, 0], sizes = [16, 4], strides = [1, 1]} : vector<18x4xf32> to vector<16x4xf32>
    %c2_96 = arith.constant 2 : index
    %c0_97 = arith.constant 0 : index
    %c0_98 = arith.constant 0 : index
    %c0_99 = arith.constant 0 : index
    %89 = vector.load %arg9[%c2_96, %c0_97, %c0_98, %c0_99] : memref<3x3x4x128xf32, #tpu.memory_space<vmem>>, vector<1x1x4x128xf32>
    %90 = vector.shape_cast %89 : vector<1x1x4x128xf32> to vector<4x128xf32>
    %cst_100 = arith.constant dense<0.000000e+00> : vector<16x128xf32>
    %91 = tpu.matmul %88, %90, %cst_100 {dimension_numbers = #tpu.dot_dimension_numbers<[1], [0], [0], [1], [0, 0, 1, 1], [], []>} : vector<16x4xf32>, vector<4x128xf32>, vector<16x128xf32> -> vector<16x128xf32>
    %92 = arith.addf %85, %91 : vector<16x128xf32>
    %93 = vector.extract_strided_slice %87 {offsets = [1, 0], sizes = [16, 4], strides = [1, 1]} : vector<18x4xf32> to vector<16x4xf32>
    %c2_101 = arith.constant 2 : index
    %c1_102 = arith.constant 1 : index
    %c0_103 = arith.constant 0 : index
    %c0_104 = arith.constant 0 : index
    %94 = vector.load %arg9[%c2_101, %c1_102, %c0_103, %c0_104] : memref<3x3x4x128xf32, #tpu.memory_space<vmem>>, vector<1x1x4x128xf32>
    %95 = vector.shape_cast %94 : vector<1x1x4x128xf32> to vector<4x128xf32>
    %cst_105 = arith.constant dense<0.000000e+00> : vector<16x128xf32>
    %96 = tpu.matmul %93, %95, %cst_105 {dimension_numbers = #tpu.dot_dimension_numbers<[1], [0], [0], [1], [0, 0, 1, 1], [], []>} : vector<16x4xf32>, vector<4x128xf32>, vector<16x128xf32> -> vector<16x128xf32>
    %97 = arith.addf %92, %96 : vector<16x128xf32>
    %98 = vector.extract_strided_slice %87 {offsets = [2, 0], sizes = [16, 4], strides = [1, 1]} : vector<18x4xf32> to vector<16x4xf32>
    %c2_106 = arith.constant 2 : index
    %c2_107 = arith.constant 2 : index
    %c0_108 = arith.constant 0 : index
    %c0_109 = arith.constant 0 : index
    %99 = vector.load %arg9[%c2_106, %c2_107, %c0_108, %c0_109] : memref<3x3x4x128xf32, #tpu.memory_space<vmem>>, vector<1x1x4x128xf32>
    %100 = vector.shape_cast %99 : vector<1x1x4x128xf32> to vector<4x128xf32>
    %cst_110 = arith.constant dense<0.000000e+00> : vector<16x128xf32>
    %101 = tpu.matmul %98, %100, %cst_110 {dimension_numbers = #tpu.dot_dimension_numbers<[1], [0], [0], [1], [0, 0, 1, 1], [], []>} : vector<16x4xf32>, vector<4x128xf32>, vector<16x128xf32> -> vector<16x128xf32>
    %102 = arith.addf %97, %101 : vector<16x128xf32>
    %c0_111 = arith.constant 0 : index
    %c0_112 = arith.constant 0 : index
    %103 = vector.load %arg10[%c0_111, %c0_112] : memref<1x128xf32, #tpu.memory_space<vmem>>, vector<1x128xf32>
    %104 = vector.broadcast %103 : vector<1x128xf32> to vector<16x128xf32>
    %105 = arith.addf %102, %104 : vector<16x128xf32>
    %c0_113 = arith.constant 0 : index
    %c0_114 = arith.constant 0 : index
    %c0_115 = arith.constant 0 : index
    %c0_116 = arith.constant 0 : index
    %106 = vector.load %arg11[%c0_113, %c0_114, %c0_115, %c0_116] : memref<1x1x16x128xf32, #tpu.memory_space<vmem>>, vector<1x1x16x128xf32>
    %107 = vector.shape_cast %106 : vector<1x1x16x128xf32> to vector<16x128xf32>
    %108 = vector.shape_cast %105 : vector<16x128xf32> to vector<1x1x16x128xf32>
    tpu.vector_store %arg11[%c0_113, %c0_114, %c0_115, %c0_116], %108 {strides = array<i32>} : memref<1x1x16x128xf32, #tpu.memory_space<vmem>>, vector<1x1x16x128xf32>,
    %c0_i32 = arith.constant 0 : i32
    %109 = arith.cmpi eq, %arg1, %c0_i32 : i32
    %110 = arith.extui %109 : i1 to i32
    %c0_i32_117 = arith.constant 0 : i32
    %111 = arith.cmpi ne, %110, %c0_i32_117 : i32
    scf.if %111 {
      %cst_132 = arith.constant 0.000000e+00 : f32
      %129 = vector.broadcast %cst_132 : f32 to vector<1x1x128xf32>
      %c0_133 = arith.constant 0 : index
      %c0_134 = arith.constant 0 : index
      %c0_135 = arith.constant 0 : index
      %130 = vector.load %arg12[%c0_133, %c0_134, %c0_135] : memref<1x1x128xf32, #tpu.memory_space<vmem>>, vector<1x1x128xf32>
      tpu.vector_store %arg12[%c0_133, %c0_134, %c0_135], %129 {strides = array<i32>} : memref<1x1x128xf32, #tpu.memory_space<vmem>>, vector<1x1x128xf32>,
      %cst_136 = arith.constant 0.000000e+00 : f32
      %131 = vector.broadcast %cst_136 : f32 to vector<1x1x128xf32>
      %c0_137 = arith.constant 0 : index
      %c0_138 = arith.constant 0 : index
      %c0_139 = arith.constant 0 : index
      %132 = vector.load %arg13[%c0_137, %c0_138, %c0_139] : memref<1x1x128xf32, #tpu.memory_space<vmem>>, vector<1x1x128xf32>
      tpu.vector_store %arg13[%c0_137, %c0_138, %c0_139], %131 {strides = array<i32>} : memref<1x1x128xf32, #tpu.memory_space<vmem>>, vector<1x1x128xf32>,
    } else {
    }
    %c0_118 = arith.constant 0 : index
    %c0_119 = arith.constant 0 : index
    %c0_120 = arith.constant 0 : index
    %112 = vector.load %arg12[%c0_118, %c0_119, %c0_120] : memref<1x1x128xf32, #tpu.memory_space<vmem>>, vector<1x1x128xf32>
    %113 = vector.shape_cast %112 : vector<1x1x128xf32> to vector<1x128xf32>
    %cst_121 = arith.constant dense<0.000000e+00> : vector<128xf32>
    %114 = vector.multi_reduction <add>, %105, %cst_121 [0] : vector<16x128xf32> to vector<128xf32>
    %115 = vector.shape_cast %114 : vector<128xf32> to vector<1x128xf32>
    %116 = arith.addf %113, %115 : vector<1x128xf32>
    %c0_122 = arith.constant 0 : index
    %c0_123 = arith.constant 0 : index
    %c0_124 = arith.constant 0 : index
    %117 = vector.load %arg12[%c0_122, %c0_123, %c0_124] : memref<1x1x128xf32, #tpu.memory_space<vmem>>, vector<1x1x128xf32>
    %118 = vector.shape_cast %117 : vector<1x1x128xf32> to vector<1x128xf32>
    %119 = vector.shape_cast %116 : vector<1x128xf32> to vector<1x1x128xf32>
    tpu.vector_store %arg12[%c0_122, %c0_123, %c0_124], %119 {strides = array<i32>} : memref<1x1x128xf32, #tpu.memory_space<vmem>>, vector<1x1x128xf32>,
    %c0_125 = arith.constant 0 : index
    %c0_126 = arith.constant 0 : index
    %c0_127 = arith.constant 0 : index
    %120 = vector.load %arg13[%c0_125, %c0_126, %c0_127] : memref<1x1x128xf32, #tpu.memory_space<vmem>>, vector<1x1x128xf32>
    %121 = vector.shape_cast %120 : vector<1x1x128xf32> to vector<1x128xf32>
    %122 = arith.mulf %105, %105 : vector<16x128xf32>
    %cst_128 = arith.constant dense<0.000000e+00> : vector<128xf32>
    %123 = vector.multi_reduction <add>, %122, %cst_128 [0] : vector<16x128xf32> to vector<128xf32>
    %124 = vector.shape_cast %123 : vector<128xf32> to vector<1x128xf32>
    %125 = arith.addf %121, %124 : vector<1x128xf32>
    %c0_129 = arith.constant 0 : index
    %c0_130 = arith.constant 0 : index
    %c0_131 = arith.constant 0 : index
    %126 = vector.load %arg13[%c0_129, %c0_130, %c0_131] : memref<1x1x128xf32, #tpu.memory_space<vmem>>, vector<1x1x128xf32>
    %127 = vector.shape_cast %126 : vector<1x1x128xf32> to vector<1x128xf32>
    %128 = vector.shape_cast %125 : vector<1x128xf32> to vector<1x1x128xf32>
    tpu.vector_store %arg13[%c0_129, %c0_130, %c0_131], %128 {strides = array<i32>} : memref<1x1x128xf32, #tpu.memory_space<vmem>>, vector<1x1x128xf32>,
    return
  }
  func.func @transform_0(%arg0: i32, %arg1: i32) -> (i32, i32, i32, i32) {
    %c0_i32 = arith.constant 0 : i32
    %0 = arith.addi %arg1, %c0_i32 : i32
    %c0_i32_0 = arith.constant 0 : i32
    %c0_i32_1 = arith.constant 0 : i32
    %c0_i32_2 = arith.constant 0 : i32
    return %arg0, %0, %c0_i32_0, %c0_i32_1 : i32, i32, i32, i32
  }
  func.func @transform_1(%arg0: i32, %arg1: i32) -> (i32, i32, i32, i32) {
    %c1_i32 = arith.constant 1 : i32
    %0 = arith.addi %arg1, %c1_i32 : i32
    %c0_i32 = arith.constant 0 : i32
    %c0_i32_0 = arith.constant 0 : i32
    %c0_i32_1 = arith.constant 0 : i32
    return %arg0, %0, %c0_i32, %c0_i32_0 : i32, i32, i32, i32
  }
  func.func @transform_2(%arg0: i32, %arg1: i32) -> (i32, i32, i32, i32) {
    %c2_i32 = arith.constant 2 : i32
    %0 = arith.addi %arg1, %c2_i32 : i32
    %c0_i32 = arith.constant 0 : i32
    %c0_i32_0 = arith.constant 0 : i32
    %c0_i32_1 = arith.constant 0 : i32
    return %arg0, %0, %c0_i32, %c0_i32_0 : i32, i32, i32, i32
  }
  func.func @transform_3(%arg0: i32, %arg1: i32) -> (i32, i32, i32, i32) {
    %c0_i32 = arith.constant 0 : i32
    %0 = arith.addi %arg1, %c0_i32 : i32
    %c0_i32_0 = arith.constant 0 : i32
    %c0_i32_1 = arith.constant 0 : i32
    %c0_i32_2 = arith.constant 0 : i32
    return %arg0, %0, %c0_i32_0, %c0_i32_1 : i32, i32, i32, i32
  }
  func.func @transform_4(%arg0: i32, %arg1: i32) -> (i32, i32, i32, i32) {
    %c1_i32 = arith.constant 1 : i32
    %0 = arith.addi %arg1, %c1_i32 : i32
    %c0_i32 = arith.constant 0 : i32
    %c0_i32_0 = arith.constant 0 : i32
    %c0_i32_1 = arith.constant 0 : i32
    return %arg0, %0, %c0_i32, %c0_i32_0 : i32, i32, i32, i32
  }
  func.func @transform_5(%arg0: i32, %arg1: i32) -> (i32, i32, i32, i32) {
    %c2_i32 = arith.constant 2 : i32
    %0 = arith.addi %arg1, %c2_i32 : i32
    %c0_i32 = arith.constant 0 : i32
    %c0_i32_0 = arith.constant 0 : i32
    %c0_i32_1 = arith.constant 0 : i32
    return %arg0, %0, %c0_i32, %c0_i32_0 : i32, i32, i32, i32
  }
  func.func @transform_6(%arg0: i32, %arg1: i32) -> (i32, i32, i32, i32) {
    %c0_i32 = arith.constant 0 : i32
    %c0_i32_0 = arith.constant 0 : i32
    %c0_i32_1 = arith.constant 0 : i32
    %c0_i32_2 = arith.constant 0 : i32
    %c0_i32_3 = arith.constant 0 : i32
    return %c0_i32, %c0_i32_0, %c0_i32_1, %c0_i32_2 : i32, i32, i32, i32
  }
  func.func @transform_7(%arg0: i32, %arg1: i32) -> (i32, i32, i32, i32) {
    %c0_i32 = arith.constant 0 : i32
    %c0_i32_0 = arith.constant 0 : i32
    %c0_i32_1 = arith.constant 0 : i32
    %c0_i32_2 = arith.constant 0 : i32
    %c0_i32_3 = arith.constant 0 : i32
    return %c0_i32, %c0_i32_0, %c0_i32_1, %c0_i32_2 : i32, i32, i32, i32
  }
  func.func @transform_8(%arg0: i32, %arg1: i32) -> (i32, i32) {
    %c0_i32 = arith.constant 0 : i32
    %c0_i32_0 = arith.constant 0 : i32
    %c0_i32_1 = arith.constant 0 : i32
    return %c0_i32, %c0_i32_0 : i32, i32
  }
  func.func @transform_9(%arg0: i32, %arg1: i32) -> (i32, i32, i32, i32) {
    %c0_i32 = arith.constant 0 : i32
    %c0_i32_0 = arith.constant 0 : i32
    %c0_i32_1 = arith.constant 0 : i32
    return %arg0, %arg1, %c0_i32, %c0_i32_0 : i32, i32, i32, i32
  }
  func.func @transform_10(%arg0: i32, %arg1: i32) -> (i32, i32, i32) {
    %c0_i32 = arith.constant 0 : i32
    %c0_i32_0 = arith.constant 0 : i32
    %c0_i32_1 = arith.constant 0 : i32
    return %arg0, %c0_i32, %c0_i32_0 : i32, i32, i32
  }
  func.func @transform_11(%arg0: i32, %arg1: i32) -> (i32, i32, i32) {
    %c0_i32 = arith.constant 0 : i32
    %c0_i32_0 = arith.constant 0 : i32
    %c0_i32_1 = arith.constant 0 : i32
    return %arg0, %c0_i32, %c0_i32_0 : i32, i32, i32
  }
}

module attributes {stable_mosaic.version = 11 : i64} {
  func.func @_bn_relu_kernel(%arg0: i32, %arg1: memref<512x128xf32, #tpu.memory_space<vmem>>, %arg2: memref<1x128xf32, #tpu.memory_space<vmem>>, %arg3: memref<1x128xf32, #tpu.memory_space<vmem>>, %arg4: memref<512x128xf32, #tpu.memory_space<vmem>>) attributes {dimension_semantics = [#tpu.dimension_semantics<parallel>], iteration_bounds = array<i64: 1>, scalar_prefetch = 0 : i64, scratch_operands = 0 : i64, tpu.core_type = #tpu.core_type<tc>, window_params = [{transform_indices = @transform_0, window_bounds = array<i64: 512, 128>}, {pipeline_mode = #tpu.pipeline_mode<synchronous>, transform_indices = @transform_1, window_bounds = array<i64: 1, 128>}, {pipeline_mode = #tpu.pipeline_mode<synchronous>, transform_indices = @transform_2, window_bounds = array<i64: 1, 128>}, {transform_indices = @transform_3, window_bounds = array<i64: 512, 128>}]} {
    %c0 = arith.constant 0 : index
    %c0_0 = arith.constant 0 : index
    %0 = vector.load %arg1[%c0, %c0_0] : memref<512x128xf32, #tpu.memory_space<vmem>>, vector<512x128xf32>
    %c0_1 = arith.constant 0 : index
    %c0_2 = arith.constant 0 : index
    %1 = vector.load %arg2[%c0_1, %c0_2] : memref<1x128xf32, #tpu.memory_space<vmem>>, vector<1x128xf32>
    %2 = vector.broadcast %1 : vector<1x128xf32> to vector<512x128xf32>
    %3 = arith.mulf %0, %2 : vector<512x128xf32>
    %c0_3 = arith.constant 0 : index
    %c0_4 = arith.constant 0 : index
    %4 = vector.load %arg3[%c0_3, %c0_4] : memref<1x128xf32, #tpu.memory_space<vmem>>, vector<1x128xf32>
    %5 = vector.broadcast %4 : vector<1x128xf32> to vector<512x128xf32>
    %6 = arith.addf %3, %5 : vector<512x128xf32>
    %cst = arith.constant 0.000000e+00 : f32
    %7 = vector.broadcast %cst : f32 to vector<512x128xf32>
    %8 = arith.maximumf %6, %7 : vector<512x128xf32>
    %c0_5 = arith.constant 0 : index
    %c0_6 = arith.constant 0 : index
    %9 = vector.load %arg4[%c0_5, %c0_6] : memref<512x128xf32, #tpu.memory_space<vmem>>, vector<512x128xf32>
    tpu.vector_store %arg4[%c0_5, %c0_6], %8 {strides = array<i32>} : memref<512x128xf32, #tpu.memory_space<vmem>>, vector<512x128xf32>,
    return
  }
  func.func @transform_0(%arg0: i32) -> (i32, i32) {
    %c0_i32 = arith.constant 0 : i32
    %c0_i32_0 = arith.constant 0 : i32
    return %arg0, %c0_i32 : i32, i32
  }
  func.func @transform_1(%arg0: i32) -> (i32, i32) {
    %c0_i32 = arith.constant 0 : i32
    %c0_i32_0 = arith.constant 0 : i32
    %c0_i32_1 = arith.constant 0 : i32
    return %c0_i32, %c0_i32_0 : i32, i32
  }
  func.func @transform_2(%arg0: i32) -> (i32, i32) {
    %c0_i32 = arith.constant 0 : i32
    %c0_i32_0 = arith.constant 0 : i32
    %c0_i32_1 = arith.constant 0 : i32
    return %c0_i32, %c0_i32_0 : i32, i32
  }
  func.func @transform_3(%arg0: i32) -> (i32, i32) {
    %c0_i32 = arith.constant 0 : i32
    %c0_i32_0 = arith.constant 0 : i32
    return %arg0, %c0_i32 : i32, i32
  }
}

module attributes {stable_mosaic.version = 11 : i64} {
  func.func @kernel(%arg0: i32, %arg1: i32, %arg2: memref<1x1x18x128xf32, #tpu.memory_space<vmem>>, %arg3: memref<1x1x18x128xf32, #tpu.memory_space<vmem>>, %arg4: memref<1x1x18x128xf32, #tpu.memory_space<vmem>>, %arg5: memref<3x3x128x128xf32, #tpu.memory_space<vmem>>, %arg6: memref<1x128xf32, #tpu.memory_space<vmem>>, %arg7: memref<1x1x16x128xf32, #tpu.memory_space<vmem>>, %arg8: memref<1x1x128xf32, #tpu.memory_space<vmem>>, %arg9: memref<1x1x128xf32, #tpu.memory_space<vmem>>) attributes {dimension_semantics = [#tpu.dimension_semantics<parallel>, #tpu.dimension_semantics<arbitrary>], iteration_bounds = array<i64: 2, 16>, scalar_prefetch = 0 : i64, scratch_operands = 0 : i64, tpu.core_type = #tpu.core_type<tc>, window_params = [{transform_indices = @transform_0, window_bounds = array<i64: 1, 1, 18, 128>}, {transform_indices = @transform_1, window_bounds = array<i64: 1, 1, 18, 128>}, {transform_indices = @transform_2, window_bounds = array<i64: 1, 1, 18, 128>}, {pipeline_mode = #tpu.pipeline_mode<synchronous>, transform_indices = @transform_3, window_bounds = array<i64: 3, 3, 128, 128>}, {pipeline_mode = #tpu.pipeline_mode<synchronous>, transform_indices = @transform_4, window_bounds = array<i64: 1, 128>}, {transform_indices = @transform_5, window_bounds = array<i64: 1, 1, 16, 128>}, {transform_indices = @transform_6, window_bounds = array<i64: 1, 1, 128>}, {transform_indices = @transform_7, window_bounds = array<i64: 1, 1, 128>}]} {
    %cst = arith.constant 0.000000e+00 : f32
    %0 = vector.broadcast %cst : f32 to vector<16x128xf32>
    %c0 = arith.constant 0 : index
    %c0_0 = arith.constant 0 : index
    %c0_1 = arith.constant 0 : index
    %c0_2 = arith.constant 0 : index
    %1 = vector.load %arg2[%c0, %c0_0, %c0_1, %c0_2] : memref<1x1x18x128xf32, #tpu.memory_space<vmem>>, vector<1x1x18x128xf32>
    %2 = vector.shape_cast %1 : vector<1x1x18x128xf32> to vector<18x128xf32>
    %3 = vector.extract_strided_slice %2 {offsets = [0, 0], sizes = [16, 128], strides = [1, 1]} : vector<18x128xf32> to vector<16x128xf32>
    %c0_3 = arith.constant 0 : index
    %c0_4 = arith.constant 0 : index
    %c0_5 = arith.constant 0 : index
    %c0_6 = arith.constant 0 : index
    %4 = vector.load %arg5[%c0_3, %c0_4, %c0_5, %c0_6] : memref<3x3x128x128xf32, #tpu.memory_space<vmem>>, vector<1x1x128x128xf32>
    %5 = vector.shape_cast %4 : vector<1x1x128x128xf32> to vector<128x128xf32>
    %cst_7 = arith.constant dense<0.000000e+00> : vector<16x128xf32>
    %6 = tpu.matmul %3, %5, %cst_7 {dimension_numbers = #tpu.dot_dimension_numbers<[1], [0], [0], [1], [0, 0, 1, 1], [], []>} : vector<16x128xf32>, vector<128x128xf32>, vector<16x128xf32> -> vector<16x128xf32>
    %7 = arith.addf %0, %6 : vector<16x128xf32>
    %8 = vector.extract_strided_slice %2 {offsets = [1, 0], sizes = [16, 128], strides = [1, 1]} : vector<18x128xf32> to vector<16x128xf32>
    %c0_8 = arith.constant 0 : index
    %c1 = arith.constant 1 : index
    %c0_9 = arith.constant 0 : index
    %c0_10 = arith.constant 0 : index
    %9 = vector.load %arg5[%c0_8, %c1, %c0_9, %c0_10] : memref<3x3x128x128xf32, #tpu.memory_space<vmem>>, vector<1x1x128x128xf32>
    %10 = vector.shape_cast %9 : vector<1x1x128x128xf32> to vector<128x128xf32>
    %cst_11 = arith.constant dense<0.000000e+00> : vector<16x128xf32>
    %11 = tpu.matmul %8, %10, %cst_11 {dimension_numbers = #tpu.dot_dimension_numbers<[1], [0], [0], [1], [0, 0, 1, 1], [], []>} : vector<16x128xf32>, vector<128x128xf32>, vector<16x128xf32> -> vector<16x128xf32>
    %12 = arith.addf %7, %11 : vector<16x128xf32>
    %13 = vector.extract_strided_slice %2 {offsets = [2, 0], sizes = [16, 128], strides = [1, 1]} : vector<18x128xf32> to vector<16x128xf32>
    %c0_12 = arith.constant 0 : index
    %c2 = arith.constant 2 : index
    %c0_13 = arith.constant 0 : index
    %c0_14 = arith.constant 0 : index
    %14 = vector.load %arg5[%c0_12, %c2, %c0_13, %c0_14] : memref<3x3x128x128xf32, #tpu.memory_space<vmem>>, vector<1x1x128x128xf32>
    %15 = vector.shape_cast %14 : vector<1x1x128x128xf32> to vector<128x128xf32>
    %cst_15 = arith.constant dense<0.000000e+00> : vector<16x128xf32>
    %16 = tpu.matmul %13, %15, %cst_15 {dimension_numbers = #tpu.dot_dimension_numbers<[1], [0], [0], [1], [0, 0, 1, 1], [], []>} : vector<16x128xf32>, vector<128x128xf32>, vector<16x128xf32> -> vector<16x128xf32>
    %17 = arith.addf %12, %16 : vector<16x128xf32>
    %c0_16 = arith.constant 0 : index
    %c0_17 = arith.constant 0 : index
    %c0_18 = arith.constant 0 : index
    %c0_19 = arith.constant 0 : index
    %18 = vector.load %arg3[%c0_16, %c0_17, %c0_18, %c0_19] : memref<1x1x18x128xf32, #tpu.memory_space<vmem>>, vector<1x1x18x128xf32>
    %19 = vector.shape_cast %18 : vector<1x1x18x128xf32> to vector<18x128xf32>
    %20 = vector.extract_strided_slice %19 {offsets = [0, 0], sizes = [16, 128], strides = [1, 1]} : vector<18x128xf32> to vector<16x128xf32>
    %c1_20 = arith.constant 1 : index
    %c0_21 = arith.constant 0 : index
    %c0_22 = arith.constant 0 : index
    %c0_23 = arith.constant 0 : index
    %21 = vector.load %arg5[%c1_20, %c0_21, %c0_22, %c0_23] : memref<3x3x128x128xf32, #tpu.memory_space<vmem>>, vector<1x1x128x128xf32>
    %22 = vector.shape_cast %21 : vector<1x1x128x128xf32> to vector<128x128xf32>
    %cst_24 = arith.constant dense<0.000000e+00> : vector<16x128xf32>
    %23 = tpu.matmul %20, %22, %cst_24 {dimension_numbers = #tpu.dot_dimension_numbers<[1], [0], [0], [1], [0, 0, 1, 1], [], []>} : vector<16x128xf32>, vector<128x128xf32>, vector<16x128xf32> -> vector<16x128xf32>
    %24 = arith.addf %17, %23 : vector<16x128xf32>
    %25 = vector.extract_strided_slice %19 {offsets = [1, 0], sizes = [16, 128], strides = [1, 1]} : vector<18x128xf32> to vector<16x128xf32>
    %c1_25 = arith.constant 1 : index
    %c1_26 = arith.constant 1 : index
    %c0_27 = arith.constant 0 : index
    %c0_28 = arith.constant 0 : index
    %26 = vector.load %arg5[%c1_25, %c1_26, %c0_27, %c0_28] : memref<3x3x128x128xf32, #tpu.memory_space<vmem>>, vector<1x1x128x128xf32>
    %27 = vector.shape_cast %26 : vector<1x1x128x128xf32> to vector<128x128xf32>
    %cst_29 = arith.constant dense<0.000000e+00> : vector<16x128xf32>
    %28 = tpu.matmul %25, %27, %cst_29 {dimension_numbers = #tpu.dot_dimension_numbers<[1], [0], [0], [1], [0, 0, 1, 1], [], []>} : vector<16x128xf32>, vector<128x128xf32>, vector<16x128xf32> -> vector<16x128xf32>
    %29 = arith.addf %24, %28 : vector<16x128xf32>
    %30 = vector.extract_strided_slice %19 {offsets = [2, 0], sizes = [16, 128], strides = [1, 1]} : vector<18x128xf32> to vector<16x128xf32>
    %c1_30 = arith.constant 1 : index
    %c2_31 = arith.constant 2 : index
    %c0_32 = arith.constant 0 : index
    %c0_33 = arith.constant 0 : index
    %31 = vector.load %arg5[%c1_30, %c2_31, %c0_32, %c0_33] : memref<3x3x128x128xf32, #tpu.memory_space<vmem>>, vector<1x1x128x128xf32>
    %32 = vector.shape_cast %31 : vector<1x1x128x128xf32> to vector<128x128xf32>
    %cst_34 = arith.constant dense<0.000000e+00> : vector<16x128xf32>
    %33 = tpu.matmul %30, %32, %cst_34 {dimension_numbers = #tpu.dot_dimension_numbers<[1], [0], [0], [1], [0, 0, 1, 1], [], []>} : vector<16x128xf32>, vector<128x128xf32>, vector<16x128xf32> -> vector<16x128xf32>
    %34 = arith.addf %29, %33 : vector<16x128xf32>
    %c0_35 = arith.constant 0 : index
    %c0_36 = arith.constant 0 : index
    %c0_37 = arith.constant 0 : index
    %c0_38 = arith.constant 0 : index
    %35 = vector.load %arg4[%c0_35, %c0_36, %c0_37, %c0_38] : memref<1x1x18x128xf32, #tpu.memory_space<vmem>>, vector<1x1x18x128xf32>
    %36 = vector.shape_cast %35 : vector<1x1x18x128xf32> to vector<18x128xf32>
    %37 = vector.extract_strided_slice %36 {offsets = [0, 0], sizes = [16, 128], strides = [1, 1]} : vector<18x128xf32> to vector<16x128xf32>
    %c2_39 = arith.constant 2 : index
    %c0_40 = arith.constant 0 : index
    %c0_41 = arith.constant 0 : index
    %c0_42 = arith.constant 0 : index
    %38 = vector.load %arg5[%c2_39, %c0_40, %c0_41, %c0_42] : memref<3x3x128x128xf32, #tpu.memory_space<vmem>>, vector<1x1x128x128xf32>
    %39 = vector.shape_cast %38 : vector<1x1x128x128xf32> to vector<128x128xf32>
    %cst_43 = arith.constant dense<0.000000e+00> : vector<16x128xf32>
    %40 = tpu.matmul %37, %39, %cst_43 {dimension_numbers = #tpu.dot_dimension_numbers<[1], [0], [0], [1], [0, 0, 1, 1], [], []>} : vector<16x128xf32>, vector<128x128xf32>, vector<16x128xf32> -> vector<16x128xf32>
    %41 = arith.addf %34, %40 : vector<16x128xf32>
    %42 = vector.extract_strided_slice %36 {offsets = [1, 0], sizes = [16, 128], strides = [1, 1]} : vector<18x128xf32> to vector<16x128xf32>
    %c2_44 = arith.constant 2 : index
    %c1_45 = arith.constant 1 : index
    %c0_46 = arith.constant 0 : index
    %c0_47 = arith.constant 0 : index
    %43 = vector.load %arg5[%c2_44, %c1_45, %c0_46, %c0_47] : memref<3x3x128x128xf32, #tpu.memory_space<vmem>>, vector<1x1x128x128xf32>
    %44 = vector.shape_cast %43 : vector<1x1x128x128xf32> to vector<128x128xf32>
    %cst_48 = arith.constant dense<0.000000e+00> : vector<16x128xf32>
    %45 = tpu.matmul %42, %44, %cst_48 {dimension_numbers = #tpu.dot_dimension_numbers<[1], [0], [0], [1], [0, 0, 1, 1], [], []>} : vector<16x128xf32>, vector<128x128xf32>, vector<16x128xf32> -> vector<16x128xf32>
    %46 = arith.addf %41, %45 : vector<16x128xf32>
    %47 = vector.extract_strided_slice %36 {offsets = [2, 0], sizes = [16, 128], strides = [1, 1]} : vector<18x128xf32> to vector<16x128xf32>
    %c2_49 = arith.constant 2 : index
    %c2_50 = arith.constant 2 : index
    %c0_51 = arith.constant 0 : index
    %c0_52 = arith.constant 0 : index
    %48 = vector.load %arg5[%c2_49, %c2_50, %c0_51, %c0_52] : memref<3x3x128x128xf32, #tpu.memory_space<vmem>>, vector<1x1x128x128xf32>
    %49 = vector.shape_cast %48 : vector<1x1x128x128xf32> to vector<128x128xf32>
    %cst_53 = arith.constant dense<0.000000e+00> : vector<16x128xf32>
    %50 = tpu.matmul %47, %49, %cst_53 {dimension_numbers = #tpu.dot_dimension_numbers<[1], [0], [0], [1], [0, 0, 1, 1], [], []>} : vector<16x128xf32>, vector<128x128xf32>, vector<16x128xf32> -> vector<16x128xf32>
    %51 = arith.addf %46, %50 : vector<16x128xf32>
    %c0_54 = arith.constant 0 : index
    %c0_55 = arith.constant 0 : index
    %52 = vector.load %arg6[%c0_54, %c0_55] : memref<1x128xf32, #tpu.memory_space<vmem>>, vector<1x128xf32>
    %53 = vector.broadcast %52 : vector<1x128xf32> to vector<16x128xf32>
    %54 = arith.addf %51, %53 : vector<16x128xf32>
    %c0_56 = arith.constant 0 : index
    %c0_57 = arith.constant 0 : index
    %c0_58 = arith.constant 0 : index
    %c0_59 = arith.constant 0 : index
    %55 = vector.load %arg7[%c0_56, %c0_57, %c0_58, %c0_59] : memref<1x1x16x128xf32, #tpu.memory_space<vmem>>, vector<1x1x16x128xf32>
    %56 = vector.shape_cast %55 : vector<1x1x16x128xf32> to vector<16x128xf32>
    %57 = vector.shape_cast %54 : vector<16x128xf32> to vector<1x1x16x128xf32>
    tpu.vector_store %arg7[%c0_56, %c0_57, %c0_58, %c0_59], %57 {strides = array<i32>} : memref<1x1x16x128xf32, #tpu.memory_space<vmem>>, vector<1x1x16x128xf32>,
    %c0_i32 = arith.constant 0 : i32
    %58 = arith.cmpi eq, %arg1, %c0_i32 : i32
    %59 = arith.extui %58 : i1 to i32
    %c0_i32_60 = arith.constant 0 : i32
    %60 = arith.cmpi ne, %59, %c0_i32_60 : i32
    scf.if %60 {
      %cst_75 = arith.constant 0.000000e+00 : f32
      %78 = vector.broadcast %cst_75 : f32 to vector<1x1x128xf32>
      %c0_76 = arith.constant 0 : index
      %c0_77 = arith.constant 0 : index
      %c0_78 = arith.constant 0 : index
      %79 = vector.load %arg8[%c0_76, %c0_77, %c0_78] : memref<1x1x128xf32, #tpu.memory_space<vmem>>, vector<1x1x128xf32>
      tpu.vector_store %arg8[%c0_76, %c0_77, %c0_78], %78 {strides = array<i32>} : memref<1x1x128xf32, #tpu.memory_space<vmem>>, vector<1x1x128xf32>,
      %cst_79 = arith.constant 0.000000e+00 : f32
      %80 = vector.broadcast %cst_79 : f32 to vector<1x1x128xf32>
      %c0_80 = arith.constant 0 : index
      %c0_81 = arith.constant 0 : index
      %c0_82 = arith.constant 0 : index
      %81 = vector.load %arg9[%c0_80, %c0_81, %c0_82] : memref<1x1x128xf32, #tpu.memory_space<vmem>>, vector<1x1x128xf32>
      tpu.vector_store %arg9[%c0_80, %c0_81, %c0_82], %80 {strides = array<i32>} : memref<1x1x128xf32, #tpu.memory_space<vmem>>, vector<1x1x128xf32>,
    } else {
    }
    %c0_61 = arith.constant 0 : index
    %c0_62 = arith.constant 0 : index
    %c0_63 = arith.constant 0 : index
    %61 = vector.load %arg8[%c0_61, %c0_62, %c0_63] : memref<1x1x128xf32, #tpu.memory_space<vmem>>, vector<1x1x128xf32>
    %62 = vector.shape_cast %61 : vector<1x1x128xf32> to vector<1x128xf32>
    %cst_64 = arith.constant dense<0.000000e+00> : vector<128xf32>
    %63 = vector.multi_reduction <add>, %54, %cst_64 [0] : vector<16x128xf32> to vector<128xf32>
    %64 = vector.shape_cast %63 : vector<128xf32> to vector<1x128xf32>
    %65 = arith.addf %62, %64 : vector<1x128xf32>
    %c0_65 = arith.constant 0 : index
    %c0_66 = arith.constant 0 : index
    %c0_67 = arith.constant 0 : index
    %66 = vector.load %arg8[%c0_65, %c0_66, %c0_67] : memref<1x1x128xf32, #tpu.memory_space<vmem>>, vector<1x1x128xf32>
    %67 = vector.shape_cast %66 : vector<1x1x128xf32> to vector<1x128xf32>
    %68 = vector.shape_cast %65 : vector<1x128xf32> to vector<1x1x128xf32>
    tpu.vector_store %arg8[%c0_65, %c0_66, %c0_67], %68 {strides = array<i32>} : memref<1x1x128xf32, #tpu.memory_space<vmem>>, vector<1x1x128xf32>,
    %c0_68 = arith.constant 0 : index
    %c0_69 = arith.constant 0 : index
    %c0_70 = arith.constant 0 : index
    %69 = vector.load %arg9[%c0_68, %c0_69, %c0_70] : memref<1x1x128xf32, #tpu.memory_space<vmem>>, vector<1x1x128xf32>
    %70 = vector.shape_cast %69 : vector<1x1x128xf32> to vector<1x128xf32>
    %71 = arith.mulf %54, %54 : vector<16x128xf32>
    %cst_71 = arith.constant dense<0.000000e+00> : vector<128xf32>
    %72 = vector.multi_reduction <add>, %71, %cst_71 [0] : vector<16x128xf32> to vector<128xf32>
    %73 = vector.shape_cast %72 : vector<128xf32> to vector<1x128xf32>
    %74 = arith.addf %70, %73 : vector<1x128xf32>
    %c0_72 = arith.constant 0 : index
    %c0_73 = arith.constant 0 : index
    %c0_74 = arith.constant 0 : index
    %75 = vector.load %arg9[%c0_72, %c0_73, %c0_74] : memref<1x1x128xf32, #tpu.memory_space<vmem>>, vector<1x1x128xf32>
    %76 = vector.shape_cast %75 : vector<1x1x128xf32> to vector<1x128xf32>
    %77 = vector.shape_cast %74 : vector<1x128xf32> to vector<1x1x128xf32>
    tpu.vector_store %arg9[%c0_72, %c0_73, %c0_74], %77 {strides = array<i32>} : memref<1x1x128xf32, #tpu.memory_space<vmem>>, vector<1x1x128xf32>,
    return
  }
  func.func @transform_0(%arg0: i32, %arg1: i32) -> (i32, i32, i32, i32) {
    %c0_i32 = arith.constant 0 : i32
    %0 = arith.addi %arg1, %c0_i32 : i32
    %c0_i32_0 = arith.constant 0 : i32
    %c0_i32_1 = arith.constant 0 : i32
    %c0_i32_2 = arith.constant 0 : i32
    return %arg0, %0, %c0_i32_0, %c0_i32_1 : i32, i32, i32, i32
  }
  func.func @transform_1(%arg0: i32, %arg1: i32) -> (i32, i32, i32, i32) {
    %c1_i32 = arith.constant 1 : i32
    %0 = arith.addi %arg1, %c1_i32 : i32
    %c0_i32 = arith.constant 0 : i32
    %c0_i32_0 = arith.constant 0 : i32
    %c0_i32_1 = arith.constant 0 : i32
    return %arg0, %0, %c0_i32, %c0_i32_0 : i32, i32, i32, i32
  }
  func.func @transform_2(%arg0: i32, %arg1: i32) -> (i32, i32, i32, i32) {
    %c2_i32 = arith.constant 2 : i32
    %0 = arith.addi %arg1, %c2_i32 : i32
    %c0_i32 = arith.constant 0 : i32
    %c0_i32_0 = arith.constant 0 : i32
    %c0_i32_1 = arith.constant 0 : i32
    return %arg0, %0, %c0_i32, %c0_i32_0 : i32, i32, i32, i32
  }
  func.func @transform_3(%arg0: i32, %arg1: i32) -> (i32, i32, i32, i32) {
    %c0_i32 = arith.constant 0 : i32
    %c0_i32_0 = arith.constant 0 : i32
    %c0_i32_1 = arith.constant 0 : i32
    %c0_i32_2 = arith.constant 0 : i32
    %c0_i32_3 = arith.constant 0 : i32
    return %c0_i32, %c0_i32_0, %c0_i32_1, %c0_i32_2 : i32, i32, i32, i32
  }
  func.func @transform_4(%arg0: i32, %arg1: i32) -> (i32, i32) {
    %c0_i32 = arith.constant 0 : i32
    %c0_i32_0 = arith.constant 0 : i32
    %c0_i32_1 = arith.constant 0 : i32
    return %c0_i32, %c0_i32_0 : i32, i32
  }
  func.func @transform_5(%arg0: i32, %arg1: i32) -> (i32, i32, i32, i32) {
    %c0_i32 = arith.constant 0 : i32
    %c0_i32_0 = arith.constant 0 : i32
    %c0_i32_1 = arith.constant 0 : i32
    return %arg0, %arg1, %c0_i32, %c0_i32_0 : i32, i32, i32, i32
  }
  func.func @transform_6(%arg0: i32, %arg1: i32) -> (i32, i32, i32) {
    %c0_i32 = arith.constant 0 : i32
    %c0_i32_0 = arith.constant 0 : i32
    %c0_i32_1 = arith.constant 0 : i32
    return %arg0, %c0_i32, %c0_i32_0 : i32, i32, i32
  }
  func.func @transform_7(%arg0: i32, %arg1: i32) -> (i32, i32, i32) {
    %c0_i32 = arith.constant 0 : i32
    %c0_i32_0 = arith.constant 0 : i32
    %c0_i32_1 = arith.constant 0 : i32
    return %arg0, %c0_i32, %c0_i32_0 : i32, i32, i32
  }
}

</mosaic_0001>

<bundles_post_ra>
// kernel: unet_decoder_forward.5
= control target key start
LH: loop header
LB: loop body
LE: loop exit
PB: predicated region body
PF: predicated region fallthrough
CT: control target
= control target key end

     0   :  { %s523_s12 = smov 0   ;;  %s525_s13 = smov 0   ;;  %s592_s0 = inlined_call_operand.vmem [shape: f32[2,8,8,8], index: 0, kind: input, shape index: {}]   ;;  %s593_s1 = inlined_call_operand.vmem [shape: f32[2,8,256], index: 1, kind: input, shape index: {}]   ;;  %s594_s2 = inlined_call_operand.vmem [shape: f32[1,256], index: 2, kind: input, shape index: {}]   ;;  %s595_s3 = inlined_call_operand.vmem [shape: f32[2,8,2,8,256], index: 3, kind: output, shape index: {}]  }
   0x1   :  { %s527_s14 = smov 0   ;;  %s529_s15 = smov 0  }
   0x2   :  { %s531_s16 = smov 0  }
   0x3 LB: > { %s22_s17 = sadd.s32 1, %s493_s14  ;;  %s25_s18 = sadd.s32 1, %s497_s15  ;;  %s501_s16 = sphi %s531_s16, %s13_s16   ;;  %s497_s15 = sphi %s529_s15, %s599_s15   ;;  %s493_s14 = sphi %s527_s14, %s598_s14   ;;  %s489_s13 = sphi %s525_s13, %s597_s13   ;;  %s485_s12 = sphi %s523_s12, %s596_s12  }
   0x4   : > { %p23_p0 = scmp.ge.s32.totalorder %s22_s17, 8  ;;  %p407_p1 = scmp.ge.s32.totalorder %s501_s16, 1 }
   0x5   : > { %p156_p2 = scmp.lt.s32.totalorder %s501_s16, 17 }
   0x6   : > { %s601_s17 = smov (%p23_p0, %s22_s17), 0  ;;  %s603_s18 = smov (!%p23_p0, %s25_s18), %s497_s15 }
   0x7   : > { %p157_p3 = pnand %p407_p1, %p156_p2  ;;  %p27_p4 = scmp.ge.s32.totalorder %s603_s18, 2 }
   0x8   : > { %p187_p5 = scmp.lt.s32.totalorder (!%p157_p3), %s489_s13, 1  ;;  %p189_p6 = scmp.lt.s32.totalorder (!%p157_p3), %s485_s12, 7 }
   0x9   : > { %s605_s18 = smov (%p27_p4, %s603_s18), 0  ;;  %160 = sbr.rel (%p157_p3) target bundleno = 156 (0x9c), region = 32 }
   0xe   : > { %v415_v0 = vld [vmem:[%s593_s1 + $0x10] sm:$0xff]  ;;  %v416_v1 = vld [vmem:[%s593_s1 + $0x18] sm:$0xff]  ;;  %v205_v2 = vld [vmem:[%s593_s1] sm:$0xff]  ;;  %s607_s13 = smov (!%p187_p5, %s489_s13), 1  ;;  %s609_s12 = smov (!%p189_p6, %s485_s12), 7  ;;  %vm213_vm0 = vcmask 64512  }
   0xf   : > { %283 = vmatpush.msra.mxu2 %v415_v0  ;;  %303 = vmatpush.msra.mxu3 %v416_v1  ;;  %v206_v3 = vld [vmem:[%s593_s1 + $0x8] sm:$0xff]  ;;  %s408_s27 = sshll.u32 %s607_s13, 3  ;;  %s411_s28 = sshll.u32 %s607_s13, 5  ;;  %v207_v5 = vld [vmem:[%s594_s2] sm:$0x3] }
  0x10   : > { %232 = vmatpush.msra.mxu0 %v205_v2  ;;  %252 = vmatpush.msra.mxu1 %v206_v3  ;;  %s192_s29 = sadd.s32 %s408_s27, %s609_s12  ;;  %s410_s30 = sshll.u32 %s609_s12, 2  ;;  %v209_v6 = vperm.slane %v207_v5, 0  ;;  %v210_v7 = vperm.slane %v207_v5, 1  ;;  %v262_v8 = vld [vmem:[%s594_s2] sm:$0x3] }
  0x11   : > { %s409_s4 = sshll.u32 %s192_s29, 3  ;;  %s201_s5 = sadd.s32 %s411_s28, %s410_s30  ;;  %v264_v13 = vperm.slane %v262_v8, 0  ;;  %v265_v14 = vperm.slane %v262_v8, 1 }
  0x12   : > { %s194_s8 = scalar_lea.vmem %s592_s0, %s409_s4  ;;  %s412_s11 = sshll.u32 %s201_s5, 3 }
  0x13   : > { %v204_v4 = vld [vmem:[%s194_s8] sm:$0xff]  ;;  %s203_s21 = scalar_lea.vmem %s595_s3, %s412_s11 }
  0x14   : > { %417 = vmatmul.msk.f32.vlgmr.msra.gmra.mxu2 %vm213_vm0, %v204_v4  ;;  %418 = vmatmul.msk.f32.vlgmr.msra.gmra.mxu3 %vm213_vm0, %v204_v4 }
  0x15   : > { %413 = vmatmul.msk.f32.vlgmr.msra.gmra.mxu0 %vm213_vm0, %v204_v4  ;;  %414 = vmatmul.msk.f32.vlgmr.msra.gmra.mxu1 %vm213_vm0, %v204_v4 }
  0x92   : > { %v234_v9 = vpop.f32.mrf.mxu0  ;;  %v254_v10 = vpop.f32.mrf.mxu1 }
  0x93   : > { %v235_v11 = vadd.f32 %v234_v9, %v209_v6  ;;  %v255_v12 = vadd.f32 %v254_v10, %v210_v7 }
  0x95   : > { %257 = vst [vmem:[%s203_s21] sm:$0xff] %v235_v11 }
  0x96   : > { %258 = vst [vmem:[%s203_s21 + $0x8] sm:$0xff] %v255_v12 }
  0x97   : > { %v285_v15 = vpop.f32.mrf.mxu2  ;;  %v305_v16 = vpop.f32.mrf.mxu3 }
  0x98   : > { %v286_v17 = vadd.f32 %v285_v15, %v264_v13  ;;  %v306_v18 = vadd.f32 %v305_v16, %v265_v14 }
  0x9a   : > { %419 = vst [vmem:[%s203_s21 + $0x10] sm:$0xff] %v286_v17 }
  0x9b   : > { %420 = vst [vmem:[%s203_s21 + $0x18] sm:$0xff] %v306_v18 }
  0x9c PF: > { %s13_s16 = sadd.s32 1, %s501_s16   ;;  %s596_s12 = smov %s493_s14 }
  0x9d   : > { %p10_p7 = scmp.ge.s32.totalorder %s13_s16, 18   ;;  %s597_s13 = smov %s497_s15 }
  0x9e   : > { %s598_s14 = smov %s601_s17  ;;  %s599_s15 = smov %s605_s18 }
  0x9f   :  { %12 = sbr.rel (!%p10_p7) target bundleno = 3 (0x3), region = 64 }

// kernel: unet_decoder_forward.7
= control target key start
LH: loop header
LB: loop body
LE: loop exit
PB: predicated region body
PF: predicated region fallthrough
CT: control target
= control target key end

     0   :  { %s893_s0 = inlined_call_operand.vmem [shape: f32[512,128], index: 0, kind: input, shape index: {}]   ;;  %s894_s1 = inlined_call_operand.vmem [shape: f32[1,128], index: 1, kind: input, shape index: {}]   ;;  %s895_s2 = inlined_call_operand.vmem [shape: f32[1,128], index: 2, kind: input, shape index: {}]   ;;  %s896_s3 = inlined_call_operand.vmem [shape: f32[512,128], index: 3, kind: output, shape index: {}]  }
   0x1   :  { %v14_v0 = vld [vmem:[%s893_s0] sm:$0xff]  ;;  %v15_v3 = vld [vmem:[%s893_s0 + $0x8] sm:$0xff]  ;;  %v16_v6 = vld [vmem:[%s893_s0 + $0x10] sm:$0xff] }
   0x2   :  { %v374_v1 = vld [vmem:[%s894_s1] ss:$0 sm:$0xff]  ;;  %v17_v7 = vld [vmem:[%s893_s0 + $0x18] sm:$0xff]  ;;  %v19_v12 = vld [vmem:[%s893_s0 + $0x28] sm:$0xff] }
   0x3   :  { %v379_v2 = vld [vmem:[%s895_s2] ss:$0 sm:$0xff]  ;;  %v82_v4 = vmul.f32 %v374_v1, %v14_v0  ;;  %v83_v5 = vmul.f32 %v374_v1, %v15_v3  ;;  %v84_v9 = vmul.f32 %v374_v1, %v16_v6  ;;  %v85_v10 = vmul.f32 %v374_v1, %v17_v7  ;;  %v20_v13 = vld [vmem:[%s893_s0 + $0x30] sm:$0xff]  ;;  %v21_v14 = vld [vmem:[%s893_s0 + $0x38] sm:$0xff] }
   0x4   :  { %v18_v8 = vld [vmem:[%s893_s0 + $0x20] sm:$0xff]  ;;  %v87_v17 = vmul.f32 %v374_v1, %v19_v12  ;;  %v88_v18 = vmul.f32 %v374_v1, %v20_v13  ;;  %v89_v22 = vmul.f32 %v374_v1, %v21_v14  ;;  %v23_v24 = vld [vmem:[%s893_s0 + $0x48] sm:$0xff]  ;;  %v24_v29 = vld [vmem:[%s893_s0 + $0x50] sm:$0xff] }
   0x5   :  { %v86_v11 = vmul.f32 %v374_v1, %v18_v8  ;;  %v150_v15 = vadd.f32 %v379_v2, %v82_v4  ;;  %v151_v16 = vadd.f32 %v379_v2, %v83_v5  ;;  %v152_v19 = vadd.f32 %v379_v2, %v84_v9  ;;  %v22_v23 = vld [vmem:[%s893_s0 + $0x40] sm:$0xff]  ;;  %v25_v30 = vld [vmem:[%s893_s0 + $0x58] sm:$0xff]  ;;  %v27_v35 = vld [vmem:[%s893_s0 + $0x68] sm:$0xff] }
   0x6   :  { %v153_v20 = vadd.f32 %v379_v2, %v85_v10  ;;  %v155_v27 = vadd.f32 %v379_v2, %v87_v17  ;;  %v156_v28 = vadd.f32 %v379_v2, %v88_v18  ;;  %v26_v31 = vld [vmem:[%s893_s0 + $0x60] sm:$0xff]  ;;  %v157_v34 = vadd.f32 %v379_v2, %v89_v22  ;;  %v28_v36 = vld [vmem:[%s893_s0 + $0x70] sm:$0xff]  ;;  %v29_v41 = vld [vmem:[%s893_s0 + $0x78] sm:$0xff] }
   0x7   :  { %v154_v21 = vadd.f32 %v379_v2, %v86_v11  ;;  %v214_v25 = vmax.f32 %v150_v15, 0.0  ;;  %v215_v26 = vmax.f32 %v151_v16, 0.0  ;;  %v216_v32 = vmax.f32 %v152_v19, 0.0  ;;  %v30_v54 = vld [vmem:[%s893_s0 + $0x80] sm:$0xff]  ;;  %v31_v55 = vld [vmem:[%s893_s0 + $0x88] sm:$0xff]  ;;  %v32_v58 = vld [vmem:[%s893_s0 + $0x90] sm:$0xff] }
   0x8   :  { %v217_v33 = vmax.f32 %v153_v20, 0.0  ;;  %v219_v38 = vmax.f32 %v155_v27, 0.0  ;;  %v90_v39 = vmul.f32 %v374_v1, %v22_v23  ;;  %v91_v40 = vmul.f32 %v374_v1, %v23_v24  ;;  %v33_v59 = vld [vmem:[%s893_s0 + $0x98] sm:$0xff]  ;;  %v34_v62 = vld [vmem:[%s893_s0 + $0xa0] sm:$0xff]  ;;  %v35_v5 = vld [vmem:[%s893_s0 + $0xa8] sm:$0xff] }
   0x9   :  { %278 = vst [vmem:[%s896_s3] sm:$0xff] %v214_v25  ;;  %v218_v37 = vmax.f32 %v154_v21, 0.0  ;;  %v220_v42 = vmax.f32 %v156_v28, 0.0  ;;  %v92_v43 = vmul.f32 %v374_v1, %v24_v29  ;;  %v93_v44 = vmul.f32 %v374_v1, %v25_v30  ;;  %v36_v10 = vld [vmem:[%s893_s0 + $0xb0] sm:$0xff]  ;;  %v37_v14 = vld [vmem:[%s893_s0 + $0xb8] sm:$0xff]  ;;  %v38_v18 = vld [vmem:[%s893_s0 + $0xc0] sm:$0xff] }
   0xa   :  { %279 = vst [vmem:[%s896_s3 + $0x8] sm:$0xff] %v215_v26  ;;  %v94_v45 = vmul.f32 %v374_v1, %v26_v31  ;;  %v158_v46 = vadd.f32 %v379_v2, %v90_v39  ;;  %v159_v47 = vadd.f32 %v379_v2, %v91_v40  ;;  %v95_v48 = vmul.f32 %v374_v1, %v27_v35  ;;  %v39_v22 = vld [vmem:[%s893_s0 + $0xc8] sm:$0xff]  ;;  %v40_v26 = vld [vmem:[%s893_s0 + $0xd0] sm:$0xff]  ;;  %v41_v30 = vld [vmem:[%s893_s0 + $0xd8] sm:$0xff] }
   0xb   :  { %280 = vst [vmem:[%s896_s3 + $0x10] sm:$0xff] %v216_v32  ;;  %v96_v49 = vmul.f32 %v374_v1, %v28_v36  ;;  %v221_v50 = vmax.f32 %v157_v34, 0.0  ;;  %v160_v51 = vadd.f32 %v379_v2, %v92_v43  ;;  %v161_v52 = vadd.f32 %v379_v2, %v93_v44  ;;  %v42_v34 = vld [vmem:[%s893_s0 + $0xe0] sm:$0xff] }
   0xc   :  { %281 = vst [vmem:[%s896_s3 + $0x18] sm:$0xff] %v217_v33  ;;  %v97_v53 = vmul.f32 %v374_v1, %v29_v41  ;;  %v222_v56 = vmax.f32 %v158_v46, 0.0  ;;  %v162_v57 = vadd.f32 %v379_v2, %v94_v45  ;;  %v223_v60 = vmax.f32 %v159_v47, 0.0  ;;  %v45_v46 = vld [vmem:[%s893_s0 + $0xf8] sm:$0xff] }
   0xd   :  { %282 = vst [vmem:[%s896_s3 + $0x20] sm:$0xff] %v218_v37  ;;  %v163_v61 = vadd.f32 %v379_v2, %v95_v48  ;;  %v224_v63 = vmax.f32 %v160_v51, 0.0  ;;  %v164_v0 = vadd.f32 %v379_v2, %v96_v49  ;;  %v98_v3 = vmul.f32 %v374_v1, %v30_v54  ;;  %v47_v54 = vld [vmem:[%s893_s0 + $0x108] sm:$0xff] }
   0xe   :  { %283 = vst [vmem:[%s896_s3 + $0x28] sm:$0xff] %v219_v38  ;;  %v99_v4 = vmul.f32 %v374_v1, %v31_v55  ;;  %v225_v6 = vmax.f32 %v161_v52, 0.0  ;;  %v165_v7 = vadd.f32 %v379_v2, %v97_v53  ;;  %v100_v8 = vmul.f32 %v374_v1, %v32_v58  ;;  %v43_v38 = vld [vmem:[%s893_s0 + $0xe8] sm:$0xff]  ;;  %v48_v58 = vld [vmem:[%s893_s0 + $0x110] sm:$0xff] }
   0xf   :  { %284 = vst [vmem:[%s896_s3 + $0x30] sm:$0xff] %v220_v42  ;;  %v101_v9 = vmul.f32 %v374_v1, %v33_v59  ;;  %v226_v11 = vmax.f32 %v162_v57, 0.0  ;;  %v166_v12 = vadd.f32 %v379_v2, %v98_v3  ;;  %v102_v13 = vmul.f32 %v374_v1, %v34_v62  ;;  %v44_v42 = vld [vmem:[%s893_s0 + $0xf0] sm:$0xff]  ;;  %v49_v62 = vld [vmem:[%s893_s0 + $0x118] sm:$0xff] }
  0x10   :  { %285 = vst [vmem:[%s896_s3 + $0x38] sm:$0xff] %v221_v50  ;;  %v227_v15 = vmax.f32 %v163_v61, 0.0  ;;  %v167_v16 = vadd.f32 %v379_v2, %v99_v4  ;;  %v103_v17 = vmul.f32 %v374_v1, %v35_v5  ;;  %v228_v19 = vmax.f32 %v164_v0, 0.0  ;;  %v46_v50 = vld [vmem:[%s893_s0 + $0x100] sm:$0xff] }
  0x11   :  { %286 = vst [vmem:[%s896_s3 + $0x40] sm:$0xff] %v222_v56  ;;  %v168_v20 = vadd.f32 %v379_v2, %v100_v8  ;;  %v104_v21 = vmul.f32 %v374_v1, %v36_v10  ;;  %v229_v23 = vmax.f32 %v165_v7, 0.0  ;;  %v169_v24 = vadd.f32 %v379_v2, %v101_v9  ;;  %v50_v4 = vld [vmem:[%s893_s0 + $0x120] sm:$0xff]  ;;  %v51_v8 = vld [vmem:[%s893_s0 + $0x128] sm:$0xff] }
  0x12   :  { %287 = vst [vmem:[%s896_s3 + $0x48] sm:$0xff] %v223_v60  ;;  %v105_v25 = vmul.f32 %v374_v1, %v37_v14  ;;  %v230_v27 = vmax.f32 %v166_v12, 0.0  ;;  %v170_v28 = vadd.f32 %v379_v2, %v102_v13  ;;  %v106_v29 = vmul.f32 %v374_v1, %v38_v18  ;;  %v52_v12 = vld [vmem:[%s893_s0 + $0x130] sm:$0xff] }
  0x13   :  { %288 = vst [vmem:[%s896_s3 + $0x50] sm:$0xff] %v224_v63  ;;  %v231_v31 = vmax.f32 %v167_v16, 0.0  ;;  %v171_v32 = vadd.f32 %v379_v2, %v103_v17  ;;  %v107_v33 = vmul.f32 %v374_v1, %v39_v22  ;;  %v232_v35 = vmax.f32 %v168_v20, 0.0  ;;  %v53_v16 = vld [vmem:[%s893_s0 + $0x138] sm:$0xff]  ;;  %v54_v20 = vld [vmem:[%s893_s0 + $0x140] sm:$0xff] }
  0x14   :  { %289 = vst [vmem:[%s896_s3 + $0x58] sm:$0xff] %v225_v6  ;;  %v172_v36 = vadd.f32 %v379_v2, %v104_v21  ;;  %v108_v37 = vmul.f32 %v374_v1, %v40_v26  ;;  %v233_v39 = vmax.f32 %v169_v24, 0.0  ;;  %v173_v40 = vadd.f32 %v379_v2, %v105_v25  ;;  %v55_v24 = vld [vmem:[%s893_s0 + $0x148] sm:$0xff] }
  0x15   :  { %290 = vst [vmem:[%s896_s3 + $0x60] sm:$0xff] %v226_v11  ;;  %v109_v41 = vmul.f32 %v374_v1, %v41_v30  ;;  %v234_v43 = vmax.f32 %v170_v28, 0.0  ;;  %v174_v44 = vadd.f32 %v379_v2, %v106_v29  ;;  %v110_v45 = vmul.f32 %v374_v1, %v42_v34  ;;  %v56_v28 = vld [vmem:[%s893_s0 + $0x150] sm:$0xff] }
  0x16   :  { %291 = vst [vmem:[%s896_s3 + $0x68] sm:$0xff] %v227_v15  ;;  %v235_v47 = vmax.f32 %v171_v32, 0.0  ;;  %v175_v48 = vadd.f32 %v379_v2, %v107_v33  ;;  %v111_v49 = vmul.f32 %v374_v1, %v43_v38  ;;  %v236_v51 = vmax.f32 %v172_v36, 0.0  ;;  %v57_v32 = vld [vmem:[%s893_s0 + $0x158] sm:$0xff]  ;;  %v58_v36 = vld [vmem:[%s893_s0 + $0x160] sm:$0xff] }
  0x17   :  { %292 = vst [vmem:[%s896_s3 + $0x70] sm:$0xff] %v228_v19  ;;  %v176_v52 = vadd.f32 %v379_v2, %v108_v37  ;;  %v112_v53 = vmul.f32 %v374_v1, %v44_v42  ;;  %v237_v55 = vmax.f32 %v173_v40, 0.0  ;;  %v177_v56 = vadd.f32 %v379_v2, %v109_v41  ;;  %v59_v40 = vld [vmem:[%s893_s0 + $0x168] sm:$0xff] }
  0x18   :  { %293 = vst [vmem:[%s896_s3 + $0x78] sm:$0xff] %v229_v23  ;;  %v113_v57 = vmul.f32 %v374_v1, %v45_v46  ;;  %v238_v59 = vmax.f32 %v174_v44, 0.0  ;;  %v178_v60 = vadd.f32 %v379_v2, %v110_v45  ;;  %v114_v61 = vmul.f32 %v374_v1, %v46_v50  ;;  %v60_v44 = vld [vmem:[%s893_s0 + $0x170] sm:$0xff] }
  0x19   :  { %294 = vst [vmem:[%s896_s3 + $0x80] sm:$0xff] %v230_v27  ;;  %v239_v63 = vmax.f32 %v175_v48, 0.0  ;;  %v179_v0 = vadd.f32 %v379_v2, %v111_v49  ;;  %v115_v3 = vmul.f32 %v374_v1, %v47_v54  ;;  %v240_v5 = vmax.f32 %v176_v52, 0.0  ;;  %v61_v48 = vld [vmem:[%s893_s0 + $0x178] sm:$0xff]  ;;  %v62_v52 = vld [vmem:[%s893_s0 + $0x180] sm:$0xff] }
  0x1a   :  { %295 = vst [vmem:[%s896_s3 + $0x88] sm:$0xff] %v231_v31  ;;  %v180_v6 = vadd.f32 %v379_v2, %v112_v53  ;;  %v116_v7 = vmul.f32 %v374_v1, %v48_v58  ;;  %v241_v9 = vmax.f32 %v177_v56, 0.0  ;;  %v181_v10 = vadd.f32 %v379_v2, %v113_v57  ;;  %v63_v56 = vld [vmem:[%s893_s0 + $0x188] sm:$0xff] }
  0x1b   :  { %296 = vst [vmem:[%s896_s3 + $0x90] sm:$0xff] %v232_v35  ;;  %v117_v11 = vmul.f32 %v374_v1, %v49_v62  ;;  %v242_v13 = vmax.f32 %v178_v60, 0.0  ;;  %v182_v14 = vadd.f32 %v379_v2, %v114_v61  ;;  %v118_v15 = vmul.f32 %v374_v1, %v50_v4  ;;  %v64_v60 = vld [vmem:[%s893_s0 + $0x190] sm:$0xff] }
  0x1c   :  { %297 = vst [vmem:[%s896_s3 + $0x98] sm:$0xff] %v233_v39  ;;  %v243_v17 = vmax.f32 %v179_v0, 0.0  ;;  %v183_v18 = vadd.f32 %v379_v2, %v115_v3  ;;  %v119_v19 = vmul.f32 %v374_v1, %v51_v8  ;;  %v244_v21 = vmax.f32 %v180_v6, 0.0  ;;  %v65_v0 = vld [vmem:[%s893_s0 + $0x198] sm:$0xff] }
  0x1d   :  { %298 = vst [vmem:[%s896_s3 + $0xa0] sm:$0xff] %v234_v43  ;;  %v184_v22 = vadd.f32 %v379_v2, %v116_v7  ;;  %v120_v23 = vmul.f32 %v374_v1, %v52_v12  ;;  %v245_v25 = vmax.f32 %v181_v10, 0.0  ;;  %v185_v26 = vadd.f32 %v379_v2, %v117_v11  ;;  %v77_v3 = vld [vmem:[%s893_s0 + $0x1f8] sm:$0xff]  ;;  %v66_v7 = vld [vmem:[%s893_s0 + $0x1a0] sm:$0xff]  ;;  %v67_v11 = vld [vmem:[%s893_s0 + $0x1a8] sm:$0xff] }
  0x1e   :  { %299 = vst [vmem:[%s896_s3 + $0xa8] sm:$0xff] %v235_v47  ;;  %v121_v27 = vmul.f32 %v374_v1, %v53_v16  ;;  %v246_v29 = vmax.f32 %v182_v14, 0.0  ;;  %v186_v30 = vadd.f32 %v379_v2, %v118_v15  ;;  %v122_v31 = vmul.f32 %v374_v1, %v54_v20  ;;  %v68_v15 = vld [vmem:[%s893_s0 + $0x1b0] sm:$0xff]  ;;  %v69_v20 = vld [vmem:[%s893_s0 + $0x1b8] sm:$0xff] }
  0x1f   :  { %300 = vst [vmem:[%s896_s3 + $0xb0] sm:$0xff] %v236_v51  ;;  %v247_v33 = vmax.f32 %v183_v18, 0.0  ;;  %v187_v34 = vadd.f32 %v379_v2, %v119_v19  ;;  %v123_v35 = vmul.f32 %v374_v1, %v55_v24  ;;  %v248_v37 = vmax.f32 %v184_v22, 0.0  ;;  %v70_v24 = vld [vmem:[%s893_s0 + $0x1c0] sm:$0xff] }
  0x20   :  { %301 = vst [vmem:[%s896_s3 + $0xb8] sm:$0xff] %v237_v55  ;;  %v188_v38 = vadd.f32 %v379_v2, %v120_v23  ;;  %v124_v39 = vmul.f32 %v374_v1, %v56_v28  ;;  %v249_v41 = vmax.f32 %v185_v26, 0.0  ;;  %v189_v42 = vadd.f32 %v379_v2, %v121_v27 }
  0x21   :  { %302 = vst [vmem:[%s896_s3 + $0xc0] sm:$0xff] %v238_v59  ;;  %v125_v43 = vmul.f32 %v374_v1, %v57_v32  ;;  %v250_v45 = vmax.f32 %v186_v30, 0.0  ;;  %v190_v46 = vadd.f32 %v379_v2, %v122_v31  ;;  %v126_v47 = vmul.f32 %v374_v1, %v58_v36 }
  0x22   :  { %303 = vst [vmem:[%s896_s3 + $0xc8] sm:$0xff] %v239_v63  ;;  %v251_v49 = vmax.f32 %v187_v34, 0.0  ;;  %v191_v50 = vadd.f32 %v379_v2, %v123_v35  ;;  %v127_v51 = vmul.f32 %v374_v1, %v59_v40  ;;  %v252_v53 = vmax.f32 %v188_v38, 0.0 }
  0x23   :  { %304 = vst [vmem:[%s896_s3 + $0xd0] sm:$0xff] %v240_v5  ;;  %v192_v54 = vadd.f32 %v379_v2, %v124_v39  ;;  %v128_v55 = vmul.f32 %v374_v1, %v60_v44  ;;  %v253_v57 = vmax.f32 %v189_v42, 0.0  ;;  %v193_v58 = vadd.f32 %v379_v2, %v125_v43 }
  0x24   :  { %305 = vst [vmem:[%s896_s3 + $0xd8] sm:$0xff] %v241_v9  ;;  %v129_v59 = vmul.f32 %v374_v1, %v61_v48  ;;  %v254_v61 = vmax.f32 %v190_v46, 0.0  ;;  %v194_v62 = vadd.f32 %v379_v2, %v126_v47  ;;  %v130_v63 = vmul.f32 %v374_v1, %v62_v52 }
  0x25   :  { %306 = vst [vmem:[%s896_s3 + $0xe0] sm:$0xff] %v242_v13  ;;  %v255_v4 = vmax.f32 %v191_v50, 0.0  ;;  %v195_v5 = vadd.f32 %v379_v2, %v127_v51  ;;  %v131_v6 = vmul.f32 %v374_v1, %v63_v56  ;;  %v256_v8 = vmax.f32 %v192_v54, 0.0 }
  0x26   :  { %307 = vst [vmem:[%s896_s3 + $0xe8] sm:$0xff] %v243_v17  ;;  %v196_v9 = vadd.f32 %v379_v2, %v128_v55  ;;  %v132_v10 = vmul.f32 %v374_v1, %v64_v60  ;;  %v257_v12 = vmax.f32 %v193_v58, 0.0  ;;  %v197_v13 = vadd.f32 %v379_v2, %v129_v59 }
  0x27   :  { %308 = vst [vmem:[%s896_s3 + $0xf0] sm:$0xff] %v244_v21  ;;  %v133_v14 = vmul.f32 %v374_v1, %v65_v0  ;;  %v145_v16 = vmul.f32 %v374_v1, %v77_v3  ;;  %v258_v17 = vmax.f32 %v194_v62, 0.0  ;;  %v198_v18 = vadd.f32 %v379_v2, %v130_v63 }
  0x28   :  { %309 = vst [vmem:[%s896_s3 + $0xf8] sm:$0xff] %v245_v25  ;;  %v134_v19 = vmul.f32 %v374_v1, %v66_v7  ;;  %v259_v21 = vmax.f32 %v195_v5, 0.0  ;;  %v199_v22 = vadd.f32 %v379_v2, %v131_v6  ;;  %v135_v23 = vmul.f32 %v374_v1, %v67_v11 }
  0x29   :  { %310 = vst [vmem:[%s896_s3 + $0x100] sm:$0xff] %v246_v29  ;;  %v784_v25 = vadd.f32 %v379_v2, %v145_v16  ;;  %v260_v26 = vmax.f32 %v196_v9, 0.0  ;;  %v200_v27 = vadd.f32 %v379_v2, %v132_v10  ;;  %v136_v28 = vmul.f32 %v374_v1, %v68_v15  ;;  %v71_v29 = vld [vmem:[%s893_s0 + $0x1c8] sm:$0xff] }
  0x2a   :  { %311 = vst [vmem:[%s896_s3 + $0x108] sm:$0xff] %v247_v33  ;;  %v261_v30 = vmax.f32 %v197_v13, 0.0  ;;  %v201_v31 = vadd.f32 %v379_v2, %v133_v14  ;;  %v137_v32 = vmul.f32 %v374_v1, %v69_v20  ;;  %v72_v33 = vld [vmem:[%s893_s0 + $0x1d0] sm:$0xff]  ;;  %v262_v34 = vmax.f32 %v198_v18, 0.0 }
  0x2b   :  { %312 = vst [vmem:[%s896_s3 + $0x110] sm:$0xff] %v248_v37  ;;  %v202_v35 = vadd.f32 %v379_v2, %v134_v19  ;;  %v138_v36 = vmul.f32 %v374_v1, %v70_v24  ;;  %v73_v37 = vld [vmem:[%s893_s0 + $0x1d8] sm:$0xff]  ;;  %v263_v38 = vmax.f32 %v199_v22, 0.0  ;;  %v203_v39 = vadd.f32 %v379_v2, %v135_v23 }
  0x2c   :  { %313 = vst [vmem:[%s896_s3 + $0x118] sm:$0xff] %v249_v41  ;;  %v139_v40 = vmul.f32 %v374_v1, %v71_v29  ;;  %v74_v41 = vld [vmem:[%s893_s0 + $0x1e0] sm:$0xff]  ;;  %v264_v42 = vmax.f32 %v200_v27, 0.0  ;;  %v204_v43 = vadd.f32 %v379_v2, %v136_v28  ;;  %v140_v44 = vmul.f32 %v374_v1, %v72_v33 }
  0x2d   :  { %314 = vst [vmem:[%s896_s3 + $0x120] sm:$0xff] %v250_v45  ;;  %v75_v45 = vld [vmem:[%s893_s0 + $0x1e8] sm:$0xff]  ;;  %v265_v46 = vmax.f32 %v201_v31, 0.0  ;;  %v205_v47 = vadd.f32 %v379_v2, %v137_v32  ;;  %v141_v48 = vmul.f32 %v374_v1, %v73_v37  ;;  %v266_v50 = vmax.f32 %v202_v35, 0.0 }
  0x2e   :  { %315 = vst [vmem:[%s896_s3 + $0x128] sm:$0xff] %v251_v49  ;;  %v76_v49 = vld [vmem:[%s893_s0 + $0x1f0] sm:$0xff]  ;;  %v206_v51 = vadd.f32 %v379_v2, %v138_v36  ;;  %v142_v52 = vmul.f32 %v374_v1, %v74_v41  ;;  %v207_v54 = vadd.f32 %v379_v2, %v139_v40  ;;  %v143_v55 = vmul.f32 %v374_v1, %v75_v45 }
  0x2f   :  { %316 = vst [vmem:[%s896_s3 + $0x130] sm:$0xff] %v252_v53  ;;  %v267_v53 = vmax.f32 %v203_v39, 0.0  ;;  %v268_v56 = vmax.f32 %v204_v43, 0.0  ;;  %v144_v58 = vmul.f32 %v374_v1, %v76_v49  ;;  %v269_v59 = vmax.f32 %v205_v47, 0.0 }
  0x30   :  { %317 = vst [vmem:[%s896_s3 + $0x138] sm:$0xff] %v253_v57  ;;  %v208_v57 = vadd.f32 %v379_v2, %v140_v44  ;;  %v209_v60 = vadd.f32 %v379_v2, %v141_v48  ;;  %v210_v62 = vadd.f32 %v379_v2, %v142_v52  ;;  %v271_v63 = vmax.f32 %v207_v54, 0.0 }
  0x31   :  { %318 = vst [vmem:[%s896_s3 + $0x140] sm:$0xff] %v254_v61  ;;  %v270_v61 = vmax.f32 %v206_v51, 0.0  ;;  %v211_v1 = vadd.f32 %v379_v2, %v143_v55  ;;  %v212_v3 = vadd.f32 %v379_v2, %v144_v58  ;;  %v277_v7 = vmax.f32 %v784_v25, 0.0 }
  0x32   :  { %319 = vst [vmem:[%s896_s3 + $0x148] sm:$0xff] %v255_v4  ;;  %v272_v0 = vmax.f32 %v208_v57, 0.0  ;;  %v273_v4 = vmax.f32 %v209_v60, 0.0  ;;  %v274_v5 = vmax.f32 %v210_v62, 0.0 }
  0x33   :  { %320 = vst [vmem:[%s896_s3 + $0x150] sm:$0xff] %v256_v8  ;;  %v275_v6 = vmax.f32 %v211_v1, 0.0  ;;  %v276_v2 = vmax.f32 %v212_v3, 0.0 }
  0x34   :  { %321 = vst [vmem:[%s896_s3 + $0x158] sm:$0xff] %v257_v12 }
  0x35   :  { %322 = vst [vmem:[%s896_s3 + $0x160] sm:$0xff] %v258_v17 }
  0x36   :  { %323 = vst [vmem:[%s896_s3 + $0x168] sm:$0xff] %v259_v21 }
  0x37   :  { %324 = vst [vmem:[%s896_s3 + $0x170] sm:$0xff] %v260_v26 }
  0x38   :  { %325 = vst [vmem:[%s896_s3 + $0x178] sm:$0xff] %v261_v30 }
  0x39   :  { %326 = vst [vmem:[%s896_s3 + $0x180] sm:$0xff] %v262_v34 }
  0x3a   :  { %327 = vst [vmem:[%s896_s3 + $0x188] sm:$0xff] %v263_v38 }
  0x3b   :  { %328 = vst [vmem:[%s896_s3 + $0x190] sm:$0xff] %v264_v42 }
  0x3c   :  { %329 = vst [vmem:[%s896_s3 + $0x198] sm:$0xff] %v265_v46 }
  0x3d   :  { %330 = vst [vmem:[%s896_s3 + $0x1a0] sm:$0xff] %v266_v50 }
  0x3e   :  { %331 = vst [vmem:[%s896_s3 + $0x1a8] sm:$0xff] %v267_v53 }
  0x3f   :  { %332 = vst [vmem:[%s896_s3 + $0x1b0] sm:$0xff] %v268_v56 }
  0x40   :  { %333 = vst [vmem:[%s896_s3 + $0x1b8] sm:$0xff] %v269_v59 }
  0x41   :  { %334 = vst [vmem:[%s896_s3 + $0x1c0] sm:$0xff] %v270_v61 }
  0x42   :  { %335 = vst [vmem:[%s896_s3 + $0x1c8] sm:$0xff] %v271_v63 }
  0x43   :  { %336 = vst [vmem:[%s896_s3 + $0x1d0] sm:$0xff] %v272_v0 }
  0x44   :  { %337 = vst [vmem:[%s896_s3 + $0x1d8] sm:$0xff] %v273_v4 }
  0x45   :  { %338 = vst [vmem:[%s896_s3 + $0x1e0] sm:$0xff] %v274_v5 }
  0x46   :  { %339 = vst [vmem:[%s896_s3 + $0x1e8] sm:$0xff] %v275_v6 }
  0x47   :  { %340 = vst [vmem:[%s896_s3 + $0x1f0] sm:$0xff] %v276_v2 }
  0x48   :  { %341 = vst [vmem:[%s896_s3 + $0x1f8] sm:$0xff] %v277_v7 }

// kernel: unet_decoder_forward.6
= control target key start
LH: loop header
LB: loop body
LE: loop exit
PB: predicated region body
PF: predicated region fallthrough
CT: control target
= control target key end

     0   :  { %s2042_s17 = smov 0   ;;  %s2044_s18 = smov 0   ;;  %s2767_s0 = inlined_call_operand.vmem [shape: f32[2,18,18,128], index: 0, kind: input, shape index: {}, may-alias: {0,1,2}]   ;;  %s2768_s1 = inlined_call_operand.vmem [shape: f32[2,18,18,128], index: 1, kind: input, shape index: {}, may-alias: {0,1,2}]   ;;  %s2769_s2 = inlined_call_operand.vmem [shape: f32[2,18,18,128], index: 2, kind: input, shape index: {}, may-alias: {0,1,2}]   ;;  %s2770_s3 = inlined_call_operand.vmem [shape: f32[2,18,18,4], index: 3, kind: input, shape index: {}, may-alias: {3,4,5}]   ;;  %s2771_s4 = inlined_call_operand.vmem [shape: f32[2,18,18,4], index: 4, kind: input, shape index: {}, may-alias: {3,4,5}]   ;;  %s2772_s5 = inlined_call_operand.vmem [shape: f32[2,18,18,4], index: 5, kind: input, shape index: {}, may-alias: {3,4,5}]   ;;  %s2773_s6 = inlined_call_operand.vmem [shape: f32[3,3,128,128], index: 6, kind: input, shape index: {}]   ;;  %s2774_s7 = inlined_call_operand.vmem [shape: f32[3,3,4,128], index: 7, kind: input, shape index: {}]   ;;  %s2775_s8 = inlined_call_operand.vmem [shape: f32[1,128], index: 8, kind: input, shape index: {}]   ;;  %s2776_s9 = inlined_call_operand.vmem [shape: f32[2,16,16,128], index: 9, kind: output, shape index: {0}]   ;;  %s2777_s10 = inlined_call_operand.vmem [shape: f32[2,1,128], index: 10, kind: output, shape index: {1}]   ;;  %s2778_s11 = inlined_call_operand.vmem [shape: f32[2,1,128], index: 11, kind: output, shape index: {2}]  }
   0x1   :  { %2782 = sst [smem:[#allocation4_spill]] %s2767_s0  ;;  %s2046_s19 = smov 0  }
   0x2   :  { %2783 = sst [smem:[#allocation5_spill]] %s2777_s10  ;;  %s2048_s20 = smov 0  }
   0x3   :  { %2784 = sst [smem:[#allocation6_spill]] %s2778_s11  ;;  %s2050_s21 = smov 0  }
   0x4 LB: > { %s31_s22 = sadd.s32 1, %s1971_s19  ;;  %s34_s23 = sadd.s32 1, %s1975_s20  ;;  %s1979_s21 = sphi %s2050_s21, %s22_s21   ;;  %s1975_s20 = sphi %s2048_s20, %s2804_s20   ;;  %s1971_s19 = sphi %s2046_s19, %s2803_s19   ;;  %s1967_s18 = sphi %s2044_s18, %s2802_s18   ;;  %s1963_s17 = sphi %s2042_s17, %s2801_s17  }
   0x5   : > { %p32_p0 = scmp.ge.s32.totalorder %s31_s22, 16  ;;  %p1718_p1 = scmp.ge.s32.totalorder %s1979_s21, 1 }
   0x6   : > { %p458_p2 = scmp.lt.s32.totalorder %s1979_s21, 33 }
   0x7   : > { %s2806_s22 = smov (%p32_p0, %s31_s22), 0  ;;  %s2808_s23 = smov (!%p32_p0, %s34_s23), %s1975_s20 }
   0x8   : > { %2785 = sst [smem:[#allocation2_spill]] %s2806_s22  ;;  %p459_p3 = pnand %p1718_p1, %p458_p2 }
   0x9   : > { %p36_p4 = scmp.ge.s32.totalorder %s2808_s23, 2  ;;  %p561_p5 = scmp.lt.s32.totalorder (!%p459_p3), %s1967_s18, 1 }
   0xa   : > { %462 = sbr.rel (%p459_p3) target bundleno = 301 (0x12d), region = 56  ;;  %s2787_s10 = sld [smem:[#allocation5_spill]] (!%p459_p3) }
   0xb   : > { %s2810_s23 = smov (%p36_p4, %s2808_s23), 0  ;;  %s2788_s11 = sld [smem:[#allocation6_spill]] (!%p459_p3) }
   0xc   : > { %2786 = sst [smem:[#allocation3_spill]] %s2810_s23  ;;  %p563_p6 = scmp.lt.s32.totalorder (!%p459_p3), %s1963_s17, 17 }
   0xd   : > { %s2791_s15 = sadd.s32 (!%p459_p3), 1, %s1963_s17  ;;  %s2792_s0 = sld [smem:[#allocation4_spill]] (!%p459_p3) }
   0xe   : > { %p625_p9 = scmp.lt.s32.totalorder (!%p459_p3), %s1963_s17, 15  ;;  %p1891_p10 = scmp.ne.s32.totalorder (!%p459_p3), %s1963_s17, 0 }
   0xf   : > { %v1743_v0 = vld [vmem:[%s2773_s6 + $0xf8] sm:$0xff]  ;;  %v1742_v4 = vld [vmem:[%s2773_s6 + $0xf0] sm:$0xff]  ;;  %v1741_v8 = vld [vmem:[%s2773_s6 + $0xe8] sm:$0xff]  ;;  %s2812_s18 = smov (!%p561_p5, %s1967_s18), 1  ;;  %vm677_vm0 = vcmask 1046528   ;;  %vm748_vm1 = vcmask 1045504  }
  0x10   : > { %v656_v1 = vld [vmem:[%s2773_s6 + $0x78] sm:$0xff]  ;;  %685 = vmatpush.msra.mxu0 %v1743_v0  ;;  %v655_v5 = vld [vmem:[%s2773_s6 + $0x70] sm:$0xff]  ;;  %v654_v9 = vld [vmem:[%s2773_s6 + $0x68] sm:$0xff]  ;;  %s2122_s30 = scalar_lea.vmem %s2787_s10, %s2812_s18  ;;  %s2258_s10 = smul.u32 54, %s2812_s18  ;;  %vm1084_vm2 = vcmask 1043456   ;;  %vm1077_vm3 = vcmask 31744  }
  0x11   : > { %v1759_v2 = vld [vmem:[%s2773_s6 + $0x178] sm:$0xff]  ;;  %708 = vmatpush.msra.mxu1 %v656_v1  ;;  %v1758_v6 = vld [vmem:[%s2773_s6 + $0x170] sm:$0xff]  ;;  %v1757_v10 = vld [vmem:[%s2773_s6 + $0x168] sm:$0xff]  ;;  %s2134_s25 = scalar_lea.vmem %s2788_s11, %s2812_s18  ;;  %s2789_s11 = sadd.s32 1, %s1963_s17 }
  0x12   : > { %v1775_v3 = vld [vmem:[%s2773_s6 + $0x1f8] sm:$0xff]  ;;  %756 = vmatpush.msra.mxu2 %v1759_v2  ;;  %v1774_v7 = vld [vmem:[%s2773_s6 + $0x1f0] sm:$0xff]  ;;  %686 = vmatpush.msra.mxu0 %v1742_v4  ;;  %v1773_v11 = vld [vmem:[%s2773_s6 + $0x1e8] sm:$0xff]  ;;  %s2236_s12 = scalar_select %p563_p6, %s1963_s17, 17 }
  0x13   : > { %801 = vmatpush.msra.mxu3 %v1775_v3  ;;  %709 = vmatpush.msra.mxu1 %v655_v5  ;;  %v1740_v12 = vld [vmem:[%s2773_s6 + $0xe0] sm:$0xff]  ;;  %v1739_v16 = vld [vmem:[%s2773_s6 + $0xd8] sm:$0xff]  ;;  %v1738_v20 = vld [vmem:[%s2773_s6 + $0xd0] sm:$0xff]  ;;  %p2275_p7 = scmp.lt.s32.totalorder %s2789_s11, 17 }
  0x14   : > { %757 = vmatpush.msra.mxu2 %v1758_v6  ;;  %v653_v13 = vld [vmem:[%s2773_s6 + $0x60] sm:$0xff]  ;;  %687 = vmatpush.msra.mxu0 %v1741_v8  ;;  %v652_v17 = vld [vmem:[%s2773_s6 + $0x58] sm:$0xff]  ;;  %v651_v21 = vld [vmem:[%s2773_s6 + $0x50] sm:$0xff]  ;;  %s1895_s29 = smul.u32 3, %s2236_s12  ;;  %s2793_s12 = sadd.s32 2, %s1963_s17 }
  0x15   : > { %802 = vmatpush.msra.mxu3 %v1774_v7  ;;  %710 = vmatpush.msra.mxu1 %v654_v9  ;;  %v1756_v14 = vld [vmem:[%s2773_s6 + $0x160] sm:$0xff]  ;;  %v1755_v18 = vld [vmem:[%s2773_s6 + $0x158] sm:$0xff]  ;;  %v1754_v22 = vld [vmem:[%s2773_s6 + $0x150] sm:$0xff]  ;;  %s2814_s15 = smov (!%p2275_p7, %s2791_s15), 17  ;;  %p2385_p8 = scmp.lt.s32.totalorder %s2793_s12, 17 }
  0x16   : > { %v1772_v15 = vld [vmem:[%s2773_s6 + $0x1e0] sm:$0xff]  ;;  %758 = vmatpush.msra.mxu2 %v1757_v10  ;;  %688 = vmatpush.msra.mxu0 %v1740_v12  ;;  %v1771_v19 = vld [vmem:[%s2773_s6 + $0x1d8] sm:$0xff]  ;;  %v1770_v23 = vld [vmem:[%s2773_s6 + $0x1d0] sm:$0xff]  ;;  %s2298_s27 = sadd.s32 %s2258_s10, %s1895_s29  ;;  %s1897_s13 = smul.u32 3, %s2814_s15 }
  0x17   : > { %803 = vmatpush.msra.mxu3 %v1773_v11  ;;  %711 = vmatpush.msra.mxu1 %v653_v13  ;;  %v1737_v24 = vld [vmem:[%s2773_s6 + $0xc8] sm:$0xff]  ;;  %v1736_v28 = vld [vmem:[%s2773_s6 + $0xc0] sm:$0xff]  ;;  %v1735_v32 = vld [vmem:[%s2773_s6 + $0xb8] sm:$0xff]  ;;  %s2779_s16 = sshll.u32 %s2298_s27, 3 }
  0x18   : > { %759 = vmatpush.msra.mxu2 %v1756_v14  ;;  %689 = vmatpush.msra.mxu0 %v1739_v16  ;;  %v650_v25 = vld [vmem:[%s2773_s6 + $0x48] sm:$0xff]  ;;  %v649_v29 = vld [vmem:[%s2773_s6 + $0x40] sm:$0xff]  ;;  %v648_v33 = vld [vmem:[%s2773_s6 + $0x38] sm:$0xff]  ;;  %s2355_s14 = scalar_lea.vmem %s2792_s0, %s2779_s16  ;;  %s2374_s23 = sadd.s32 %s1897_s13, %s2258_s10 }
  0x19   : > { %804 = vmatpush.msra.mxu3 %v1772_v15  ;;  %712 = vmatpush.msra.mxu1 %v652_v17  ;;  %v1753_v26 = vld [vmem:[%s2773_s6 + $0x148] sm:$0xff]  ;;  %v1752_v30 = vld [vmem:[%s2773_s6 + $0x140] sm:$0xff]  ;;  %v1751_v34 = vld [vmem:[%s2773_s6 + $0x138] sm:$0xff]  ;;  %s2780_s12 = sshll.u32 %s2374_s23, 3  ;;  %s2795_s16 = sadd.s32 2, %s1963_s17 }
  0x1a   : > { %760 = vmatpush.msra.mxu2 %v1755_v18  ;;  %690 = vmatpush.msra.mxu0 %v1738_v20  ;;  %v1769_v27 = vld [vmem:[%s2773_s6 + $0x1c8] sm:$0xff]  ;;  %v1768_v31 = vld [vmem:[%s2773_s6 + $0x1c0] sm:$0xff]  ;;  %v1767_v35 = vld [vmem:[%s2773_s6 + $0x1b8] sm:$0xff]  ;;  %s2816_s16 = smov (!%p2385_p8, %s2795_s16), 17  ;;  %s2433_s26 = scalar_lea.vmem %s2768_s1, %s2780_s12 }
  0x1b   : > { %805 = vmatpush.msra.mxu3 %v1771_v19  ;;  %713 = vmatpush.msra.mxu1 %v651_v21  ;;  %v1734_v36 = vld [vmem:[%s2773_s6 + $0xb0] sm:$0xff]  ;;  %v1733_v40 = vld [vmem:[%s2773_s6 + $0xa8] sm:$0xff]  ;;  %v1732_v44 = vld [vmem:[%s2773_s6 + $0xa0] sm:$0xff]  ;;  %s1898_s0 = smul.u32 3, %s2816_s16 }
  0x1c   : > { %761 = vmatpush.msra.mxu2 %v1754_v22  ;;  %691 = vmatpush.msra.mxu0 %v1737_v24  ;;  %v647_v37 = vld [vmem:[%s2773_s6 + $0x30] sm:$0xff]  ;;  %v646_v41 = vld [vmem:[%s2773_s6 + $0x28] sm:$0xff]  ;;  %v645_v45 = vld [vmem:[%s2773_s6 + $0x20] sm:$0xff] }
  0x1d   : > { %806 = vmatpush.msra.mxu3 %v1770_v23  ;;  %714 = vmatpush.msra.mxu1 %v650_v25  ;;  %v1750_v38 = vld [vmem:[%s2773_s6 + $0x130] sm:$0xff]  ;;  %v1749_v42 = vld [vmem:[%s2773_s6 + $0x128] sm:$0xff]  ;;  %v1748_v46 = vld [vmem:[%s2773_s6 + $0x120] sm:$0xff] }
  0x1e   : > { %762 = vmatpush.msra.mxu2 %v1753_v26  ;;  %692 = vmatpush.msra.mxu0 %v1736_v28  ;;  %v1766_v39 = vld [vmem:[%s2773_s6 + $0x1b0] sm:$0xff]  ;;  %v1765_v43 = vld [vmem:[%s2773_s6 + $0x1a8] sm:$0xff]  ;;  %v1764_v47 = vld [vmem:[%s2773_s6 + $0x1a0] sm:$0xff] }
  0x1f   : > { %807 = vmatpush.msra.mxu3 %v1769_v27  ;;  %715 = vmatpush.msra.mxu1 %v649_v29  ;;  %v1731_v48 = vld [vmem:[%s2773_s6 + $0x98] sm:$0xff]  ;;  %v1730_v52 = vld [vmem:[%s2773_s6 + $0x90] sm:$0xff]  ;;  %v1729_v56 = vld [vmem:[%s2773_s6 + $0x88] sm:$0xff] }
  0x20   : > { %763 = vmatpush.msra.mxu2 %v1752_v30  ;;  %693 = vmatpush.msra.mxu0 %v1735_v32  ;;  %v644_v49 = vld [vmem:[%s2773_s6 + $0x18] sm:$0xff]  ;;  %v643_v53 = vld [vmem:[%s2773_s6 + $0x10] sm:$0xff]  ;;  %v642_v57 = vld [vmem:[%s2773_s6 + $0x8] sm:$0xff] }
  0x21   : > { %808 = vmatpush.msra.mxu3 %v1768_v31  ;;  %716 = vmatpush.msra.mxu1 %v648_v33  ;;  %v1747_v50 = vld [vmem:[%s2773_s6 + $0x118] sm:$0xff]  ;;  %v1746_v54 = vld [vmem:[%s2773_s6 + $0x110] sm:$0xff]  ;;  %v1745_v58 = vld [vmem:[%s2773_s6 + $0x108] sm:$0xff] }
  0x22   : > { %764 = vmatpush.msra.mxu2 %v1751_v34  ;;  %694 = vmatpush.msra.mxu0 %v1734_v36  ;;  %v1763_v51 = vld [vmem:[%s2773_s6 + $0x198] sm:$0xff]  ;;  %v1762_v55 = vld [vmem:[%s2773_s6 + $0x190] sm:$0xff]  ;;  %v1761_v59 = vld [vmem:[%s2773_s6 + $0x188] sm:$0xff] }
  0x23   : > { %809 = vmatpush.msra.mxu3 %v1767_v35  ;;  %717 = vmatpush.msra.mxu1 %v647_v37  ;;  %v1728_v60 = vld [vmem:[%s2773_s6 + $0x80] sm:$0xff]  ;;  %v1791_v0 = vld [vmem:[%s2773_s6 + $0x278] sm:$0xff]  ;;  %v1790_v4 = vld [vmem:[%s2773_s6 + $0x270] sm:$0xff] }
  0x24   : > { %765 = vmatpush.msra.mxu2 %v1750_v38  ;;  %695 = vmatpush.msra.mxu0 %v1733_v40  ;;  %v641_v61 = vld [vmem:[%s2773_s6] sm:$0xff]  ;;  %v1807_v1 = vld [vmem:[%s2773_s6 + $0x2f8] sm:$0xff]  ;;  %v1806_v5 = vld [vmem:[%s2773_s6 + $0x2f0] sm:$0xff] }
  0x25   : > { %810 = vmatpush.msra.mxu3 %v1766_v39  ;;  %718 = vmatpush.msra.mxu1 %v646_v41  ;;  %v1744_v62 = vld [vmem:[%s2773_s6 + $0x100] sm:$0xff]  ;;  %v1823_v2 = vld [vmem:[%s2773_s6 + $0x378] sm:$0xff]  ;;  %v1822_v6 = vld [vmem:[%s2773_s6 + $0x370] sm:$0xff] }
  0x26   : > { %766 = vmatpush.msra.mxu2 %v1749_v42  ;;  %696 = vmatpush.msra.mxu0 %v1732_v44  ;;  %v1760_v63 = vld [vmem:[%s2773_s6 + $0x180] sm:$0xff]  ;;  %v1839_v3 = vld [vmem:[%s2773_s6 + $0x3f8] sm:$0xff]  ;;  %v1838_v7 = vld [vmem:[%s2773_s6 + $0x3f0] sm:$0xff] }
  0x27   : > { %811 = vmatpush.msra.mxu3 %v1765_v43  ;;  %719 = vmatpush.msra.mxu1 %v645_v45  ;;  %v1789_v8 = vld [vmem:[%s2773_s6 + $0x268] sm:$0xff]  ;;  %v1788_v12 = vld [vmem:[%s2773_s6 + $0x260] sm:$0xff]  ;;  %v1787_v16 = vld [vmem:[%s2773_s6 + $0x258] sm:$0xff] }
  0x28   : > { %767 = vmatpush.msra.mxu2 %v1748_v46  ;;  %697 = vmatpush.msra.mxu0 %v1731_v48  ;;  %v1805_v9 = vld [vmem:[%s2773_s6 + $0x2e8] sm:$0xff]  ;;  %v1804_v13 = vld [vmem:[%s2773_s6 + $0x2e0] sm:$0xff]  ;;  %v1803_v17 = vld [vmem:[%s2773_s6 + $0x2d8] sm:$0xff] }
  0x29   : > { %812 = vmatpush.msra.mxu3 %v1764_v47  ;;  %720 = vmatpush.msra.mxu1 %v644_v49  ;;  %v1821_v10 = vld [vmem:[%s2773_s6 + $0x368] sm:$0xff]  ;;  %v1820_v14 = vld [vmem:[%s2773_s6 + $0x360] sm:$0xff]  ;;  %v1819_v18 = vld [vmem:[%s2773_s6 + $0x358] sm:$0xff] }
  0x2a   : > { %768 = vmatpush.msra.mxu2 %v1747_v50  ;;  %698 = vmatpush.msra.mxu0 %v1730_v52  ;;  %v1837_v11 = vld [vmem:[%s2773_s6 + $0x3e8] sm:$0xff]  ;;  %v1836_v15 = vld [vmem:[%s2773_s6 + $0x3e0] sm:$0xff]  ;;  %v1835_v19 = vld [vmem:[%s2773_s6 + $0x3d8] sm:$0xff] }
  0x2b   : > { %813 = vmatpush.msra.mxu3 %v1763_v51  ;;  %721 = vmatpush.msra.mxu1 %v643_v53  ;;  %v638_v20 = vld [vmem:[%s2355_s14] sm:$0xff]  ;;  %v2381_v21 = vld [vmem:[%s2355_s14 + $0x8] sm:$0xff]  ;;  %v1786_v22 = vld [vmem:[%s2773_s6 + $0x250] sm:$0xff] }
  0x2c   : > { %769 = vmatpush.msra.mxu2 %v1746_v54  ;;  %699 = vmatpush.msra.mxu0 %v1729_v56  ;;  %v1802_v23 = vld [vmem:[%s2773_s6 + $0x2d0] sm:$0xff]  ;;  %v1785_v26 = vld [vmem:[%s2773_s6 + $0x248] sm:$0xff]  ;;  %v678_v28 = vrot.slane %v638_v20, 1  ;;  %v679_v29 = vrot.slane %v2381_v21, 1  ;;  %v749_v32 = vrot.slane %v638_v20, 2  ;;  %v750_v33 = vrot.slane %v2381_v21, 2 }
  0x2d   : > { %814 = vmatpush.msra.mxu3 %v1762_v55  ;;  %722 = vmatpush.msra.mxu1 %v642_v57  ;;  %v1818_v24 = vld [vmem:[%s2773_s6 + $0x350] sm:$0xff]  ;;  %v1801_v27 = vld [vmem:[%s2773_s6 + $0x2c8] sm:$0xff]  ;;  %v1784_v34 = vld [vmem:[%s2773_s6 + $0x240] sm:$0xff] }
  0x2e   : > { %770 = vmatpush.msra.mxu2 %v1745_v58  ;;  %700 = vmatpush.msra.mxu0 %v1728_v60  ;;  %v1834_v25 = vld [vmem:[%s2773_s6 + $0x3d0] sm:$0xff]  ;;  %v1817_v30 = vld [vmem:[%s2773_s6 + $0x348] sm:$0xff]  ;;  %v1800_v35 = vld [vmem:[%s2773_s6 + $0x2c0] sm:$0xff]  ;;  %v680_v38 = vsel %vm677_vm0, %v678_v28, %v679_v29  ;;  %v751_v39 = vsel %vm748_vm1, %v749_v32, %v750_v33 }
  0x2f   : > { %815 = vmatpush.msra.mxu3 %v1761_v59  ;;  %723 = vmatpush.msra.mxu1 %v641_v61  ;;  %v1833_v31 = vld [vmem:[%s2773_s6 + $0x3c8] sm:$0xff]  ;;  %v1816_v36 = vld [vmem:[%s2773_s6 + $0x340] sm:$0xff]  ;;  %v1783_v41 = vld [vmem:[%s2773_s6 + $0x238] sm:$0xff] }
  0x30   : > { %771 = vmatpush.msra.mxu2 %v1744_v62  ;;  %853 = vmatpush.msrb.mxu0 %v1791_v0  ;;  %v1832_v37 = vld [vmem:[%s2773_s6 + $0x3c0] sm:$0xff]  ;;  %v1799_v42 = vld [vmem:[%s2773_s6 + $0x2b8] sm:$0xff]  ;;  %v640_v45 = vld [vmem:[%s2355_s14 + $0x10] sm:$0x3]  ;;  %s2478_s14 = sadd.s32 %s1898_s0, %s2258_s10  ;;  %s2796_s10 = sshll.u32 %s2298_s27, 3 }
  0x31   : > { %816 = vmatpush.msra.mxu3 %v1760_v63  ;;  %902 = vmatpush.msrb.mxu1 %v1807_v1  ;;  %v2448_v40 = vld [vmem:[%s2433_s26] sm:$0xff]  ;;  %v1815_v43 = vld [vmem:[%s2773_s6 + $0x338] sm:$0xff]  ;;  %v1782_v46 = vld [vmem:[%s2773_s6 + $0x230] sm:$0xff]  ;;  %v681_v52 = vrot.slane %v640_v45, 1  ;;  %v752_v55 = vrot.slane %v640_v45, 2  ;;  %s2781_s16 = sshll.u32 %s2478_s14, 3  ;;  %s2627_s12 = scalar_lea.vmem %s2770_s3, %s2796_s10 }
  0x32   : > { %947 = vmatpush.msrb.mxu2 %v1823_v2  ;;  %854 = vmatpush.msrb.mxu0 %v1790_v4  ;;  %v1831_v44 = vld [vmem:[%s2773_s6 + $0x3b8] sm:$0xff]  ;;  %v1798_v47 = vld [vmem:[%s2773_s6 + $0x2b0] sm:$0xff]  ;;  %v1781_v50 = vld [vmem:[%s2773_s6 + $0x228] sm:$0xff]  ;;  %s2519_s28 = scalar_lea.vmem %s2769_s2, %s2781_s16  ;;  %s2797_s10 = sshll.u32 %s2374_s23, 3 }
  0x33   : > { %999 = vmatpush.msrb.mxu3 %v1839_v3  ;;  %903 = vmatpush.msrb.mxu1 %v1806_v5  ;;  %v1814_v48 = vld [vmem:[%s2773_s6 + $0x330] sm:$0xff]  ;;  %v1797_v51 = vld [vmem:[%s2773_s6 + $0x2a8] sm:$0xff]  ;;  %v1780_v56 = vld [vmem:[%s2773_s6 + $0x220] sm:$0xff]  ;;  %v682_v60 = vsel %vm677_vm0, %v679_v29, %v681_v52  ;;  %v753_v61 = vsel %vm748_vm1, %v750_v33, %v752_v55  ;;  %s610_s13 = scalar_lea.vmem %s2771_s4, %s2797_s10  ;;  %s2798_s10 = sshll.u32 %s2478_s14, 3 }
  0x34   : > { %948 = vmatpush.msrb.mxu2 %v1822_v6  ;;  %855 = vmatpush.msrb.mxu0 %v1789_v8  ;;  %v1830_v49 = vld [vmem:[%s2773_s6 + $0x3b0] sm:$0xff]  ;;  %v1813_v53 = vld [vmem:[%s2773_s6 + $0x328] sm:$0xff]  ;;  %v1796_v57 = vld [vmem:[%s2773_s6 + $0x2a0] sm:$0xff]  ;;  %s621_s11 = scalar_lea.vmem %s2772_s5, %s2798_s10  ;;  %s1726_s27 = sshll.u32 %s2812_s18, 5 }
  0x35   : > { %1000 = vmatpush.msrb.mxu3 %v1838_v7  ;;  %904 = vmatpush.msrb.mxu1 %v1805_v9  ;;  %v1829_v54 = vld [vmem:[%s2773_s6 + $0x3a8] sm:$0xff]  ;;  %v1812_v58 = vld [vmem:[%s2773_s6 + $0x320] sm:$0xff]  ;;  %v1779_v63 = vld [vmem:[%s2773_s6 + $0x218] sm:$0xff]  ;;  %v846_v9 = vrot.slane %v2448_v40, 1  ;;  %s626_s14 = scalar_select %p625_p9, %s1963_s17, 15 }
  0x36   : > { %949 = vmatpush.msrb.mxu2 %v1821_v10  ;;  %856 = vmatpush.msrb.mxu0 %v1788_v12  ;;  %v1828_v59 = vld [vmem:[%s2773_s6 + $0x3a0] sm:$0xff]  ;;  %v2512_v62 = vld [vmem:[%s2433_s26 + $0x8] sm:$0xff]  ;;  %v1795_v0 = vld [vmem:[%s2773_s6 + $0x298] sm:$0xff]  ;;  %v895_v10 = vrot.slane %v2448_v40, 2 }
  0x37   : > { %1001 = vmatpush.msrb.mxu3 %v1837_v11  ;;  %905 = vmatpush.msrb.mxu1 %v1804_v13  ;;  %v1811_v1 = vld [vmem:[%s2773_s6 + $0x318] sm:$0xff]  ;;  %v1778_v3 = vld [vmem:[%s2773_s6 + $0x210] sm:$0xff]  ;;  %v2542_v5 = vld [vmem:[%s2519_s28] sm:$0xff]  ;;  %v847_v11 = vrot.slane %v2512_v62, 1  ;;  %v896_v12 = vrot.slane %v2512_v62, 2 }
  0x38   : > { %950 = vmatpush.msrb.mxu2 %v1820_v14  ;;  %857 = vmatpush.msrb.mxu0 %v1787_v16  ;;  %v1827_v2 = vld [vmem:[%s2773_s6 + $0x398] sm:$0xff]  ;;  %v1794_v4 = vld [vmem:[%s2773_s6 + $0x290] sm:$0xff]  ;;  %v2545_v6 = vld [vmem:[%s2519_s28 + $0x8] sm:$0xff] }
  0x39   : > { %1002 = vmatpush.msrb.mxu3 %v1836_v15  ;;  %906 = vmatpush.msrb.mxu1 %v1803_v17  ;;  %v1810_v7 = vld [vmem:[%s2773_s6 + $0x310] sm:$0xff]  ;;  %v1777_v13 = vld [vmem:[%s2773_s6 + $0x208] sm:$0xff]  ;;  %v992_v17 = vrot.slane %v2542_v5, 1  ;;  %v1859_v28 = vld [vmem:[%s2774_s7 + $0x4] sm:$0xf] }
  0x3a   : > { %951 = vmatpush.msrb.mxu2 %v1819_v18  ;;  %858 = vmatpush.msrb.mxu0 %v1786_v22  ;;  %v1826_v8 = vld [vmem:[%s2773_s6 + $0x390] sm:$0xff]  ;;  %v1793_v14 = vld [vmem:[%s2773_s6 + $0x288] sm:$0xff]  ;;  %v993_v18 = vrot.slane %v2545_v6, 1  ;;  %v1824_v22 = vld [vmem:[%s2773_s6 + $0x380] sm:$0xff] }
  0x3b   : > { %1003 = vmatpush.msrb.mxu3 %v1835_v19  ;;  %907 = vmatpush.msrb.mxu1 %v1802_v23  ;;  %v1809_v15 = vld [vmem:[%s2773_s6 + $0x308] sm:$0xff]  ;;  %v1776_v19 = vld [vmem:[%s2773_s6 + $0x200] sm:$0xff]  ;;  %v848_v23 = vsel %vm677_vm0, %v846_v9, %v847_v11  ;;  %v1854_v32 = vld [vmem:[%s2773_s6 + $0x470] sm:$0xff] }
  0x3c   : > { %952 = vmatpush.msrb.mxu2 %v1818_v24  ;;  %859 = vmatpush.msrb.mxu0 %v1785_v26  ;;  %v1825_v16 = vld [vmem:[%s2773_s6 + $0x388] sm:$0xff]  ;;  %v897_v24 = vsel %vm748_vm1, %v895_v10, %v896_v12  ;;  %v783_v26 = vld [vmem:[%s2433_s26 + $0x10] sm:$0x3]  ;;  %v1076_v29 = vld [vmem:[%s2774_s7] sm:$0xf]  ;;  %v1041_v10 = vrot.slane %v2542_v5, 2 }
  0x3d   : > { %1004 = vmatpush.msrb.mxu3 %v1834_v25  ;;  %908 = vmatpush.msrb.mxu1 %v1801_v27  ;;  %v994_v25 = vsel %vm677_vm0, %v992_v17, %v993_v18  ;;  %v1855_v27 = vld [vmem:[%s2773_s6 + $0x478] sm:$0xff]  ;;  %v898_v33 = vrot.slane %v783_v26, 2  ;;  %v1073_v45 = vld [vmem:[%s2627_s12] sm:$0xff]  ;;  %v1842_v9 = vld [vmem:[%s2773_s6 + $0x410] sm:$0xff] }
  0x3e   : > { %953 = vmatpush.msrb.mxu2 %v1817_v30  ;;  %860 = vmatpush.msrb.mxu0 %v1784_v34  ;;  %v1863_v30 = vld [vmem:[%s2774_s7 + $0x8] sm:$0xf]  ;;  %v1871_v34 = vld [vmem:[%s2774_s7 + $0x10] sm:$0xf]  ;;  %v1883_v55 = vld [vmem:[%s2774_s7 + $0x1c] sm:$0xf] }
  0x3f   : > { %1005 = vmatpush.msrb.mxu3 %v1833_v31  ;;  %909 = vmatpush.msrb.mxu1 %v1800_v35  ;;  %v2600_v31 = vld [vmem:[%s2519_s28 + $0x10] sm:$0x3]  ;;  %v849_v35 = vrot.slane %v783_v26, 1  ;;  %v1840_v17 = vld [vmem:[%s2773_s6 + $0x400] sm:$0xff]  ;;  %v1311_v26 = vld [vmem:[%s621_s11 + $0x8] sm:$0xff] }
  0x40   : > { %954 = vmatpush.msrb.mxu2 %v1816_v36  ;;  %701 = vmatmul.f32.vlgmr.msra.gmra.mxu0 %v680_v38  ;;  %v1867_v36 = vld [vmem:[%s2774_s7 + $0xc] sm:$0xf] }
  0x41   : > { %1006 = vmatpush.msrb.mxu3 %v1832_v37  ;;  %724 = vmatmul.f32.vlgmr.msra.gmra.mxu1 %v638_v20  ;;  %v1792_v20 = vld [vmem:[%s2773_s6 + $0x280] sm:$0xff]  ;;  %v1875_v37 = vld [vmem:[%s2774_s7 + $0x14] sm:$0xf]  ;;  %v1853_v38 = vld [vmem:[%s2773_s6 + $0x468] sm:$0xff] }
  0x42   : > { %772 = vmatmul.f32.vlgmr.msra.gmra.mxu2 %v751_v39  ;;  %817 = vmatmul.f32.vlgmr.msra.gmra.mxu3 %v2448_v40  ;;  %v995_v39 = vrot.slane %v2600_v31, 1  ;;  %v1852_v40 = vld [vmem:[%s2773_s6 + $0x460] sm:$0xff] }
  0x43   : > { %861 = vmatpush.msrb.mxu0 %v1783_v41  ;;  %910 = vmatpush.msrb.mxu1 %v1799_v42  ;;  %v899_v41 = vsel %vm748_vm1, %v896_v12, %v898_v33  ;;  %v850_v42 = vsel %vm677_vm0, %v847_v11, %v849_v35  ;;  %v1042_v11 = vrot.slane %v2545_v6, 2 }
  0x44   : > { %955 = vmatpush.msrb.mxu2 %v1815_v43  ;;  %1007 = vmatpush.msrb.mxu3 %v1831_v44  ;;  %v996_v43 = vsel %vm677_vm0, %v993_v18, %v995_v39  ;;  %v1851_v44 = vld [vmem:[%s2773_s6 + $0x458] sm:$0xff] }
  0x45   : > { %862 = vmatpush.msrb.mxu0 %v1782_v46  ;;  %911 = vmatpush.msrb.mxu1 %v1798_v47  ;;  %v1074_v46 = vld [vmem:[%s2627_s12 + $0x8] sm:$0xff]  ;;  %v1850_v47 = vld [vmem:[%s2773_s6 + $0x450] sm:$0xff] }
  0x46   : > { %956 = vmatpush.msrb.mxu2 %v1814_v48  ;;  %1008 = vmatpush.msrb.mxu3 %v1830_v49  ;;  %v1116_v48 = vrot.slane %v1073_v45, 1  ;;  %v1117_v49 = vrot.slane %v1074_v46, 1  ;;  %v1156_v52 = vrot.slane %v1074_v46, 2 }
  0x47   : > { %863 = vmatpush.msrb.mxu0 %v1781_v50  ;;  %912 = vmatpush.msrb.mxu1 %v1797_v51  ;;  %v1849_v50 = vld [vmem:[%s2773_s6 + $0x448] sm:$0xff]  ;;  %v1155_v51 = vrot.slane %v1073_v45, 2 }
  0x48   : > { %957 = vmatpush.msrb.mxu2 %v1813_v53  ;;  %1009 = vmatpush.msrb.mxu3 %v1829_v54  ;;  %v1848_v53 = vld [vmem:[%s2773_s6 + $0x440] sm:$0xff]  ;;  %v1118_v54 = vsel %vm677_vm0, %v1116_v48, %v1117_v49 }
  0x49   : > { %864 = vmatpush.msrb.mxu0 %v1780_v56  ;;  %913 = vmatpush.msrb.mxu1 %v1796_v57  ;;  %v1847_v56 = vld [vmem:[%s2773_s6 + $0x438] sm:$0xff]  ;;  %v1157_v57 = vsel %vm748_vm1, %v1155_v51, %v1156_v52 }
  0x4a   : > { %958 = vmatpush.msrb.mxu2 %v1812_v58  ;;  %1010 = vmatpush.msrb.mxu3 %v1828_v59  ;;  %v1075_v58 = vld [vmem:[%s2627_s12 + $0x10] sm:$0x3]  ;;  %v1887_v59 = vld [vmem:[%s2774_s7 + $0x20] sm:$0xf] }
  0x4b   : > { %704 = vmatmul.f32.gmra.mxu0 %v682_v60  ;;  %727 = vmatmul.f32.gmra.mxu1 %v2381_v21  ;;  %v1808_v21 = vld [vmem:[%s2773_s6 + $0x300] sm:$0xff]  ;;  %v1879_v60 = vld [vmem:[%s2774_s7 + $0x18] sm:$0xf] }
  0x4c   : > { %775 = vmatmul.f32.gmra.mxu2 %v753_v61  ;;  %820 = vmatmul.f32.gmra.mxu3 %v2512_v62  ;;  %v1846_v61 = vld [vmem:[%s2773_s6 + $0x430] sm:$0xff]  ;;  %v1119_v62 = vrot.slane %v1075_v58, 1 }
  0x4d   : > { %865 = vmatpush.msrb.mxu0 %v1779_v63  ;;  %914 = vmatpush.msrb.mxu1 %v1795_v0  ;;  %v1845_v63 = vld [vmem:[%s2773_s6 + $0x428] sm:$0xff]  ;;  %v1158_v0 = vrot.slane %v1075_v58, 2 }
  0x4e   : > { %959 = vmatpush.msrb.mxu2 %v1811_v1  ;;  %1011 = vmatpush.msrb.mxu3 %v1827_v2  ;;  %v1844_v1 = vld [vmem:[%s2773_s6 + $0x420] sm:$0xff]  ;;  %v1120_v2 = vsel %vm677_vm0, %v1117_v49, %v1119_v62 }
  0x4f   : > { %866 = vmatpush.msrb.mxu0 %v1778_v3  ;;  %915 = vmatpush.msrb.mxu1 %v1794_v4  ;;  %v1193_v3 = vld [vmem:[%s610_s13 + $0x8] sm:$0xff]  ;;  %v1843_v4 = vld [vmem:[%s2773_s6 + $0x418] sm:$0xff] }
  0x50   : > { %960 = vmatpush.msrb.mxu2 %v1810_v7  ;;  %1012 = vmatpush.msrb.mxu3 %v1826_v8  ;;  %v1159_v7 = vsel %vm748_vm1, %v1156_v52, %v1158_v0  ;;  %v1192_v8 = vld [vmem:[%s610_s13] sm:$0xff] }
  0x51   : > { %867 = vmatpush.msrb.mxu0 %v1777_v13  ;;  %916 = vmatpush.msrb.mxu1 %v1793_v14  ;;  %v1234_v12 = vrot.slane %v1192_v8, 1  ;;  %v1235_v13 = vrot.slane %v1193_v3, 1  ;;  %v1841_v14 = vld [vmem:[%s2773_s6 + $0x408] sm:$0xff] }
  0x52   : > { %961 = vmatpush.msrb.mxu2 %v1809_v15  ;;  %1013 = vmatpush.msrb.mxu3 %v1825_v16  ;;  %v1273_v15 = vrot.slane %v1192_v8, 2  ;;  %v1274_v16 = vrot.slane %v1193_v3, 2 }
  0x53   : > { %868 = vmatpush.msrb.mxu0 %v1776_v19  ;;  %917 = vmatpush.msrb.mxu1 %v1792_v20  ;;  %v1236_v18 = vsel %vm677_vm0, %v1234_v12, %v1235_v13  ;;  %v1194_v19 = vld [vmem:[%s610_s13 + $0x10] sm:$0x3]  ;;  %v1044_v20 = vrot.slane %v2600_v31, 2  ;;  %v1392_v31 = vrot.slane %v1311_v26, 2  ;;  %s1725_s13 = sshll.u32 %s626_s14, 1 }
  0x54   : > { %962 = vmatpush.msrb.mxu2 %v1808_v21  ;;  %1014 = vmatpush.msrb.mxu3 %v1824_v22  ;;  %v1237_v21 = vrot.slane %v1194_v19, 1  ;;  %v1276_v22 = vrot.slane %v1194_v19, 2  ;;  %s629_s22 = sadd.s32 %s1726_s27, %s1725_s13 }
  0x55   : > { %869 = vmatmul.f32.vlgmr.msrb.gmra.mxu0 %v848_v23  ;;  %918 = vmatmul.f32.vlgmr.msrb.gmra.mxu1 %v897_v24  ;;  %v1045_v23 = vsel %vm748_vm1, %v1042_v11, %v1044_v20  ;;  %s1727_s28 = sshll.u32 %s629_s22, 3 }
  0x56   : > { %963 = vmatmul.f32.vlgmr.msrb.gmra.mxu2 %v2542_v5  ;;  %1015 = vmatmul.f32.vlgmr.msrb.gmra.mxu3 %v994_v25  ;;  %v1043_v5 = vsel %vm748_vm1, %v1041_v10, %v1042_v11  ;;  %v1238_v24 = vsel %vm677_vm0, %v1235_v13, %v1237_v21  ;;  %v1310_v25 = vld [vmem:[%s621_s11] sm:$0xff]  ;;  %s631_s18 = scalar_lea.vmem %s2776_s9, %s1727_s28 }
  0x57   : > { %1048 = vmatpush.msra.mxu0 %v1855_v27  ;;  %1860 = vmatpush.msk.msra.mxu2 %vm1084_vm2, %v1859_v28  ;;  %v1277_v27 = vsel %vm748_vm1, %v1274_v16, %v1276_v22  ;;  %v1352_v28 = vrot.slane %v1310_v25, 1 }
  0x58   : > { %1856 = vmatpush.msk.msra.mxu1 %vm1084_vm2, %v1076_v29  ;;  %1864 = vmatpush.msk.msra.mxu3 %vm1084_vm2, %v1863_v30  ;;  %v1353_v29 = vrot.slane %v1311_v26, 1  ;;  %v1391_v30 = vrot.slane %v1310_v25, 2 }
  0x59   : > { %1049 = vmatpush.msra.mxu0 %v1854_v32  ;;  %1872 = vmatpush.msk.msrb.mxu2 %vm1084_vm2, %v1871_v34  ;;  %v1312_v34 = vld [vmem:[%s621_s11 + $0x10] sm:$0x3] }
  0x5a   : > { %1868 = vmatpush.msk.msrb.mxu1 %vm1084_vm2, %v1867_v36  ;;  %1876 = vmatpush.msk.msrb.mxu3 %vm1084_vm2, %v1875_v37  ;;  %v1354_v32 = vsel %vm677_vm0, %v1352_v28, %v1353_v29  ;;  %v1393_v33 = vsel %vm748_vm1, %v1391_v30, %v1392_v31  ;;  %v1355_v35 = vrot.slane %v1312_v34, 1  ;;  %v1394_v36 = vrot.slane %v1312_v34, 2 }
  0x5b   : > { %1050 = vmatpush.msra.mxu0 %v1853_v38 }
  0x5c   : > { %v1356_v37 = vsel %vm677_vm0, %v1353_v29, %v1355_v35  ;;  %v1395_v38 = vsel %vm748_vm1, %v1392_v31, %v1394_v36 }
  0x5d   : > { %1051 = vmatpush.msra.mxu0 %v1852_v40  ;;  %921 = vmatmul.f32.gmra.mxu1 %v899_v41 }
  0x5e   : > { %872 = vmatmul.f32.gmra.mxu0 %v850_v42  ;;  %966 = vmatmul.f32.gmra.mxu2 %v2545_v6  ;;  %v1275_v6 = vsel %vm748_vm1, %v1273_v15, %v1274_v16 }
  0x5f   : > { %1018 = vmatmul.f32.gmra.mxu3 %v996_v43  ;;  %1052 = vmatpush.msra.mxu0 %v1851_v44 }
  0x61   : > { %1053 = vmatpush.msra.mxu0 %v1850_v47 }
  0x63   : > { %1054 = vmatpush.msra.mxu0 %v1849_v50 }
  0x65   : > { %1055 = vmatpush.msra.mxu0 %v1848_v53  ;;  %1857 = vmatmul.msk.f32.vlgmr.msra.gmra.mxu1 %vm1077_vm3, %v1073_v45 }
  0x66   : > { %1861 = vmatmul.msk.f32.vlgmr.msra.gmra.mxu2 %vm1077_vm3, %v1118_v54  ;;  %1884 = vmatpush.msk.msra.mxu1 %vm1084_vm2, %v1883_v55 }
  0x67   : > { %1056 = vmatpush.msra.mxu0 %v1847_v56  ;;  %1865 = vmatmul.msk.f32.vlgmr.msra.gmra.mxu3 %vm1077_vm3, %v1157_v57 }
  0x68   : > { %1888 = vmatpush.msk.msra.mxu2 %vm1084_vm2, %v1887_v59  ;;  %1894 = vmatpush.msk.msra.mxu3 %vm1084_vm2, %v1879_v60 }
  0x69   : > { %1057 = vmatpush.msra.mxu0 %v1846_v61 }
  0x6b   : > { %1058 = vmatpush.msra.mxu0 %v1845_v63 }
  0x6d   : > { %1059 = vmatpush.msra.mxu0 %v1844_v1  ;;  %1858 = vmatmul.msk.f32.gmra.mxu1 %vm1077_vm3, %v1074_v46 }
  0x6e   : > { %1862 = vmatmul.msk.f32.gmra.mxu2 %vm1077_vm3, %v1120_v2 }
  0x6f   : > { %1060 = vmatpush.msra.mxu0 %v1843_v4  ;;  %1866 = vmatmul.msk.f32.gmra.mxu3 %vm1077_vm3, %v1159_v7 }
  0x71   : > { %1061 = vmatpush.msra.mxu0 %v1842_v9 }
  0x73   : > { %1062 = vmatpush.msra.mxu0 %v1841_v14 }
  0x75   : > { %1063 = vmatpush.msra.mxu0 %v1840_v17  ;;  %1869 = vmatmul.msk.f32.vlgmr.msrb.gmra.mxu1 %vm1077_vm3, %v1192_v8 }
  0x76   : > { %1064 = vmatmul.f32.vlgmr.msra.gmra.mxu0 %v1043_v5  ;;  %1873 = vmatmul.msk.f32.vlgmr.msrb.gmra.mxu2 %vm1077_vm3, %v1236_v18 }
  0x77   : > { %1877 = vmatmul.msk.f32.vlgmr.msrb.gmra.mxu3 %vm1077_vm3, %v1275_v6  ;;  %1880 = vmatpush.msk.msrb.mxu0 %vm1084_vm2, %v1879_v60 }
  0x7d   : > { %1870 = vmatmul.msk.f32.gmra.mxu1 %vm1077_vm3, %v1193_v3 }
  0x7e   : > { %1067 = vmatmul.f32.gmra.mxu0 %v1045_v23  ;;  %1874 = vmatmul.msk.f32.gmra.mxu2 %vm1077_vm3, %v1238_v24 }
  0x7f   : > { %1878 = vmatmul.msk.f32.gmra.mxu3 %vm1077_vm3, %v1277_v27 }
  0x85   : > { %1885 = vmatmul.msk.f32.vlgmr.msra.gmra.mxu1 %vm1077_vm3, %v1354_v32 }
  0x86   : > { %1881 = vmatmul.msk.f32.vlgmr.msrb.gmra.mxu0 %vm1077_vm3, %v1310_v25  ;;  %1889 = vmatmul.msk.f32.vlgmr.msra.gmra.mxu2 %vm1077_vm3, %v1393_v33 }
  0x87   : > { %1882 = vmatmul.msk.f32.vlgmr.msra.gmra.mxu3 %vm1077_vm3, %v1311_v26 }
  0x8d   : > { %1886 = vmatmul.msk.f32.gmra.mxu1 %vm1077_vm3, %v1356_v37  ;;  %v1940_v37 = vld [vmem:[%s2775_s8] ss:$0 sm:$0xff] }
  0x8e   : > { %1890 = vmatmul.msk.f32.gmra.mxu2 %vm1077_vm3, %v1395_v38 }
  0xbd   : > { %v702_v43 = vpop.f32.mrf.mxu0 }
  0xbe   : > { %v725_v39 = vpop.f32.mrf.mxu1 }
  0xbf   : > { %v726_v51 = vadd.f32 %v725_v39, %v702_v43 }
  0xc5   : > { %v773_v40 = vpop.f32.mrf.mxu2  ;;  %v818_v41 = vpop.f32.mrf.mxu3 }
  0xc6   : > { %v779_v54 = vadd.f32 %v773_v40, %v726_v51 }
  0xc8   : > { %v728_v42 = vpop.f32.mrf.mxu1  ;;  %v705_v47 = vpop.f32.mrf.mxu0  ;;  %v824_v57 = vadd.f32 %v818_v41, %v779_v54 }
  0xc9   : > { %v729_v58 = vadd.f32 %v728_v42, %v705_v47 }
  0xcf   : > { %v776_v44 = vpop.f32.mrf.mxu2  ;;  %v821_v45 = vpop.f32.mrf.mxu3 }
  0xd0   : > { %v780_v61 = vadd.f32 %v776_v44, %v729_v58 }
  0xd2   : > { %v919_v46 = vpop.f32.mrf.mxu1  ;;  %v870_v52 = vpop.f32.mrf.mxu0  ;;  %v825_v2 = vadd.f32 %v821_v45, %v780_v61 }
  0xd3   : > { %v876_v59 = vadd.f32 %v870_v52, %v824_v57 }
  0xd5   : > { %v925_v1 = vadd.f32 %v919_v46, %v876_v59 }
  0xd9   : > { %v964_v48 = vpop.f32.mrf.mxu2  ;;  %v1016_v49 = vpop.f32.mrf.mxu3 }
  0xda   : > { %v922_v50 = vpop.f32.mrf.mxu1  ;;  %v970_v3 = vadd.f32 %v964_v48, %v925_v1 }
  0xdb   : > { %v873_v0 = vpop.f32.mrf.mxu0 }
  0xdc   : > { %v877_v4 = vadd.f32 %v873_v0, %v825_v2  ;;  %v1022_v8 = vadd.f32 %v1016_v49, %v970_v3 }
  0xde   : > { %v926_v12 = vadd.f32 %v922_v50, %v877_v4 }
  0xe1   : > { %v967_v53 = vpop.f32.mrf.mxu2 }
  0xe2   : > { %v1019_v55 = vpop.f32.mrf.mxu3  ;;  %v1105_v56 = vpop.f32.mrf.mxu1  ;;  %v971_v14 = vadd.f32 %v967_v53, %v926_v12 }
  0xe4   : > { %v1023_v5 = vadd.f32 %v1019_v55, %v971_v14 }
  0xe9   : > { %v1145_v60 = vpop.f32.mrf.mxu2 }
  0xea   : > { %v1184_v62 = vpop.f32.mrf.mxu3  ;;  %v1108_v63 = vpop.f32.mrf.mxu1 }
  0xf1   : > { %v1148_v7 = vpop.f32.mrf.mxu2 }
  0xf2   : > { %v1187_v9 = vpop.f32.mrf.mxu3  ;;  %v1223_v10 = vpop.f32.mrf.mxu1 }
  0xf3   : > { %v1065_v11 = vpop.f32.mrf.mxu0 }
  0xf4   : > { %v1071_v13 = vadd.f32 %v1065_v11, %v1022_v8 }
  0xf6   : > { %v1111_v15 = vadd.f32 %v1105_v56, %v1071_v13 }
  0xf8   : > { %v1151_v16 = vadd.f32 %v1145_v60, %v1111_v15 }
  0xf9   : > { %v1263_v17 = vpop.f32.mrf.mxu2 }
  0xfa   : > { %v1190_v18 = vadd.f32 %v1184_v62, %v1151_v16  ;;  %v1302_v6 = vpop.f32.mrf.mxu3  ;;  %v1226_v19 = vpop.f32.mrf.mxu1 }
  0xfb   : > { %v1068_v20 = vpop.f32.mrf.mxu0 }
  0xfc   : > { %v1229_v21 = vadd.f32 %v1223_v10, %v1190_v18  ;;  %v1072_v22 = vadd.f32 %v1068_v20, %v1023_v5 }
  0xfe   : > { %v1269_v23 = vadd.f32 %v1263_v17, %v1229_v21  ;;  %v1112_v24 = vadd.f32 %v1108_v63, %v1072_v22 }
 0x100   : > { %v1152_v25 = vadd.f32 %v1148_v7, %v1112_v24  ;;  %v1308_v27 = vadd.f32 %v1302_v6, %v1269_v23 }
 0x101   : > { %v1266_v26 = vpop.f32.mrf.mxu2 }
 0x102   : > { %v1191_v28 = vadd.f32 %v1187_v9, %v1152_v25  ;;  %v1305_v29 = vpop.f32.mrf.mxu3  ;;  %v1381_v31 = vpop.f32.mrf.mxu1 }
 0x103   : > { %v1341_v30 = vpop.f32.mrf.mxu0 }
 0x104   : > { %v1230_v32 = vadd.f32 %v1226_v19, %v1191_v28  ;;  %v1347_v33 = vadd.f32 %v1341_v30, %v1308_v27 }
 0x106   : > { %v1270_v34 = vadd.f32 %v1266_v26, %v1230_v32  ;;  %v1387_v36 = vadd.f32 %v1381_v31, %v1347_v33 }
 0x108   : > { %v1309_v35 = vadd.f32 %v1305_v29, %v1270_v34 }
 0x109   : > { %v1420_v38 = vpop.f32.mrf.mxu2 }
 0x10a   : > { %v1344_v39 = vpop.f32.mrf.mxu3  ;;  %v1426_v40 = vadd.f32 %v1420_v38, %v1387_v36  ;;  %v1384_v43 = vpop.f32.mrf.mxu1 }
 0x10b   : > { %v1348_v41 = vadd.f32 %v1344_v39, %v1309_v35 }
 0x10c   : > { %v1432_v42 = vadd.f32 %v1940_v37, %v1426_v40 }
 0x10d   : > { %v1388_v44 = vadd.f32 %v1384_v43, %v1348_v41 }
 0x10e   : > { %1434 = vst [vmem:[%s631_s18] sm:$0xff] %v1432_v42 }
 0x111   : > { %v1423_v45 = vpop.f32.mrf.mxu2 }
 0x112   : > { %v1427_v46 = vadd.f32 %v1423_v45, %v1388_v44  ;;  %1439 = sbr.rel (%p1891_p10) target bundleno = 282 (0x11a), region = 60 }
 0x114   : > { %v1433_v47 = vadd.f32 %v1940_v37, %v1427_v46 }
 0x116   : > { %1435 = vst [vmem:[%s631_s18 + $0x8] sm:$0xff] %v1433_v47 }
 0x117   : > { %v1981_v48 = vmov 0.0  }
 0x118   : > { %1440 = vst [vmem:[%s2122_s30] sm:$0x1] %v1981_v48 }
 0x119   : > { %1441 = vst [vmem:[%s2134_s25] sm:$0x1] %v1981_v48 }
 0x11a PF: > { %v1443_v49 = vadd.f32 %v1433_v47, %v1432_v42  ;;  %v1453_v50 = vmul.f32 %v1432_v42, %v1432_v42  ;;  %v1454_v51 = vmul.f32 %v1433_v47, %v1433_v47 }
 0x11c   : > { %v1444_v52 = vrot.slane %v1443_v49, 4  ;;  %v1455_v53 = vadd.f32 %v1454_v51, %v1453_v50 }
 0x11e   : > { %v1445_v54 = vadd.f32 %v1444_v52, %v1443_v49  ;;  %v1456_v55 = vrot.slane %v1455_v53, 4 }
 0x11f   : > { %v1442_v62 = vld [vmem:[%s2122_s30] sm:$0x1] }
 0x120   : > { %v1446_v56 = vrot.slane %v1445_v54, 2  ;;  %v1457_v57 = vadd.f32 %v1456_v55, %v1455_v53  ;;  %v1452_v1 = vld [vmem:[%s2134_s25] sm:$0x1] }
 0x122   : > { %v1447_v58 = vadd.f32 %v1446_v56, %v1445_v54  ;;  %v1458_v59 = vrot.slane %v1457_v57, 2 }
 0x124   : > { %v1448_v60 = vrot.slane %v1447_v58, 1  ;;  %v1459_v61 = vadd.f32 %v1458_v59, %v1457_v57 }
 0x126   : > { %v1449_v63 = vadd.f32 %v1448_v60, %v1447_v58  ;;  %v1460_v0 = vrot.slane %v1459_v61, 1 }
 0x128   : > { %v1450_v2 = vadd.f32 %v1449_v63, %v1442_v62  ;;  %v1461_v3 = vadd.f32 %v1460_v0, %v1459_v61 }
 0x12a   : > { %1451 = vst [vmem:[%s2122_s30] sm:$0x1] %v1450_v2  ;;  %v1462_v4 = vadd.f32 %v1461_v3, %v1452_v1 }
 0x12c   : > { %1463 = vst [vmem:[%s2134_s25] sm:$0x1] %v1462_v4 }
 0x12d PF: > { %s22_s21 = sadd.s32 1, %s1979_s21   ;;  %s2799_s12 = sld [smem:[#allocation2_spill]] }
 0x12e   : > { %p19_p11 = scmp.ge.s32.totalorder %s22_s21, 34   ;;  %s2800_s29 = sld [smem:[#allocation3_spill]] }
 0x12f   : > { %s2801_s17 = smov %s1971_s19  ;;  %s2802_s18 = smov %s1975_s20 }
 0x130   :  { %21 = sbr.rel (!%p19_p11) target bundleno = 4 (0x4), region = 145 }
 0x133   : > { %s2803_s19 = smov %s2799_s12 }
 0x134   : > { %s2804_s20 = smov %s2800_s29 }

// kernel: unet_decoder_forward.8
= control target key start
LH: loop header
LB: loop body
LE: loop exit
PB: predicated region body
PF: predicated region fallthrough
CT: control target
= control target key end

     0   :  { %s1357_s24 = smov 0   ;;  %s1359_s25 = smov 0   ;;  %s1984_s0 = inlined_call_operand.vmem [shape: f32[2,18,18,128], index: 0, kind: input, shape index: {}, may-alias: {0,1,2}]   ;;  %s1985_s1 = inlined_call_operand.vmem [shape: f32[2,18,18,128], index: 1, kind: input, shape index: {}, may-alias: {0,1,2}]   ;;  %s1986_s2 = inlined_call_operand.vmem [shape: f32[2,18,18,128], index: 2, kind: input, shape index: {}, may-alias: {0,1,2}]   ;;  %s1987_s3 = inlined_call_operand.vmem [shape: f32[3,3,128,128], index: 3, kind: input, shape index: {}]   ;;  %s1988_s4 = inlined_call_operand.vmem [shape: f32[1,128], index: 4, kind: input, shape index: {}]   ;;  %s1989_s5 = inlined_call_operand.vmem [shape: f32[2,16,16,128], index: 5, kind: output, shape index: {0}]   ;;  %s1990_s6 = inlined_call_operand.vmem [shape: f32[2,1,128], index: 6, kind: output, shape index: {1}]   ;;  %s1991_s7 = inlined_call_operand.vmem [shape: f32[2,1,128], index: 7, kind: output, shape index: {2}]  }
   0x1   :  { %s1361_s26 = smov 0   ;;  %s1363_s27 = smov 0  }
   0x2   :  { %s1365_s28 = smov 0  }
   0x3 LB: > { %s27_s29 = sadd.s32 1, %s1306_s26  ;;  %s30_s30 = sadd.s32 1, %s1310_s27  ;;  %s1314_s28 = sphi %s1365_s28, %s18_s28   ;;  %s1310_s27 = sphi %s1363_s27, %s1997_s27   ;;  %s1306_s26 = sphi %s1361_s26, %s1996_s26   ;;  %s1302_s25 = sphi %s1359_s25, %s1995_s25   ;;  %s1298_s24 = sphi %s1357_s24, %s1994_s24  }
   0x4   : > { %p28_p0 = scmp.ge.s32.totalorder %s27_s29, 16  ;;  %p1076_p1 = scmp.ge.s32.totalorder %s1314_s28, 1 }
   0x5   : > { %p302_p2 = scmp.lt.s32.totalorder %s1314_s28, 33 }
   0x6   : > { %s1999_s29 = smov (%p28_p0, %s27_s29), 0  ;;  %s2001_s30 = smov (!%p28_p0, %s30_s30), %s1310_s27 }
   0x7   : > { %p303_p3 = pnand %p1076_p1, %p302_p2  ;;  %p32_p4 = scmp.ge.s32.totalorder %s2001_s30, 2 }
   0x8   : > { %p368_p5 = scmp.lt.s32.totalorder (!%p303_p3), %s1302_s25, 1  ;;  %p370_p6 = scmp.lt.s32.totalorder (!%p303_p3), %s1298_s24, 17 }
   0x9   : > { %s2003_s30 = smov (%p32_p4, %s2001_s30), 0  ;;  %306 = sbr.rel (%p303_p3) target bundleno = 267 (0x10b), region = 40 }
   0xa   : > { %s377_s15 = sadd.s32 (!%p303_p3), 1, %s1298_s24  ;;  %p401_p9 = scmp.lt.s32.totalorder (!%p303_p3), %s1298_s24, 15 }
   0xb   : > { %p1605_p7 = scmp.lt.s32.totalorder (!%p303_p3), %s377_s15, 17  ;;  %p1211_p10 = scmp.ne.s32.totalorder (!%p303_p3), %s1298_s24, 0 }
   0xe   : > { %v1098_v0 = vld [vmem:[%s1987_s3 + $0xf8] sm:$0xff]  ;;  %v1097_v2 = vld [vmem:[%s1987_s3 + $0xf0] sm:$0xff]  ;;  %v1096_v5 = vld [vmem:[%s1987_s3 + $0xe8] sm:$0xff]  ;;  %s2005_s25 = smov (!%p368_p5, %s1302_s25), 1  ;;  %s2007_s15 = smov (!%p1605_p7, %s377_s15), 17  ;;  %vm524_vm0 = vcmask 1045504  }
   0xf   : > { %v432_v1 = vld [vmem:[%s1987_s3 + $0x78] sm:$0xff]  ;;  %461 = vmatpush.msra.mxu0 %v1098_v0  ;;  %v431_v3 = vld [vmem:[%s1987_s3 + $0x70] sm:$0xff]  ;;  %v430_v6 = vld [vmem:[%s1987_s3 + $0x68] sm:$0xff]  ;;  %s1434_s20 = scalar_lea.vmem %s1990_s6, %s2005_s25  ;;  %s1446_s11 = scalar_lea.vmem %s1991_s7, %s2005_s25  ;;  %vm453_vm1 = vcmask 1046528  }
  0x10   : > { %484 = vmatpush.msra.mxu1 %v432_v1  ;;  %v1114_v4 = vld [vmem:[%s1987_s3 + $0x178] sm:$0xff]  ;;  %v1113_v7 = vld [vmem:[%s1987_s3 + $0x170] sm:$0xff]  ;;  %v1112_v9 = vld [vmem:[%s1987_s3 + $0x168] sm:$0xff]  ;;  %s1560_s14 = scalar_select %p370_p6, %s1298_s24, 17 }
  0x11   : > { %532 = vmatpush.msra.mxu2 %v1114_v4  ;;  %v1130_v8 = vld [vmem:[%s1987_s3 + $0x1f8] sm:$0xff]  ;;  %462 = vmatpush.msra.mxu0 %v1097_v2  ;;  %v1095_v10 = vld [vmem:[%s1987_s3 + $0xe0] sm:$0xff]  ;;  %v1129_v12 = vld [vmem:[%s1987_s3 + $0x1f0] sm:$0xff]  ;;  %s1581_s13 = smul.u32 54, %s2005_s25 }
  0x12   : > { %485 = vmatpush.msra.mxu1 %v431_v3  ;;  %577 = vmatpush.msra.mxu3 %v1130_v8  ;;  %v429_v11 = vld [vmem:[%s1987_s3 + $0x60] sm:$0xff]  ;;  %v1128_v14 = vld [vmem:[%s1987_s3 + $0x1e8] sm:$0xff]  ;;  %v1094_v15 = vld [vmem:[%s1987_s3 + $0xd8] sm:$0xff]  ;;  %s1230_s21 = smul.u32 3, %s1560_s14  ;;  %s388_s14 = sadd.s32 2, %s1298_s24 }
  0x13   : > { %533 = vmatpush.msra.mxu2 %v1113_v7  ;;  %463 = vmatpush.msra.mxu0 %v1096_v5  ;;  %v1111_v13 = vld [vmem:[%s1987_s3 + $0x160] sm:$0xff]  ;;  %v428_v16 = vld [vmem:[%s1987_s3 + $0x58] sm:$0xff]  ;;  %v1093_v19 = vld [vmem:[%s1987_s3 + $0xd0] sm:$0xff]  ;;  %s1232_s9 = smul.u32 3, %s2007_s15  ;;  %p1712_p8 = scmp.lt.s32.totalorder %s388_s14, 17 }
  0x14   : > { %486 = vmatpush.msra.mxu1 %v430_v6  ;;  %578 = vmatpush.msra.mxu3 %v1129_v12  ;;  %v1110_v17 = vld [vmem:[%s1987_s3 + $0x158] sm:$0xff]  ;;  %v1127_v18 = vld [vmem:[%s1987_s3 + $0x1e0] sm:$0xff]  ;;  %v427_v20 = vld [vmem:[%s1987_s3 + $0x50] sm:$0xff]  ;;  %s374_s16 = sadd.s32 %s1581_s13, %s1230_s21 }
  0x15   : > { %534 = vmatpush.msra.mxu2 %v1112_v9  ;;  %464 = vmatpush.msra.mxu0 %v1095_v10  ;;  %v1109_v21 = vld [vmem:[%s1987_s3 + $0x150] sm:$0xff]  ;;  %v1126_v22 = vld [vmem:[%s1987_s3 + $0x1d8] sm:$0xff]  ;;  %v1092_v23 = vld [vmem:[%s1987_s3 + $0xc8] sm:$0xff]  ;;  %s1077_s19 = sshll.u32 %s374_s16, 3  ;;  %s2009_s14 = smov (!%p1712_p8, %s388_s14), 17 }
  0x16   : > { %487 = vmatpush.msra.mxu1 %v429_v11  ;;  %579 = vmatpush.msra.mxu3 %v1128_v14  ;;  %v426_v24 = vld [vmem:[%s1987_s3 + $0x48] sm:$0xff]  ;;  %v1125_v26 = vld [vmem:[%s1987_s3 + $0x1d0] sm:$0xff]  ;;  %v1091_v27 = vld [vmem:[%s1987_s3 + $0xc0] sm:$0xff]  ;;  %s1667_s8 = scalar_lea.vmem %s1984_s0, %s1077_s19  ;;  %s1702_s19 = sadd.s32 %s1232_s9, %s1581_s13 }
  0x17   : > { %535 = vmatpush.msra.mxu2 %v1111_v13  ;;  %465 = vmatpush.msra.mxu0 %v1094_v15  ;;  %v1108_v25 = vld [vmem:[%s1987_s3 + $0x148] sm:$0xff]  ;;  %v425_v28 = vld [vmem:[%s1987_s3 + $0x40] sm:$0xff]  ;;  %v1090_v31 = vld [vmem:[%s1987_s3 + $0xb8] sm:$0xff]  ;;  %s1078_s10 = sshll.u32 %s1702_s19, 3  ;;  %s1233_s12 = smul.u32 3, %s2009_s14 }
  0x18   : > { %488 = vmatpush.msra.mxu1 %v428_v16  ;;  %580 = vmatpush.msra.mxu3 %v1127_v18  ;;  %v1107_v29 = vld [vmem:[%s1987_s3 + $0x140] sm:$0xff]  ;;  %v1124_v30 = vld [vmem:[%s1987_s3 + $0x1c8] sm:$0xff]  ;;  %v424_v32 = vld [vmem:[%s1987_s3 + $0x38] sm:$0xff]  ;;  %s1760_s17 = scalar_lea.vmem %s1985_s1, %s1078_s10  ;;  %s1081_s19 = sshll.u32 %s2005_s25, 5 }
  0x19   : > { %536 = vmatpush.msra.mxu2 %v1110_v17  ;;  %466 = vmatpush.msra.mxu0 %v1093_v19  ;;  %v1106_v33 = vld [vmem:[%s1987_s3 + $0x138] sm:$0xff]  ;;  %v1123_v34 = vld [vmem:[%s1987_s3 + $0x1c0] sm:$0xff]  ;;  %v1089_v35 = vld [vmem:[%s1987_s3 + $0xb0] sm:$0xff]  ;;  %s395_s22 = sadd.s32 %s1233_s12, %s1581_s13 }
  0x1a   : > { %489 = vmatpush.msra.mxu1 %v427_v20  ;;  %581 = vmatpush.msra.mxu3 %v1126_v22  ;;  %v423_v36 = vld [vmem:[%s1987_s3 + $0x30] sm:$0xff]  ;;  %v1122_v38 = vld [vmem:[%s1987_s3 + $0x1b8] sm:$0xff]  ;;  %v1088_v39 = vld [vmem:[%s1987_s3 + $0xa8] sm:$0xff]  ;;  %s1079_s21 = sshll.u32 %s395_s22, 3 }
  0x1b   : > { %537 = vmatpush.msra.mxu2 %v1109_v21  ;;  %467 = vmatpush.msra.mxu0 %v1092_v23  ;;  %v1105_v37 = vld [vmem:[%s1987_s3 + $0x130] sm:$0xff]  ;;  %v422_v40 = vld [vmem:[%s1987_s3 + $0x28] sm:$0xff]  ;;  %v1087_v43 = vld [vmem:[%s1987_s3 + $0xa0] sm:$0xff]  ;;  %s1845_s12 = scalar_lea.vmem %s1986_s2, %s1079_s21 }
  0x1c   : > { %490 = vmatpush.msra.mxu1 %v426_v24  ;;  %582 = vmatpush.msra.mxu3 %v1125_v26  ;;  %v1104_v41 = vld [vmem:[%s1987_s3 + $0x128] sm:$0xff]  ;;  %v1121_v42 = vld [vmem:[%s1987_s3 + $0x1b0] sm:$0xff]  ;;  %v421_v44 = vld [vmem:[%s1987_s3 + $0x20] sm:$0xff]  ;;  %s402_s16 = scalar_select %p401_p9, %s1298_s24, 15 }
  0x1d   : > { %538 = vmatpush.msra.mxu2 %v1108_v25  ;;  %468 = vmatpush.msra.mxu0 %v1091_v27  ;;  %v1103_v45 = vld [vmem:[%s1987_s3 + $0x120] sm:$0xff]  ;;  %v1120_v46 = vld [vmem:[%s1987_s3 + $0x1a8] sm:$0xff]  ;;  %v1086_v47 = vld [vmem:[%s1987_s3 + $0x98] sm:$0xff] }
  0x1e   : > { %491 = vmatpush.msra.mxu1 %v425_v28  ;;  %583 = vmatpush.msra.mxu3 %v1124_v30  ;;  %v420_v48 = vld [vmem:[%s1987_s3 + $0x18] sm:$0xff]  ;;  %v1119_v50 = vld [vmem:[%s1987_s3 + $0x1a0] sm:$0xff]  ;;  %v1085_v51 = vld [vmem:[%s1987_s3 + $0x90] sm:$0xff]  ;;  %s1080_s18 = sshll.u32 %s402_s16, 1 }
  0x1f   : > { %539 = vmatpush.msra.mxu2 %v1107_v29  ;;  %469 = vmatpush.msra.mxu0 %v1090_v31  ;;  %v1102_v49 = vld [vmem:[%s1987_s3 + $0x118] sm:$0xff]  ;;  %v419_v52 = vld [vmem:[%s1987_s3 + $0x10] sm:$0xff]  ;;  %v1084_v55 = vld [vmem:[%s1987_s3 + $0x88] sm:$0xff]  ;;  %s405_s15 = sadd.s32 %s1081_s19, %s1080_s18 }
  0x20   : > { %492 = vmatpush.msra.mxu1 %v424_v32  ;;  %584 = vmatpush.msra.mxu3 %v1123_v34  ;;  %v1101_v53 = vld [vmem:[%s1987_s3 + $0x110] sm:$0xff]  ;;  %v1118_v54 = vld [vmem:[%s1987_s3 + $0x198] sm:$0xff]  ;;  %v418_v56 = vld [vmem:[%s1987_s3 + $0x8] sm:$0xff] }
  0x21   : > { %540 = vmatpush.msra.mxu2 %v1106_v33  ;;  %470 = vmatpush.msra.mxu0 %v1089_v35  ;;  %v1100_v57 = vld [vmem:[%s1987_s3 + $0x108] sm:$0xff]  ;;  %v1117_v58 = vld [vmem:[%s1987_s3 + $0x190] sm:$0xff]  ;;  %v1083_v59 = vld [vmem:[%s1987_s3 + $0x80] sm:$0xff] }
  0x22   : > { %493 = vmatpush.msra.mxu1 %v423_v36  ;;  %585 = vmatpush.msra.mxu3 %v1122_v38  ;;  %v417_v60 = vld [vmem:[%s1987_s3] sm:$0xff]  ;;  %v1146_v61 = vld [vmem:[%s1987_s3 + $0x278] sm:$0xff]  ;;  %v1116_v0 = vld [vmem:[%s1987_s3 + $0x188] sm:$0xff] }
  0x23   : > { %541 = vmatpush.msra.mxu2 %v1105_v37  ;;  %471 = vmatpush.msra.mxu0 %v1088_v39  ;;  %v1162_v62 = vld [vmem:[%s1987_s3 + $0x2f8] sm:$0xff]  ;;  %v1099_v63 = vld [vmem:[%s1987_s3 + $0x100] sm:$0xff]  ;;  %v1145_v1 = vld [vmem:[%s1987_s3 + $0x270] sm:$0xff] }
  0x24   : > { %494 = vmatpush.msra.mxu1 %v422_v40  ;;  %586 = vmatpush.msra.mxu3 %v1121_v42  ;;  %v1161_v2 = vld [vmem:[%s1987_s3 + $0x2f0] sm:$0xff]  ;;  %v1178_v3 = vld [vmem:[%s1987_s3 + $0x378] sm:$0xff]  ;;  %v1115_v4 = vld [vmem:[%s1987_s3 + $0x180] sm:$0xff] }
  0x25   : > { %542 = vmatpush.msra.mxu2 %v1104_v41  ;;  %472 = vmatpush.msra.mxu0 %v1087_v43  ;;  %v1144_v5 = vld [vmem:[%s1987_s3 + $0x268] sm:$0xff]  ;;  %v1177_v7 = vld [vmem:[%s1987_s3 + $0x370] sm:$0xff]  ;;  %v1194_v8 = vld [vmem:[%s1987_s3 + $0x3f8] sm:$0xff] }
  0x26   : > { %495 = vmatpush.msra.mxu1 %v421_v44  ;;  %587 = vmatpush.msra.mxu3 %v1120_v46  ;;  %v1160_v6 = vld [vmem:[%s1987_s3 + $0x2e8] sm:$0xff]  ;;  %v1143_v9 = vld [vmem:[%s1987_s3 + $0x260] sm:$0xff]  ;;  %v1193_v12 = vld [vmem:[%s1987_s3 + $0x3f0] sm:$0xff] }
  0x27   : > { %543 = vmatpush.msra.mxu2 %v1103_v45  ;;  %473 = vmatpush.msra.mxu0 %v1086_v47  ;;  %v1159_v10 = vld [vmem:[%s1987_s3 + $0x2e0] sm:$0xff]  ;;  %v1176_v11 = vld [vmem:[%s1987_s3 + $0x368] sm:$0xff]  ;;  %v1142_v13 = vld [vmem:[%s1987_s3 + $0x258] sm:$0xff] }
  0x28   : > { %496 = vmatpush.msra.mxu1 %v420_v48  ;;  %588 = vmatpush.msra.mxu3 %v1119_v50  ;;  %v1158_v14 = vld [vmem:[%s1987_s3 + $0x2d8] sm:$0xff]  ;;  %v1175_v15 = vld [vmem:[%s1987_s3 + $0x360] sm:$0xff]  ;;  %v1192_v16 = vld [vmem:[%s1987_s3 + $0x3e8] sm:$0xff] }
  0x29   : > { %544 = vmatpush.msra.mxu2 %v1102_v49  ;;  %474 = vmatpush.msra.mxu0 %v1085_v51  ;;  %v1141_v17 = vld [vmem:[%s1987_s3 + $0x250] sm:$0xff]  ;;  %v1174_v19 = vld [vmem:[%s1987_s3 + $0x358] sm:$0xff]  ;;  %v1191_v20 = vld [vmem:[%s1987_s3 + $0x3e0] sm:$0xff] }
  0x2a   : > { %497 = vmatpush.msra.mxu1 %v419_v52  ;;  %589 = vmatpush.msra.mxu3 %v1118_v54  ;;  %v1157_v18 = vld [vmem:[%s1987_s3 + $0x2d0] sm:$0xff]  ;;  %v1690_v21 = vld [vmem:[%s1667_s8] sm:$0xff]  ;;  %v1693_v22 = vld [vmem:[%s1667_s8 + $0x8] sm:$0xff] }
  0x2b   : > { %545 = vmatpush.msra.mxu2 %v1101_v53  ;;  %475 = vmatpush.msra.mxu0 %v1084_v55  ;;  %v1140_v23 = vld [vmem:[%s1987_s3 + $0x248] sm:$0xff]  ;;  %v1173_v25 = vld [vmem:[%s1987_s3 + $0x350] sm:$0xff]  ;;  %v1190_v26 = vld [vmem:[%s1987_s3 + $0x3d8] sm:$0xff]  ;;  %v525_v29 = vrot.slane %v1690_v21, 2  ;;  %v526_v30 = vrot.slane %v1693_v22, 2  ;;  %v454_v35 = vrot.slane %v1690_v21, 1 }
  0x2c   : > { %498 = vmatpush.msra.mxu1 %v418_v56  ;;  %590 = vmatpush.msra.mxu3 %v1117_v58  ;;  %v1156_v24 = vld [vmem:[%s1987_s3 + $0x2c8] sm:$0xff]  ;;  %v1139_v27 = vld [vmem:[%s1987_s3 + $0x240] sm:$0xff]  ;;  %v1189_v32 = vld [vmem:[%s1987_s3 + $0x3d0] sm:$0xff]  ;;  %v455_v36 = vrot.slane %v1693_v22, 1 }
  0x2d   : > { %546 = vmatpush.msra.mxu2 %v1100_v57  ;;  %476 = vmatpush.msra.mxu0 %v1083_v59  ;;  %v1155_v28 = vld [vmem:[%s1987_s3 + $0x2c0] sm:$0xff]  ;;  %v1172_v31 = vld [vmem:[%s1987_s3 + $0x348] sm:$0xff]  ;;  %v1138_v33 = vld [vmem:[%s1987_s3 + $0x238] sm:$0xff]  ;;  %v527_v39 = vsel %vm524_vm0, %v525_v29, %v526_v30 }
  0x2e   : > { %499 = vmatpush.msra.mxu1 %v417_v60  ;;  %591 = vmatpush.msra.mxu3 %v1116_v0  ;;  %v1154_v34 = vld [vmem:[%s1987_s3 + $0x2b8] sm:$0xff]  ;;  %v1171_v37 = vld [vmem:[%s1987_s3 + $0x340] sm:$0xff]  ;;  %v1188_v38 = vld [vmem:[%s1987_s3 + $0x3c8] sm:$0xff]  ;;  %v456_v44 = vsel %vm453_vm1, %v454_v35, %v455_v36 }
  0x2f   : > { %629 = vmatpush.msrb.mxu0 %v1146_v61  ;;  %547 = vmatpush.msra.mxu2 %v1099_v63  ;;  %v1137_v40 = vld [vmem:[%s1987_s3 + $0x230] sm:$0xff]  ;;  %v1170_v42 = vld [vmem:[%s1987_s3 + $0x338] sm:$0xff]  ;;  %v1187_v43 = vld [vmem:[%s1987_s3 + $0x3c0] sm:$0xff] }
  0x30   : > { %678 = vmatpush.msrb.mxu1 %v1162_v62  ;;  %592 = vmatpush.msra.mxu3 %v1115_v4  ;;  %v1153_v41 = vld [vmem:[%s1987_s3 + $0x2b0] sm:$0xff]  ;;  %v1775_v45 = vld [vmem:[%s1760_s17] sm:$0xff]  ;;  %v1136_v46 = vld [vmem:[%s1987_s3 + $0x228] sm:$0xff] }
  0x31   : > { %630 = vmatpush.msrb.mxu0 %v1145_v1  ;;  %723 = vmatpush.msrb.mxu2 %v1178_v3  ;;  %v416_v47 = vld [vmem:[%s1667_s8 + $0x10] sm:$0x3]  ;;  %v1152_v48 = vld [vmem:[%s1987_s3 + $0x2a8] sm:$0xff]  ;;  %v1186_v50 = vld [vmem:[%s1987_s3 + $0x3b8] sm:$0xff]  ;;  %s1082_s8 = sshll.u32 %s405_s15, 3 }
  0x32   : > { %679 = vmatpush.msrb.mxu1 %v1161_v2  ;;  %775 = vmatpush.msrb.mxu3 %v1194_v8  ;;  %v1169_v49 = vld [vmem:[%s1987_s3 + $0x330] sm:$0xff]  ;;  %v1135_v51 = vld [vmem:[%s1987_s3 + $0x220] sm:$0xff]  ;;  %v528_v53 = vrot.slane %v416_v47, 2  ;;  %v1168_v54 = vld [vmem:[%s1987_s3 + $0x328] sm:$0xff]  ;;  %v457_v58 = vrot.slane %v416_v47, 1 }
  0x33   : > { %631 = vmatpush.msrb.mxu0 %v1144_v5  ;;  %724 = vmatpush.msrb.mxu2 %v1177_v7  ;;  %v1151_v52 = vld [vmem:[%s1987_s3 + $0x2a0] sm:$0xff]  ;;  %v1185_v55 = vld [vmem:[%s1987_s3 + $0x3b0] sm:$0xff]  ;;  %v1134_v56 = vld [vmem:[%s1987_s3 + $0x218] sm:$0xff] }
  0x34   : > { %680 = vmatpush.msrb.mxu1 %v1160_v6  ;;  %776 = vmatpush.msrb.mxu3 %v1193_v12  ;;  %v1150_v57 = vld [vmem:[%s1987_s3 + $0x298] sm:$0xff]  ;;  %v1167_v59 = vld [vmem:[%s1987_s3 + $0x320] sm:$0xff]  ;;  %v1184_v60 = vld [vmem:[%s1987_s3 + $0x3a8] sm:$0xff]  ;;  %v529_v61 = vsel %vm524_vm0, %v526_v30, %v528_v53  ;;  %v458_v2 = vsel %vm453_vm1, %v455_v36, %v457_v58 }
  0x35   : > { %632 = vmatpush.msrb.mxu0 %v1143_v9  ;;  %725 = vmatpush.msrb.mxu2 %v1176_v11  ;;  %v1133_v62 = vld [vmem:[%s1987_s3 + $0x210] sm:$0xff]  ;;  %v1166_v0 = vld [vmem:[%s1987_s3 + $0x318] sm:$0xff]  ;;  %v1183_v1 = vld [vmem:[%s1987_s3 + $0x3a0] sm:$0xff] }
  0x36   : > { %681 = vmatpush.msrb.mxu1 %v1159_v10  ;;  %777 = vmatpush.msrb.mxu3 %v1192_v16  ;;  %v1149_v63 = vld [vmem:[%s1987_s3 + $0x290] sm:$0xff]  ;;  %v1837_v3 = vld [vmem:[%s1760_s17 + $0x8] sm:$0xff]  ;;  %v1182_v7 = vld [vmem:[%s1987_s3 + $0x398] sm:$0xff] }
  0x37   : > { %633 = vmatpush.msrb.mxu0 %v1142_v13  ;;  %726 = vmatpush.msrb.mxu2 %v1175_v15  ;;  %v1132_v4 = vld [vmem:[%s1987_s3 + $0x208] sm:$0xff]  ;;  %v1165_v6 = vld [vmem:[%s1987_s3 + $0x310] sm:$0xff]  ;;  %v1131_v8 = vld [vmem:[%s1987_s3 + $0x200] sm:$0xff]  ;;  %v622_v15 = vrot.slane %v1775_v45, 1  ;;  %v623_v16 = vrot.slane %v1837_v3, 1 }
  0x38   : > { %682 = vmatpush.msrb.mxu1 %v1158_v14  ;;  %778 = vmatpush.msrb.mxu3 %v1191_v20  ;;  %v1148_v5 = vld [vmem:[%s1987_s3 + $0x288] sm:$0xff]  ;;  %v1147_v9 = vld [vmem:[%s1987_s3 + $0x280] sm:$0xff]  ;;  %v1181_v13 = vld [vmem:[%s1987_s3 + $0x390] sm:$0xff] }
  0x39   : > { %634 = vmatpush.msrb.mxu0 %v1141_v17  ;;  %727 = vmatpush.msrb.mxu2 %v1174_v19  ;;  %v1864_v10 = vld [vmem:[%s1845_s12] sm:$0xff]  ;;  %v1867_v11 = vld [vmem:[%s1845_s12 + $0x8] sm:$0xff]  ;;  %v1210_v14 = vld [vmem:[%s1987_s3 + $0x478] sm:$0xff] }
  0x3a   : > { %683 = vmatpush.msrb.mxu1 %v1157_v18  ;;  %779 = vmatpush.msrb.mxu3 %v1190_v26  ;;  %v1164_v12 = vld [vmem:[%s1987_s3 + $0x308] sm:$0xff]  ;;  %v1163_v17 = vld [vmem:[%s1987_s3 + $0x300] sm:$0xff]  ;;  %v768_v19 = vrot.slane %v1864_v10, 1  ;;  %v769_v20 = vrot.slane %v1867_v11, 1  ;;  %v624_v26 = vsel %vm453_vm1, %v622_v15, %v623_v16  ;;  %v559_v29 = vld [vmem:[%s1760_s17 + $0x10] sm:$0x3] }
  0x3b   : > { %635 = vmatpush.msrb.mxu0 %v1140_v23  ;;  %728 = vmatpush.msrb.mxu2 %v1173_v25  ;;  %v1180_v18 = vld [vmem:[%s1987_s3 + $0x388] sm:$0xff]  ;;  %v672_v23 = vrot.slane %v1837_v3, 2  ;;  %v705_v30 = vld [vmem:[%s1845_s12 + $0x10] sm:$0x3]  ;;  %v674_v36 = vrot.slane %v559_v29, 2  ;;  %s407_s12 = scalar_lea.vmem %s1989_s5, %s1082_s8 }
  0x3c   : > { %684 = vmatpush.msrb.mxu1 %v1156_v24  ;;  %780 = vmatpush.msrb.mxu3 %v1189_v32  ;;  %v1179_v24 = vld [vmem:[%s1987_s3 + $0x380] sm:$0xff]  ;;  %v1208_v25 = vld [vmem:[%s1987_s3 + $0x468] sm:$0xff]  ;;  %v1206_v32 = vld [vmem:[%s1987_s3 + $0x458] sm:$0xff] }
  0x3d   : > { %636 = vmatpush.msrb.mxu0 %v1139_v27  ;;  %729 = vmatpush.msrb.mxu2 %v1172_v31  ;;  %v770_v27 = vsel %vm453_vm1, %v768_v19, %v769_v20  ;;  %v1205_v35 = vld [vmem:[%s1987_s3 + $0x450] sm:$0xff] }
  0x3e   : > { %685 = vmatpush.msrb.mxu1 %v1155_v28  ;;  %781 = vmatpush.msrb.mxu3 %v1188_v38  ;;  %v1207_v28 = vld [vmem:[%s1987_s3 + $0x460] sm:$0xff]  ;;  %v1197_v47 = vld [vmem:[%s1987_s3 + $0x410] sm:$0xff] }
  0x3f   : > { %637 = vmatpush.msrb.mxu0 %v1138_v33  ;;  %730 = vmatpush.msrb.mxu2 %v1171_v37  ;;  %v625_v33 = vrot.slane %v559_v29, 1  ;;  %v1204_v37 = vld [vmem:[%s1987_s3 + $0x448] sm:$0xff] }
  0x40   : > { %686 = vmatpush.msrb.mxu1 %v1154_v34  ;;  %548 = vmatmul.f32.vlgmr.msra.gmra.mxu2 %v527_v39  ;;  %v771_v34 = vrot.slane %v705_v30, 1 }
  0x41   : > { %638 = vmatpush.msrb.mxu0 %v1137_v40  ;;  %731 = vmatpush.msrb.mxu2 %v1170_v42  ;;  %v626_v38 = vsel %vm453_vm1, %v623_v16, %v625_v33  ;;  %v1203_v40 = vld [vmem:[%s1987_s3 + $0x440] sm:$0xff]  ;;  %v1202_v42 = vld [vmem:[%s1987_s3 + $0x438] sm:$0xff] }
  0x42   : > { %687 = vmatpush.msrb.mxu1 %v1153_v41  ;;  %782 = vmatpush.msrb.mxu3 %v1187_v43  ;;  %v772_v39 = vsel %vm453_vm1, %v769_v20, %v771_v34  ;;  %v675_v41 = vsel %vm524_vm0, %v672_v23, %v674_v36  ;;  %v1201_v43 = vld [vmem:[%s1987_s3 + $0x430] sm:$0xff] }
  0x43   : > { %477 = vmatmul.f32.vlgmr.msra.gmra.mxu0 %v456_v44  ;;  %593 = vmatmul.f32.vlgmr.msra.gmra.mxu3 %v1775_v45  ;;  %v1200_v44 = vld [vmem:[%s1987_s3 + $0x428] sm:$0xff] }
  0x44   : > { %639 = vmatpush.msrb.mxu0 %v1136_v46  ;;  %688 = vmatpush.msrb.mxu1 %v1152_v48  ;;  %v1198_v46 = vld [vmem:[%s1987_s3 + $0x418] sm:$0xff]  ;;  %v817_v48 = vrot.slane %v1864_v10, 2 }
  0x45   : > { %732 = vmatpush.msrb.mxu2 %v1169_v49  ;;  %783 = vmatpush.msrb.mxu3 %v1186_v50  ;;  %v820_v49 = vrot.slane %v705_v30, 2  ;;  %v818_v50 = vrot.slane %v1867_v11, 2 }
  0x46   : > { %500 = vmatmul.f32.vlgmr.msra.gmra.mxu1 %v1690_v21  ;;  %640 = vmatpush.msrb.mxu0 %v1135_v51  ;;  %v1209_v21 = vld [vmem:[%s1987_s3 + $0x470] sm:$0xff]  ;;  %v1196_v51 = vld [vmem:[%s1987_s3 + $0x408] sm:$0xff] }
  0x47   : > { %689 = vmatpush.msrb.mxu1 %v1151_v52  ;;  %733 = vmatpush.msrb.mxu2 %v1168_v54  ;;  %v1195_v52 = vld [vmem:[%s1987_s3 + $0x400] sm:$0xff]  ;;  %v819_v53 = vsel %vm524_vm0, %v817_v48, %v818_v50  ;;  %v821_v54 = vsel %vm524_vm0, %v818_v50, %v820_v49 }
  0x48   : > { %784 = vmatpush.msrb.mxu3 %v1185_v55  ;;  %641 = vmatpush.msrb.mxu0 %v1134_v56 }
  0x49   : > { %690 = vmatpush.msrb.mxu1 %v1150_v57  ;;  %734 = vmatpush.msrb.mxu2 %v1167_v59 }
  0x4a   : > { %785 = vmatpush.msrb.mxu3 %v1184_v60  ;;  %551 = vmatmul.f32.gmra.mxu2 %v529_v61 }
  0x4b   : > { %642 = vmatpush.msrb.mxu0 %v1133_v62  ;;  %691 = vmatpush.msrb.mxu1 %v1149_v63 }
  0x4c   : > { %735 = vmatpush.msrb.mxu2 %v1166_v0  ;;  %786 = vmatpush.msrb.mxu3 %v1183_v1 }
  0x4d   : > { %480 = vmatmul.f32.gmra.mxu0 %v458_v2  ;;  %596 = vmatmul.f32.gmra.mxu3 %v1837_v3 }
  0x4e   : > { %643 = vmatpush.msrb.mxu0 %v1132_v4  ;;  %692 = vmatpush.msrb.mxu1 %v1148_v5 }
  0x4f   : > { %736 = vmatpush.msrb.mxu2 %v1165_v6  ;;  %787 = vmatpush.msrb.mxu3 %v1182_v7 }
  0x50   : > { %503 = vmatmul.f32.gmra.mxu1 %v1693_v22  ;;  %644 = vmatpush.msrb.mxu0 %v1131_v8  ;;  %v671_v22 = vrot.slane %v1775_v45, 2  ;;  %v1199_v45 = vld [vmem:[%s1987_s3 + $0x420] sm:$0xff] }
  0x51   : > { %693 = vmatpush.msrb.mxu1 %v1147_v9  ;;  %737 = vmatpush.msrb.mxu2 %v1164_v12 }
  0x52   : > { %788 = vmatpush.msrb.mxu3 %v1181_v13  ;;  %824 = vmatpush.msra.mxu0 %v1210_v14  ;;  %v673_v31 = vsel %vm524_vm0, %v671_v22, %v672_v23 }
  0x53   : > { %1214 = vmatpush.msra.mxu1 %v1210_v14  ;;  %738 = vmatpush.msrb.mxu2 %v1163_v17 }
  0x54   : > { %789 = vmatpush.msrb.mxu3 %v1180_v18  ;;  %825 = vmatpush.msra.mxu0 %v1209_v21 }
  0x55   : > { %1215 = vmatpush.msra.mxu1 %v1209_v21  ;;  %739 = vmatmul.f32.vlgmr.msrb.gmra.mxu2 %v1864_v10  ;;  %v1275_v21 = vld [vmem:[%s1988_s4] ss:$0 sm:$0xff] }
  0x56   : > { %790 = vmatpush.msrb.mxu3 %v1179_v24  ;;  %826 = vmatpush.msra.mxu0 %v1208_v25 }
  0x57   : > { %1216 = vmatpush.msra.mxu1 %v1208_v25  ;;  %645 = vmatmul.f32.vlgmr.msrb.gmra.mxu0 %v624_v26 }
  0x58   : > { %791 = vmatmul.f32.vlgmr.msrb.gmra.mxu3 %v770_v27  ;;  %827 = vmatpush.msra.mxu0 %v1207_v28 }
  0x59   : > { %1217 = vmatpush.msra.mxu1 %v1207_v28 }
  0x5a   : > { %694 = vmatmul.f32.vlgmr.msrb.gmra.mxu1 %v673_v31  ;;  %828 = vmatpush.msra.mxu0 %v1206_v32 }
  0x5b   : > { %1218 = vmatpush.msra.mxu1 %v1206_v32 }
  0x5c   : > { %829 = vmatpush.msra.mxu0 %v1205_v35 }
  0x5d   : > { %1219 = vmatpush.msra.mxu1 %v1205_v35  ;;  %742 = vmatmul.f32.gmra.mxu2 %v1867_v11 }
  0x5e   : > { %830 = vmatpush.msra.mxu0 %v1204_v37 }
  0x5f   : > { %1220 = vmatpush.msra.mxu1 %v1204_v37  ;;  %648 = vmatmul.f32.gmra.mxu0 %v626_v38 }
  0x60   : > { %794 = vmatmul.f32.gmra.mxu3 %v772_v39  ;;  %831 = vmatpush.msra.mxu0 %v1203_v40 }
  0x61   : > { %1221 = vmatpush.msra.mxu1 %v1203_v40 }
  0x62   : > { %697 = vmatmul.f32.gmra.mxu1 %v675_v41  ;;  %832 = vmatpush.msra.mxu0 %v1202_v42 }
  0x63   : > { %1222 = vmatpush.msra.mxu1 %v1202_v42 }
  0x64   : > { %833 = vmatpush.msra.mxu0 %v1201_v43 }
  0x65   : > { %1223 = vmatpush.msra.mxu1 %v1201_v43 }
  0x66   : > { %834 = vmatpush.msra.mxu0 %v1200_v44 }
  0x67   : > { %1224 = vmatpush.msra.mxu1 %v1200_v44 }
  0x68   : > { %835 = vmatpush.msra.mxu0 %v1199_v45 }
  0x69   : > { %1225 = vmatpush.msra.mxu1 %v1199_v45 }
  0x6a   : > { %836 = vmatpush.msra.mxu0 %v1198_v46 }
  0x6b   : > { %1226 = vmatpush.msra.mxu1 %v1198_v46 }
  0x6c   : > { %837 = vmatpush.msra.mxu0 %v1197_v47 }
  0x6d   : > { %1227 = vmatpush.msra.mxu1 %v1197_v47 }
  0x6e   : > { %838 = vmatpush.msra.mxu0 %v1196_v51 }
  0x6f   : > { %1228 = vmatpush.msra.mxu1 %v1196_v51 }
  0x70   : > { %839 = vmatpush.msra.mxu0 %v1195_v52 }
  0x71   : > { %1229 = vmatpush.msra.mxu1 %v1195_v52  ;;  %840 = vmatmul.f32.vlgmr.msra.gmra.mxu0 %v819_v53 }
  0x72   : > { %843 = vmatmul.f32.vlgmr.msra.gmra.mxu1 %v821_v54 }
  0xc0   : > { %v478_v55 = vpop.f32.mrf.mxu0 }
  0xc3   : > { %v501_v56 = vpop.f32.mrf.mxu1  ;;  %v549_v57 = vpop.f32.mrf.mxu2 }
  0xc4   : > { %v502_v63 = vadd.f32 %v501_v56, %v478_v55 }
  0xc6   : > { %v594_v59 = vpop.f32.mrf.mxu3  ;;  %v555_v3 = vadd.f32 %v549_v57, %v502_v63 }
  0xc8   : > { %v600_v6 = vadd.f32 %v594_v59, %v555_v3 }
  0xca   : > { %v481_v58 = vpop.f32.mrf.mxu0 }
  0xcd   : > { %v504_v60 = vpop.f32.mrf.mxu1  ;;  %v552_v61 = vpop.f32.mrf.mxu2 }
  0xce   : > { %v505_v0 = vadd.f32 %v504_v60, %v481_v58 }
  0xd0   : > { %v597_v1 = vpop.f32.mrf.mxu3  ;;  %v556_v4 = vadd.f32 %v552_v61, %v505_v0 }
  0xd2   : > { %v601_v7 = vadd.f32 %v597_v1, %v556_v4 }
  0xd4   : > { %v646_v62 = vpop.f32.mrf.mxu0 }
  0xd5   : > { %v652_v10 = vadd.f32 %v646_v62, %v600_v6 }
  0xd7   : > { %v695_v2 = vpop.f32.mrf.mxu1 }
  0xd8   : > { %v740_v5 = vpop.f32.mrf.mxu2  ;;  %v701_v13 = vadd.f32 %v695_v2, %v652_v10 }
  0xda   : > { %v746_v16 = vadd.f32 %v740_v5, %v701_v13 }
  0xdb   : > { %v792_v9 = vpop.f32.mrf.mxu3 }
  0xdc   : > { %v649_v8 = vpop.f32.mrf.mxu0  ;;  %v798_v19 = vadd.f32 %v792_v9, %v746_v16 }
  0xdd   : > { %v653_v11 = vadd.f32 %v649_v8, %v601_v7 }
  0xdf   : > { %v698_v12 = vpop.f32.mrf.mxu1 }
  0xe0   : > { %v702_v14 = vadd.f32 %v698_v12, %v653_v11  ;;  %v743_v15 = vpop.f32.mrf.mxu2 }
  0xe2   : > { %v747_v17 = vadd.f32 %v743_v15, %v702_v14 }
  0xe3   : > { %v795_v18 = vpop.f32.mrf.mxu3 }
  0xe4   : > { %v799_v20 = vadd.f32 %v795_v18, %v747_v17 }
  0xee   : > { %v841_v22 = vpop.f32.mrf.mxu0 }
  0xef   : > { %v844_v23 = vpop.f32.mrf.mxu1  ;;  %v847_v24 = vadd.f32 %v841_v22, %v798_v19 }
  0xf0   : > { %v848_v25 = vadd.f32 %v844_v23, %v799_v20  ;;  %860 = sbr.rel (%p1211_p10) target bundleno = 248 (0xf8), region = 44 }
  0xf1   : > { %v853_v26 = vadd.f32 %v1275_v21, %v847_v24 }
  0xf2   : > { %v854_v27 = vadd.f32 %v1275_v21, %v848_v25 }
  0xf3   : > { %855 = vst [vmem:[%s407_s12] sm:$0xff] %v853_v26 }
  0xf4   : > { %856 = vst [vmem:[%s407_s12 + $0x8] sm:$0xff] %v854_v27 }
  0xf5   : > { %v1316_v28 = vmov 0.0  }
  0xf6   : > { %861 = vst [vmem:[%s1434_s20] sm:$0x1] %v1316_v28 }
  0xf7   : > { %862 = vst [vmem:[%s1446_s11] sm:$0x1] %v1316_v28 }
  0xf8 PF: > { %v864_v29 = vadd.f32 %v854_v27, %v853_v26  ;;  %v874_v30 = vmul.f32 %v853_v26, %v853_v26  ;;  %v875_v31 = vmul.f32 %v854_v27, %v854_v27 }
  0xfa   : > { %v865_v32 = vrot.slane %v864_v29, 4  ;;  %v876_v33 = vadd.f32 %v875_v31, %v874_v30 }
  0xfc   : > { %v866_v34 = vadd.f32 %v865_v32, %v864_v29  ;;  %v877_v35 = vrot.slane %v876_v33, 4 }
  0xfd   : > { %v863_v42 = vld [vmem:[%s1434_s20] sm:$0x1] }
  0xfe   : > { %v867_v36 = vrot.slane %v866_v34, 2  ;;  %v878_v37 = vadd.f32 %v877_v35, %v876_v33  ;;  %v873_v45 = vld [vmem:[%s1446_s11] sm:$0x1] }
 0x100   : > { %v868_v38 = vadd.f32 %v867_v36, %v866_v34  ;;  %v879_v39 = vrot.slane %v878_v37, 2 }
 0x102   : > { %v869_v40 = vrot.slane %v868_v38, 1  ;;  %v880_v41 = vadd.f32 %v879_v39, %v878_v37 }
 0x104   : > { %v870_v43 = vadd.f32 %v869_v40, %v868_v38  ;;  %v881_v44 = vrot.slane %v880_v41, 1 }
 0x106   : > { %v871_v46 = vadd.f32 %v870_v43, %v863_v42  ;;  %v882_v47 = vadd.f32 %v881_v44, %v880_v41 }
 0x108   : > { %872 = vst [vmem:[%s1434_s20] sm:$0x1] %v871_v46  ;;  %v883_v48 = vadd.f32 %v882_v47, %v873_v45 }
 0x10a   : > { %884 = vst [vmem:[%s1446_s11] sm:$0x1] %v883_v48 }
 0x10b PF: > { %s18_s28 = sadd.s32 1, %s1314_s28   ;;  %s1994_s24 = smov %s1306_s26 }
 0x10c   : > { %p15_p11 = scmp.ge.s32.totalorder %s18_s28, 34   ;;  %s1995_s25 = smov %s1310_s27 }
 0x10d   : > { %s1996_s26 = smov %s1999_s29  ;;  %s1997_s27 = smov %s2003_s30 }
 0x10e   :  { %17 = sbr.rel (!%p15_p11) target bundleno = 3 (0x3), region = 112 }

</bundles_post_ra>
